<compile_context>
chip_gen: v5e
topology: v5e:2x2
jax: 0.10.0
libtpu: 0.0.40
codegen_flags: <defaults>
</compile_context>

<pallas_src>
import jax
import jax.numpy as jnp
from jax.experimental import pallas as pl
from jax.experimental.pallas import tpu as pltpu

EPS = 1e-5  # nn.BatchNorm2d default eps


def _round_up(x, m):
    return (x + m - 1) // m * m


def upsample_forward(x_nchw, params):
    w_conv, b_conv, gamma, beta, w_up, b_up = params
    del b_conv  # train-mode BatchNorm subtracts the batch mean -> conv bias cancels exactly

    N, Cin, H, W = x_nchw.shape
    Cout = w_conv.shape[0]
    Cout_p = _round_up(Cout, 32)       # 4*Cout_p is a multiple of 128 -> lane-dense deconv out
    Wp = W + 2                         # padded row width
    HW2 = H * Wp                       # conv rows per image (W valid + 2 junk cols per row)
    L = (H + 2) * Wp + 2               # flattened padded image rows (+2 so the last tap fits)

    # ---- glue (XLA): NCHW -> NHWC, zero-pad halo, flatten spatial so every 3x3 tap is a
    # contiguous row-range slice inside the kernel (row stride == Wp).  Input stays f32
    # (smallest stream); it is cast to bf16 right before the MXU inside the kernel.
    x = jnp.transpose(x_nchw, (0, 2, 3, 1)).astype(jnp.float32)            # (N, H, W, Cin)
    xp = jnp.pad(x, ((0, 0), (1, 1), (1, 1), (0, 0)))                      # (N, H+2, Wp, Cin)
    xflat = jnp.pad(xp.reshape(N, (H + 2) * Wp, Cin), ((0, 0), (0, 2), (0, 0)))  # (N, L, Cin)

    # Validity mask over the HW2 conv rows (0 for the two pad-column rows of each image row).
    valid = (jnp.arange(HW2) % Wp < W).astype(jnp.float32).reshape(HW2, 1)

    # ---- glue: parameter packing ----
    wc = jnp.transpose(w_conv, (2, 3, 1, 0)).reshape(9, Cin, Cout)          # (kh*3+kw, ci, co)
    wc = jnp.pad(wc, ((0, 0), (0, 0), (0, Cout_p - Cout))).astype(jnp.bfloat16)
    gamma_p = jnp.pad(gamma, (0, Cout_p - Cout)).astype(jnp.float32)
    beta_p = jnp.pad(beta, (0, Cout_p - Cout)).astype(jnp.float32)
    wu = jnp.transpose(w_up, (0, 2, 3, 1))                                  # (ci, di, dj, co)
    wu = jnp.pad(wu, ((0, Cout_p - Cout), (0, 0), (0, 0), (0, Cout_p - Cout)))
    wu = wu.reshape(Cout_p, 4 * Cout_p).astype(jnp.bfloat16)                # cols (di, dj, co)
    bu = jnp.tile(jnp.pad(b_up, (0, Cout_p - Cout)), 4).reshape(1, 4 * Cout_p).astype(jnp.float32)

    cparams = pltpu.CompilerParams(
        dimension_semantics=("parallel",),   # independent images -> pipelining + v7x megacore
        vmem_limit_bytes=32 * 1024 * 1024,
    )

    # ---------- Pass 1: in-kernel 3x3 conv (9 shifted-slice matmuls) + bf16 conv + stats ----
    def conv_stats_kernel(x_ref, wc_ref, msk_ref, conv_ref, stats_ref):
        # x_ref: (1, L, Cin) f32 flat padded image; wc_ref: (9, Cin, Cout_p) bf16
        acc = jnp.zeros((HW2, Cout_p), jnp.float32)
        for k in range(9):
            kh, kw = divmod(k, 3)
            off = kh * Wp + kw
            xs = x_ref[0, off:off + HW2, :].astype(jnp.bfloat16)            # (HW2, Cin)
            acc = acc + jnp.dot(xs, wc_ref[k], preferred_element_type=jnp.float32)
        convb = acc.astype(jnp.bfloat16)
        conv_ref[0] = convb                                                 # reused by pass 2
        # Per-channel partial sum / sum-of-squares of the *bf16-rounded* conv (exactly what
        # pass 2 normalizes), junk pad-column rows zeroed, reduced on the MXU via a
        # ones-row matmul; single fused (8, 2*Cout_p) output block (all 8 rows identical).
        c32 = convb.astype(jnp.float32) * msk_ref[...]
        ones = jnp.ones((8, HW2), jnp.float32)
        s1 = jnp.dot(ones, c32, preferred_element_type=jnp.float32)
        s2 = jnp.dot(ones, c32 * c32, preferred_element_type=jnp.float32)
        stats_ref[0] = jnp.concatenate([s1, s2], axis=-1)

    conv_act, stats = pl.pallas_call(
        conv_stats_kernel,
        out_shape=(
            jax.ShapeDtypeStruct((N, HW2, Cout_p), jnp.bfloat16),
            jax.ShapeDtypeStruct((N, 8, 2 * Cout_p), jnp.float32),
        ),
        grid=(N,),
        in_specs=[
            pl.BlockSpec((1, L, Cin), lambda n: (n, 0, 0)),
            pl.BlockSpec((9, Cin, Cout_p), lambda n: (0, 0, 0)),
            pl.BlockSpec((HW2, 1), lambda n: (0, 0)),
        ],
        out_specs=(
            pl.BlockSpec((1, HW2, Cout_p), lambda n: (n, 0, 0)),
            pl.BlockSpec((1, 8, 2 * Cout_p), lambda n: (n, 0, 0)),
        ),
        compiler_params=cparams,
    )(xflat, wc, valid)

    # ---- tiny cross-image combine (XLA): batch mean / var, fold the BN affine ----
    tot = stats[:, 0, :].sum(axis=0)                                        # (2*Cout_p,)
    cnt = float(N * H * W)
    mean = tot[:Cout_p] / cnt
    # NOTE: E[x^2] - mean^2 in f32 is cancellation-prone when |mean| >> std; acceptable here.
    var = jnp.maximum(tot[Cout_p:] / cnt - mean * mean, 0.0)                # biased (train mode)
    inv = jax.lax.rsqrt(var + EPS)
    s = (gamma_p * inv).reshape(1, Cout_p)
    t = (beta_p - mean * gamma_p * inv).reshape(1, Cout_p)

    # ---------- Pass 2: BN affine + ReLU + ConvTranspose2d(k=2, s=2) as one matmul ----------
    def deconv_kernel(conv_ref, s_ref, t_ref, wu_ref, bu_ref, out_ref):
        y = jnp.maximum(conv_ref[0].astype(jnp.float32) * s_ref[...] + t_ref[...], 0.0)
        o = jnp.dot(y.astype(jnp.bfloat16), wu_ref[...],
                    preferred_element_type=jnp.float32) + bu_ref[...]
        out_ref[0] = o.astype(jnp.bfloat16)                                 # bf16 output stream

    out_flat = pl.pallas_call(
        deconv_kernel,
        out_shape=jax.ShapeDtypeStruct((N, HW2, 4 * Cout_p), jnp.bfloat16),
        grid=(N,),
        in_specs=[
            pl.BlockSpec((1, HW2, Cout_p), lambda n: (n, 0, 0)),
            pl.BlockSpec((1, Cout_p), lambda n: (0, 0)),
            pl.BlockSpec((1, Cout_p), lambda n: (0, 0)),
            pl.BlockSpec((Cout_p, 4 * Cout_p), lambda n: (0, 0)),
            pl.BlockSpec((1, 4 * Cout_p), lambda n: (0, 0)),
        ],
        out_specs=pl.BlockSpec((1, HW2, 4 * Cout_p), lambda n: (n, 0, 0)),
        compiler_params=cparams,
    )(conv_act, s, t, wu, bu)

    # TODO(synk): BatchNorm2d running_mean / running_var buffer updates (training side effect)
    # are not produced; only the forward activations are returned.
    # TODO(synk): for very large H*W, tile rows with a 2-row halo (manual make_async_copy,
    # memory_space=pl.ANY) instead of one whole image per grid step.

    # ---- glue: drop junk pad-columns + channel padding, single transpose to NCHW ----
    out = out_flat.reshape(N, H, Wp, 2, 2, Cout_p)[:, :, :W]                # (N,H,W,di,dj,co)
    out = jnp.transpose(out, (0, 5, 1, 3, 2, 4))                            # (N,co,H,di,W,dj)
    out = out.reshape(N, Cout_p, 2 * H, 2 * W)[:, :Cout]
    return out.astype(jnp.float32)


def upsample_reference(x_nchw, params):
    """Pure-JAX f32 reference matching the PyTorch module (train-mode BN)."""
    w_conv, b_conv, gamma, beta, w_up, b_up = params
    conv = jax.lax.conv_general_dilated(
        x_nchw, w_conv, window_strides=(1, 1), padding=((1, 1), (1, 1)),
        dimension_numbers=("NCHW", "OIHW", "NCHW"),
    ) + b_conv[None, :, None, None]
    mean = conv.mean(axis=(0, 2, 3), keepdims=True)
    var = ((conv - mean) ** 2).mean(axis=(0, 2, 3), keepdims=True)
    y = (conv - mean) * jax.lax.rsqrt(var + EPS)
    y = y * gamma[None, :, None, None] + beta[None, :, None, None]
    y = jnp.maximum(y, 0.0)
    up = jnp.einsum("nchw,ckij->nkhiwj", y, w_up)                  # (N, Cout, H, 2, W, 2)
    N, _, H, W = y.shape
    Cout = w_up.shape[1]
    return up.reshape(N, Cout, 2 * H, 2 * W) + b_up[None, :, None, None]


def init_params(key, in_channels, out_channels):
    k1, k2, k3, k4, k5, k6 = jax.random.split(key, 6)
    w_conv = 0.1 * jax.random.normal(k1, (out_channels, in_channels, 3, 3), jnp.float32)
    b_conv = 0.1 * jax.random.normal(k2, (out_channels,), jnp.float32)
    gamma = 1.0 + 0.1 * jax.random.normal(k3, (out_channels,), jnp.float32)
    beta = 0.1 * jax.random.normal(k4, (out_channels,), jnp.float32)
    w_up = 0.1 * jax.random.normal(k5, (out_channels, out_channels, 2, 2), jnp.float32)
    b_up = 0.1 * jax.random.normal(k6, (out_channels,), jnp.float32)
    return (w_conv, b_conv, gamma, beta, w_up, b_up)


if __name__ == "__main__":
    key = jax.random.PRNGKey(0)
    kx, kp = jax.random.split(key)

    N, Cin, H, W = 2, 4, 16, 16
    Cout = 8

    x = jax.random.normal(kx, (N, Cin, H, W), jnp.float32)
    params = init_params(kp, Cin, Cout)

    fwd = jax.jit(upsample_forward)
    out = jax.block_until_ready(fwd(x, params))

    assert out.shape == (N, Cout, 2 * H, 2 * W), out.shape
    ref = upsample_reference(x, params)
    err = float(jnp.max(jnp.abs(out - ref)))
    assert bool(jnp.allclose(out, ref, rtol=1e-1, atol=1e-1)), err
    print("KERNEL_OK")
</pallas_src>

<mosaic_0001>
module attributes {stable_mosaic.version = 11 : i64} {
  func.func @conv_stats_kernel(%arg0: i32, %arg1: memref<1x326x4xf32, #tpu.memory_space<vmem>>, %arg2: memref<9x4x32xbf16, #tpu.memory_space<vmem>>, %arg3: memref<288x1xf32, #tpu.memory_space<vmem>>, %arg4: memref<1x288x32xbf16, #tpu.memory_space<vmem>>, %arg5: memref<1x8x64xf32, #tpu.memory_space<vmem>>) attributes {dimension_semantics = [#tpu.dimension_semantics<parallel>], iteration_bounds = array<i64: 2>, scalar_prefetch = 0 : i64, scratch_operands = 0 : i64, tpu.core_type = #tpu.core_type<tc>, window_params = [{transform_indices = @transform_0, window_bounds = array<i64: 1, 326, 4>}, {pipeline_mode = #tpu.pipeline_mode<synchronous>, transform_indices = @transform_1, window_bounds = array<i64: 9, 4, 32>}, {pipeline_mode = #tpu.pipeline_mode<synchronous>, transform_indices = @transform_2, window_bounds = array<i64: 288, 1>}, {transform_indices = @transform_3, window_bounds = array<i64: 1, 288, 32>}, {transform_indices = @transform_4, window_bounds = array<i64: 1, 8, 64>}]} {
    %cst = arith.constant 0.000000e+00 : f32
    %0 = vector.broadcast %cst : f32 to vector<288x32xf32>
    %c0 = arith.constant 0 : index
    %c0_0 = arith.constant 0 : index
    %c0_1 = arith.constant 0 : index
    %1 = vector.load %arg1[%c0, %c0_0, %c0_1] : memref<1x326x4xf32, #tpu.memory_space<vmem>>, vector<1x288x4xf32>
    %2 = vector.shape_cast %1 : vector<1x288x4xf32> to vector<288x4xf32>
    %3 = arith.truncf %2 : vector<288x4xf32> to vector<288x4xbf16>
    %c0_2 = arith.constant 0 : index
    %c0_3 = arith.constant 0 : index
    %c0_4 = arith.constant 0 : index
    %4 = vector.load %arg2[%c0_2, %c0_3, %c0_4] : memref<9x4x32xbf16, #tpu.memory_space<vmem>>, vector<1x4x32xbf16>
    %5 = vector.shape_cast %4 : vector<1x4x32xbf16> to vector<4x32xbf16>
    %cst_5 = arith.constant dense<0.000000e+00> : vector<288x32xf32>
    %6 = tpu.matmul %3, %5, %cst_5 {dimension_numbers = #tpu.dot_dimension_numbers<[1], [0], [0], [1], [0, 0, 1, 1], [], []>} : vector<288x4xbf16>, vector<4x32xbf16>, vector<288x32xf32> -> vector<288x32xf32>
    %7 = arith.addf %0, %6 : vector<288x32xf32>
    %c0_6 = arith.constant 0 : index
    %c1 = arith.constant 1 : index
    %c0_7 = arith.constant 0 : index
    %8 = vector.load %arg1[%c0_6, %c1, %c0_7] : memref<1x326x4xf32, #tpu.memory_space<vmem>>, vector<1x288x4xf32>
    %9 = vector.shape_cast %8 : vector<1x288x4xf32> to vector<288x4xf32>
    %10 = arith.truncf %9 : vector<288x4xf32> to vector<288x4xbf16>
    %c1_8 = arith.constant 1 : index
    %c0_9 = arith.constant 0 : index
    %c0_10 = arith.constant 0 : index
    %11 = vector.load %arg2[%c1_8, %c0_9, %c0_10] : memref<9x4x32xbf16, #tpu.memory_space<vmem>>, vector<1x4x32xbf16>
    %12 = vector.shape_cast %11 : vector<1x4x32xbf16> to vector<4x32xbf16>
    %cst_11 = arith.constant dense<0.000000e+00> : vector<288x32xf32>
    %13 = tpu.matmul %10, %12, %cst_11 {dimension_numbers = #tpu.dot_dimension_numbers<[1], [0], [0], [1], [0, 0, 1, 1], [], []>} : vector<288x4xbf16>, vector<4x32xbf16>, vector<288x32xf32> -> vector<288x32xf32>
    %14 = arith.addf %7, %13 : vector<288x32xf32>
    %c0_12 = arith.constant 0 : index
    %c2 = arith.constant 2 : index
    %c0_13 = arith.constant 0 : index
    %15 = vector.load %arg1[%c0_12, %c2, %c0_13] : memref<1x326x4xf32, #tpu.memory_space<vmem>>, vector<1x288x4xf32>
    %16 = vector.shape_cast %15 : vector<1x288x4xf32> to vector<288x4xf32>
    %17 = arith.truncf %16 : vector<288x4xf32> to vector<288x4xbf16>
    %c2_14 = arith.constant 2 : index
    %c0_15 = arith.constant 0 : index
    %c0_16 = arith.constant 0 : index
    %18 = vector.load %arg2[%c2_14, %c0_15, %c0_16] : memref<9x4x32xbf16, #tpu.memory_space<vmem>>, vector<1x4x32xbf16>
    %19 = vector.shape_cast %18 : vector<1x4x32xbf16> to vector<4x32xbf16>
    %cst_17 = arith.constant dense<0.000000e+00> : vector<288x32xf32>
    %20 = tpu.matmul %17, %19, %cst_17 {dimension_numbers = #tpu.dot_dimension_numbers<[1], [0], [0], [1], [0, 0, 1, 1], [], []>} : vector<288x4xbf16>, vector<4x32xbf16>, vector<288x32xf32> -> vector<288x32xf32>
    %21 = arith.addf %14, %20 : vector<288x32xf32>
    %c0_18 = arith.constant 0 : index
    %c18 = arith.constant 18 : index
    %c0_19 = arith.constant 0 : index
    %22 = vector.load %arg1[%c0_18, %c18, %c0_19] : memref<1x326x4xf32, #tpu.memory_space<vmem>>, vector<1x288x4xf32>
    %23 = vector.shape_cast %22 : vector<1x288x4xf32> to vector<288x4xf32>
    %24 = arith.truncf %23 : vector<288x4xf32> to vector<288x4xbf16>
    %c3 = arith.constant 3 : index
    %c0_20 = arith.constant 0 : index
    %c0_21 = arith.constant 0 : index
    %25 = vector.load %arg2[%c3, %c0_20, %c0_21] : memref<9x4x32xbf16, #tpu.memory_space<vmem>>, vector<1x4x32xbf16>
    %26 = vector.shape_cast %25 : vector<1x4x32xbf16> to vector<4x32xbf16>
    %cst_22 = arith.constant dense<0.000000e+00> : vector<288x32xf32>
    %27 = tpu.matmul %24, %26, %cst_22 {dimension_numbers = #tpu.dot_dimension_numbers<[1], [0], [0], [1], [0, 0, 1, 1], [], []>} : vector<288x4xbf16>, vector<4x32xbf16>, vector<288x32xf32> -> vector<288x32xf32>
    %28 = arith.addf %21, %27 : vector<288x32xf32>
    %c0_23 = arith.constant 0 : index
    %c19 = arith.constant 19 : index
    %c0_24 = arith.constant 0 : index
    %29 = vector.load %arg1[%c0_23, %c19, %c0_24] : memref<1x326x4xf32, #tpu.memory_space<vmem>>, vector<1x288x4xf32>
    %30 = vector.shape_cast %29 : vector<1x288x4xf32> to vector<288x4xf32>
    %31 = arith.truncf %30 : vector<288x4xf32> to vector<288x4xbf16>
    %c4 = arith.constant 4 : index
    %c0_25 = arith.constant 0 : index
    %c0_26 = arith.constant 0 : index
    %32 = vector.load %arg2[%c4, %c0_25, %c0_26] : memref<9x4x32xbf16, #tpu.memory_space<vmem>>, vector<1x4x32xbf16>
    %33 = vector.shape_cast %32 : vector<1x4x32xbf16> to vector<4x32xbf16>
    %cst_27 = arith.constant dense<0.000000e+00> : vector<288x32xf32>
    %34 = tpu.matmul %31, %33, %cst_27 {dimension_numbers = #tpu.dot_dimension_numbers<[1], [0], [0], [1], [0, 0, 1, 1], [], []>} : vector<288x4xbf16>, vector<4x32xbf16>, vector<288x32xf32> -> vector<288x32xf32>
    %35 = arith.addf %28, %34 : vector<288x32xf32>
    %c0_28 = arith.constant 0 : index
    %c20 = arith.constant 20 : index
    %c0_29 = arith.constant 0 : index
    %36 = vector.load %arg1[%c0_28, %c20, %c0_29] : memref<1x326x4xf32, #tpu.memory_space<vmem>>, vector<1x288x4xf32>
    %37 = vector.shape_cast %36 : vector<1x288x4xf32> to vector<288x4xf32>
    %38 = arith.truncf %37 : vector<288x4xf32> to vector<288x4xbf16>
    %c5 = arith.constant 5 : index
    %c0_30 = arith.constant 0 : index
    %c0_31 = arith.constant 0 : index
    %39 = vector.load %arg2[%c5, %c0_30, %c0_31] : memref<9x4x32xbf16, #tpu.memory_space<vmem>>, vector<1x4x32xbf16>
    %40 = vector.shape_cast %39 : vector<1x4x32xbf16> to vector<4x32xbf16>
    %cst_32 = arith.constant dense<0.000000e+00> : vector<288x32xf32>
    %41 = tpu.matmul %38, %40, %cst_32 {dimension_numbers = #tpu.dot_dimension_numbers<[1], [0], [0], [1], [0, 0, 1, 1], [], []>} : vector<288x4xbf16>, vector<4x32xbf16>, vector<288x32xf32> -> vector<288x32xf32>
    %42 = arith.addf %35, %41 : vector<288x32xf32>
    %c0_33 = arith.constant 0 : index
    %c36 = arith.constant 36 : index
    %c0_34 = arith.constant 0 : index
    %43 = vector.load %arg1[%c0_33, %c36, %c0_34] : memref<1x326x4xf32, #tpu.memory_space<vmem>>, vector<1x288x4xf32>
    %44 = vector.shape_cast %43 : vector<1x288x4xf32> to vector<288x4xf32>
    %45 = arith.truncf %44 : vector<288x4xf32> to vector<288x4xbf16>
    %c6 = arith.constant 6 : index
    %c0_35 = arith.constant 0 : index
    %c0_36 = arith.constant 0 : index
    %46 = vector.load %arg2[%c6, %c0_35, %c0_36] : memref<9x4x32xbf16, #tpu.memory_space<vmem>>, vector<1x4x32xbf16>
    %47 = vector.shape_cast %46 : vector<1x4x32xbf16> to vector<4x32xbf16>
    %cst_37 = arith.constant dense<0.000000e+00> : vector<288x32xf32>
    %48 = tpu.matmul %45, %47, %cst_37 {dimension_numbers = #tpu.dot_dimension_numbers<[1], [0], [0], [1], [0, 0, 1, 1], [], []>} : vector<288x4xbf16>, vector<4x32xbf16>, vector<288x32xf32> -> vector<288x32xf32>
    %49 = arith.addf %42, %48 : vector<288x32xf32>
    %c0_38 = arith.constant 0 : index
    %c37 = arith.constant 37 : index
    %c0_39 = arith.constant 0 : index
    %50 = vector.load %arg1[%c0_38, %c37, %c0_39] : memref<1x326x4xf32, #tpu.memory_space<vmem>>, vector<1x288x4xf32>
    %51 = vector.shape_cast %50 : vector<1x288x4xf32> to vector<288x4xf32>
    %52 = arith.truncf %51 : vector<288x4xf32> to vector<288x4xbf16>
    %c7 = arith.constant 7 : index
    %c0_40 = arith.constant 0 : index
    %c0_41 = arith.constant 0 : index
    %53 = vector.load %arg2[%c7, %c0_40, %c0_41] : memref<9x4x32xbf16, #tpu.memory_space<vmem>>, vector<1x4x32xbf16>
    %54 = vector.shape_cast %53 : vector<1x4x32xbf16> to vector<4x32xbf16>
    %cst_42 = arith.constant dense<0.000000e+00> : vector<288x32xf32>
    %55 = tpu.matmul %52, %54, %cst_42 {dimension_numbers = #tpu.dot_dimension_numbers<[1], [0], [0], [1], [0, 0, 1, 1], [], []>} : vector<288x4xbf16>, vector<4x32xbf16>, vector<288x32xf32> -> vector<288x32xf32>
    %56 = arith.addf %49, %55 : vector<288x32xf32>
    %c0_43 = arith.constant 0 : index
    %c38 = arith.constant 38 : index
    %c0_44 = arith.constant 0 : index
    %57 = vector.load %arg1[%c0_43, %c38, %c0_44] : memref<1x326x4xf32, #tpu.memory_space<vmem>>, vector<1x288x4xf32>
    %58 = vector.shape_cast %57 : vector<1x288x4xf32> to vector<288x4xf32>
    %59 = arith.truncf %58 : vector<288x4xf32> to vector<288x4xbf16>
    %c8 = arith.constant 8 : index
    %c0_45 = arith.constant 0 : index
    %c0_46 = arith.constant 0 : index
    %60 = vector.load %arg2[%c8, %c0_45, %c0_46] : memref<9x4x32xbf16, #tpu.memory_space<vmem>>, vector<1x4x32xbf16>
    %61 = vector.shape_cast %60 : vector<1x4x32xbf16> to vector<4x32xbf16>
    %cst_47 = arith.constant dense<0.000000e+00> : vector<288x32xf32>
    %62 = tpu.matmul %59, %61, %cst_47 {dimension_numbers = #tpu.dot_dimension_numbers<[1], [0], [0], [1], [0, 0, 1, 1], [], []>} : vector<288x4xbf16>, vector<4x32xbf16>, vector<288x32xf32> -> vector<288x32xf32>
    %63 = arith.addf %56, %62 : vector<288x32xf32>
    %64 = arith.truncf %63 : vector<288x32xf32> to vector<288x32xbf16>
    %c0_48 = arith.constant 0 : index
    %c0_49 = arith.constant 0 : index
    %c0_50 = arith.constant 0 : index
    %65 = vector.load %arg4[%c0_48, %c0_49, %c0_50] : memref<1x288x32xbf16, #tpu.memory_space<vmem>>, vector<1x288x32xbf16>
    %66 = vector.shape_cast %65 : vector<1x288x32xbf16> to vector<288x32xbf16>
    %67 = vector.shape_cast %64 : vector<288x32xbf16> to vector<1x288x32xbf16>
    tpu.vector_store %arg4[%c0_48, %c0_49, %c0_50], %67 {strides = array<i32>} : memref<1x288x32xbf16, #tpu.memory_space<vmem>>, vector<1x288x32xbf16>,
    %68 = arith.extf %64 : vector<288x32xbf16> to vector<288x32xf32>
    %c0_51 = arith.constant 0 : index
    %c0_52 = arith.constant 0 : index
    %69 = vector.load %arg3[%c0_51, %c0_52] : memref<288x1xf32, #tpu.memory_space<vmem>>, vector<288x1xf32>
    %70 = vector.broadcast %69 : vector<288x1xf32> to vector<288x32xf32>
    %71 = arith.mulf %68, %70 : vector<288x32xf32>
    %cst_53 = arith.constant 1.000000e+00 : f32
    %72 = vector.broadcast %cst_53 : f32 to vector<8x288xf32>
    %cst_54 = arith.constant dense<0.000000e+00> : vector<8x32xf32>
    %73 = tpu.matmul %72, %71, %cst_54 {dimension_numbers = #tpu.dot_dimension_numbers<[1], [0], [0], [1], [0, 0, 1, 1], [], []>} : vector<8x288xf32>, vector<288x32xf32>, vector<8x32xf32> -> vector<8x32xf32>
    %74 = arith.mulf %71, %71 : vector<288x32xf32>
    %cst_55 = arith.constant dense<0.000000e+00> : vector<8x32xf32>
    %75 = tpu.matmul %72, %74, %cst_55 {dimension_numbers = #tpu.dot_dimension_numbers<[1], [0], [0], [1], [0, 0, 1, 1], [], []>} : vector<8x288xf32>, vector<288x32xf32>, vector<8x32xf32> -> vector<8x32xf32>
    %76 = tpu.concatenate %73, %75 in 1 : vector<8x32xf32>, vector<8x32xf32> -> vector<8x64xf32>
    %c0_56 = arith.constant 0 : index
    %c0_57 = arith.constant 0 : index
    %c0_58 = arith.constant 0 : index
    %77 = vector.load %arg5[%c0_56, %c0_57, %c0_58] : memref<1x8x64xf32, #tpu.memory_space<vmem>>, vector<1x8x64xf32>
    %78 = vector.shape_cast %77 : vector<1x8x64xf32> to vector<8x64xf32>
    %79 = vector.shape_cast %76 : vector<8x64xf32> to vector<1x8x64xf32>
    tpu.vector_store %arg5[%c0_56, %c0_57, %c0_58], %79 {strides = array<i32>} : memref<1x8x64xf32, #tpu.memory_space<vmem>>, vector<1x8x64xf32>,
    return
  }
  func.func @transform_0(%arg0: i32) -> (i32, i32, i32) {
    %c0_i32 = arith.constant 0 : i32
    %c0_i32_0 = arith.constant 0 : i32
    %c0_i32_1 = arith.constant 0 : i32
    return %arg0, %c0_i32, %c0_i32_0 : i32, i32, i32
  }
  func.func @transform_1(%arg0: i32) -> (i32, i32, i32) {
    %c0_i32 = arith.constant 0 : i32
    %c0_i32_0 = arith.constant 0 : i32
    %c0_i32_1 = arith.constant 0 : i32
    %c0_i32_2 = arith.constant 0 : i32
    return %c0_i32, %c0_i32_0, %c0_i32_1 : i32, i32, i32
  }
  func.func @transform_2(%arg0: i32) -> (i32, i32) {
    %c0_i32 = arith.constant 0 : i32
    %c0_i32_0 = arith.constant 0 : i32
    %c0_i32_1 = arith.constant 0 : i32
    return %c0_i32, %c0_i32_0 : i32, i32
  }
  func.func @transform_3(%arg0: i32) -> (i32, i32, i32) {
    %c0_i32 = arith.constant 0 : i32
    %c0_i32_0 = arith.constant 0 : i32
    %c0_i32_1 = arith.constant 0 : i32
    return %arg0, %c0_i32, %c0_i32_0 : i32, i32, i32
  }
  func.func @transform_4(%arg0: i32) -> (i32, i32, i32) {
    %c0_i32 = arith.constant 0 : i32
    %c0_i32_0 = arith.constant 0 : i32
    %c0_i32_1 = arith.constant 0 : i32
    return %arg0, %c0_i32, %c0_i32_0 : i32, i32, i32
  }
}

module attributes {stable_mosaic.version = 11 : i64} {
  func.func @deconv_kernel(%arg0: i32, %arg1: memref<1x288x32xbf16, #tpu.memory_space<vmem>>, %arg2: memref<1x32xf32, #tpu.memory_space<vmem>>, %arg3: memref<1x32xf32, #tpu.memory_space<vmem>>, %arg4: memref<32x128xbf16, #tpu.memory_space<vmem>>, %arg5: memref<1x128xf32, #tpu.memory_space<vmem>>, %arg6: memref<1x288x128xbf16, #tpu.memory_space<vmem>>) attributes {dimension_semantics = [#tpu.dimension_semantics<parallel>], iteration_bounds = array<i64: 2>, scalar_prefetch = 0 : i64, scratch_operands = 0 : i64, tpu.core_type = #tpu.core_type<tc>, window_params = [{transform_indices = @transform_0, window_bounds = array<i64: 1, 288, 32>}, {pipeline_mode = #tpu.pipeline_mode<synchronous>, transform_indices = @transform_1, window_bounds = array<i64: 1, 32>}, {pipeline_mode = #tpu.pipeline_mode<synchronous>, transform_indices = @transform_2, window_bounds = array<i64: 1, 32>}, {pipeline_mode = #tpu.pipeline_mode<synchronous>, transform_indices = @transform_3, window_bounds = array<i64: 32, 128>}, {pipeline_mode = #tpu.pipeline_mode<synchronous>, transform_indices = @transform_4, window_bounds = array<i64: 1, 128>}, {transform_indices = @transform_5, window_bounds = array<i64: 1, 288, 128>}]} {
    %c0 = arith.constant 0 : index
    %c0_0 = arith.constant 0 : index
    %c0_1 = arith.constant 0 : index
    %0 = vector.load %arg1[%c0, %c0_0, %c0_1] : memref<1x288x32xbf16, #tpu.memory_space<vmem>>, vector<1x288x32xbf16>
    %1 = vector.shape_cast %0 : vector<1x288x32xbf16> to vector<288x32xbf16>
    %2 = arith.extf %1 : vector<288x32xbf16> to vector<288x32xf32>
    %c0_2 = arith.constant 0 : index
    %c0_3 = arith.constant 0 : index
    %3 = vector.load %arg2[%c0_2, %c0_3] : memref<1x32xf32, #tpu.memory_space<vmem>>, vector<1x32xf32>
    %4 = vector.broadcast %3 : vector<1x32xf32> to vector<288x32xf32>
    %5 = arith.mulf %2, %4 : vector<288x32xf32>
    %c0_4 = arith.constant 0 : index
    %c0_5 = arith.constant 0 : index
    %6 = vector.load %arg3[%c0_4, %c0_5] : memref<1x32xf32, #tpu.memory_space<vmem>>, vector<1x32xf32>
    %7 = vector.broadcast %6 : vector<1x32xf32> to vector<288x32xf32>
    %8 = arith.addf %5, %7 : vector<288x32xf32>
    %cst = arith.constant 0.000000e+00 : f32
    %9 = vector.broadcast %cst : f32 to vector<288x32xf32>
    %10 = arith.maximumf %8, %9 : vector<288x32xf32>
    %11 = arith.truncf %10 : vector<288x32xf32> to vector<288x32xbf16>
    %c0_6 = arith.constant 0 : index
    %c0_7 = arith.constant 0 : index
    %12 = vector.load %arg4[%c0_6, %c0_7] : memref<32x128xbf16, #tpu.memory_space<vmem>>, vector<32x128xbf16>
    %cst_8 = arith.constant dense<0.000000e+00> : vector<288x128xf32>
    %13 = tpu.matmul %11, %12, %cst_8 {dimension_numbers = #tpu.dot_dimension_numbers<[1], [0], [0], [1], [0, 0, 1, 1], [], []>} : vector<288x32xbf16>, vector<32x128xbf16>, vector<288x128xf32> -> vector<288x128xf32>
    %c0_9 = arith.constant 0 : index
    %c0_10 = arith.constant 0 : index
    %14 = vector.load %arg5[%c0_9, %c0_10] : memref<1x128xf32, #tpu.memory_space<vmem>>, vector<1x128xf32>
    %15 = vector.broadcast %14 : vector<1x128xf32> to vector<288x128xf32>
    %16 = arith.addf %13, %15 : vector<288x128xf32>
    %17 = arith.truncf %16 : vector<288x128xf32> to vector<288x128xbf16>
    %c0_11 = arith.constant 0 : index
    %c0_12 = arith.constant 0 : index
    %c0_13 = arith.constant 0 : index
    %18 = vector.load %arg6[%c0_11, %c0_12, %c0_13] : memref<1x288x128xbf16, #tpu.memory_space<vmem>>, vector<1x288x128xbf16>
    %19 = vector.shape_cast %18 : vector<1x288x128xbf16> to vector<288x128xbf16>
    %20 = vector.shape_cast %17 : vector<288x128xbf16> to vector<1x288x128xbf16>
    tpu.vector_store %arg6[%c0_11, %c0_12, %c0_13], %20 {strides = array<i32>} : memref<1x288x128xbf16, #tpu.memory_space<vmem>>, vector<1x288x128xbf16>,
    return
  }
  func.func @transform_0(%arg0: i32) -> (i32, i32, i32) {
    %c0_i32 = arith.constant 0 : i32
    %c0_i32_0 = arith.constant 0 : i32
    %c0_i32_1 = arith.constant 0 : i32
    return %arg0, %c0_i32, %c0_i32_0 : i32, i32, i32
  }
  func.func @transform_1(%arg0: i32) -> (i32, i32) {
    %c0_i32 = arith.constant 0 : i32
    %c0_i32_0 = arith.constant 0 : i32
    %c0_i32_1 = arith.constant 0 : i32
    return %c0_i32, %c0_i32_0 : i32, i32
  }
  func.func @transform_2(%arg0: i32) -> (i32, i32) {
    %c0_i32 = arith.constant 0 : i32
    %c0_i32_0 = arith.constant 0 : i32
    %c0_i32_1 = arith.constant 0 : i32
    return %c0_i32, %c0_i32_0 : i32, i32
  }
  func.func @transform_3(%arg0: i32) -> (i32, i32) {
    %c0_i32 = arith.constant 0 : i32
    %c0_i32_0 = arith.constant 0 : i32
    %c0_i32_1 = arith.constant 0 : i32
    return %c0_i32, %c0_i32_0 : i32, i32
  }
  func.func @transform_4(%arg0: i32) -> (i32, i32) {
    %c0_i32 = arith.constant 0 : i32
    %c0_i32_0 = arith.constant 0 : i32
    %c0_i32_1 = arith.constant 0 : i32
    return %c0_i32, %c0_i32_0 : i32, i32
  }
  func.func @transform_5(%arg0: i32) -> (i32, i32, i32) {
    %c0_i32 = arith.constant 0 : i32
    %c0_i32_0 = arith.constant 0 : i32
    %c0_i32_1 = arith.constant 0 : i32
    return %arg0, %c0_i32, %c0_i32_0 : i32, i32, i32
  }
}

</mosaic_0001>

<bundles_post_ra>
// kernel: tile.9
= control target key start
LH: loop header
LB: loop body
LE: loop exit
PB: predicated region body
PF: predicated region fallthrough
CT: control target
= control target key end

     0   :  { %s37_s8 = smov 32   ;;  %s38_s9 = smov 64   ;;  %vm7_vm0 = vcmask 261120   ;;  %vm13_vm1 = vcmask 1048320   ;;  %vm19_vm2 = vcmask 785920   ;;  %vm25_vm3 = vcmask 523520   ;;  %s55_s0 = inlined_call_operand.vmem [shape: f32[4,32], index: 0, kind: input, shape index: {}]   ;;  %s56_s1 = inlined_call_operand.vmem [shape: f32[1,128], index: 1, kind: output, shape index: {}]  }
   0x1   :  { %v4_v0 = vld [vmem:[%s55_s0] sm:$0xf]  ;;  %s36_s0 = smov 96  }
   0x2   :  { %5 = vst [vmem:[#allocation1] sm:$0xf] %v4_v0 }
   0x9   :  { %v10_v1 = vld [vmem:[#allocation1 + $0x3] sm:$0x1]   ;;  %v22_v2 = vld [vmem:[#allocation1 + $0x1] sm:$0x1]   ;;  %v16_v3 = vld [vmem:[#allocation1 + $0x2] sm:$0x1]  }
   0xa   :  { %11 = vrot.lane.b32.xlu0 %v10_v1, %s36_s0  ;;  %23 = vrot.lane.b32.xlu1 %v22_v2, %s37_s8  ;;  %v6_v4 = vld [vmem:[#allocation1] sm:$0x1]  }
   0xb   :  { %8 = vst.msk [vmem:[#allocation0] sm:$0x1] %vm7_vm0, %v6_v4  }
  0x12   :  { %17 = vrot.lane.b32.xlu0 %v16_v3, %s38_s9 }
  0x7c   :  { %v12_v5 = vpop.permute.xlu0 %11   ;;  %v24_v6 = vpop.permute.xlu1 %23  }
  0x7d   :  { %14 = vst.msk [vmem:[#allocation0] sm:$0x1] %vm13_vm1, %v12_v5  }
  0x84   :  { %v18_v7 = vpop.permute.xlu0 %17  }
  0x85   :  { %20 = vst.msk [vmem:[#allocation0] sm:$0x1] %vm19_vm2, %v18_v7  }
  0x86   :  { %26 = vst.msk [vmem:[#allocation0] sm:$0x1] %vm25_vm3, %v24_v6  }
  0x8d   :  { %v29_v8 = vld [vmem:[#allocation0] sm:$0x1] }
  0x8e   :  { %32 = vst [vmem:[%s56_s1] sm:$0x1] %v29_v8 }

// kernel: tile.8
= control target key start
LH: loop header
LB: loop body
LE: loop exit
PB: predicated region body
PF: predicated region fallthrough
CT: control target
= control target key end

     0   :  { %s22_s0 = inlined_call_operand.vmem [shape: f32[32], index: 0, kind: input, shape index: {}]   ;;  %s23_s1 = inlined_call_operand.vmem [shape: f32[4,32], index: 1, kind: output, shape index: {}]  }
   0x1   :  { %v4_v0 = vld [vmem:[%s22_s0] ss:$0 sm:$0xff] }
   0x2   :  { %5 = vst [vmem:[%s23_s1] sm:$0xf] %v4_v0 }

// kernel: upsample_forward.3
= control target key start
LH: loop header
LB: loop body
LE: loop exit
PB: predicated region body
PF: predicated region fallthrough
CT: control target
= control target key end

     0   :  { %s1022_s18 = smov 0   ;;  %s1233_s0 = inlined_call_operand.vmem [shape: bf16[2,288,32], index: 0, kind: input, shape index: {}]   ;;  %s1234_s1 = inlined_call_operand.vmem [shape: f32[1,32], index: 1, kind: input, shape index: {}]   ;;  %s1235_s2 = inlined_call_operand.vmem [shape: f32[1,32], index: 2, kind: input, shape index: {}]   ;;  %s1236_s3 = inlined_call_operand.vmem [shape: bf16[32,128], index: 3, kind: input, shape index: {}]   ;;  %s1237_s4 = inlined_call_operand.vmem [shape: f32[1,128], index: 4, kind: input, shape index: {}]   ;;  %s1238_s5 = inlined_call_operand.vmem [shape: bf16[2,288,128], index: 5, kind: output, shape index: {}]  }
   0x1 LB: > { %s733_s19 = sadd.s32 4294967295, %s990_s18   ;;  %p737_p0 = scmp.ge.s32.totalorder %s990_s18, 1  ;;  %s990_s18 = sphi %s1022_s18, %s15_s18  }
   0x2   : > { %p187_p1 = scmp.lt.s32.totalorder %s990_s18, 3 }
   0x4   : > { %p188_p2 = pnand %p737_p0, %p187_p1 }
   0x5   : > { %p215_p3 = scmp.lt.s32.totalorder (!%p188_p2), %s733_s19, 1 }
   0x6   : > { %191 = sbr.rel (%p188_p2) target bundleno = 236 (0xec), region = 40 }
   0xb   : > { %v769_v0 = vld [vmem:[%s1236_s3 + $0x8] sm:$0xff]  ;;  %v768_v1 = vld [vmem:[%s1236_s3] sm:$0xff]  ;;  %s1240_s19 = smov (!%p215_p3, %s733_s19), 1  ;;  %vm452_vm0 = vcmask 261120  }
   0xc   : > { %513 = vmatpush.bf16.msra.mxu0 %v769_v0  ;;  %966 = vmatpush.bf16.msra.mxu1 %v769_v0  ;;  %s972_s24 = smul.u32 144, %s1240_s19  ;;  %v1049_v2 = vld [vmem:[%s1234_s1] ss:$0 sm:$0xff] }
   0xd   : > { %967 = vmatpush.bf16.msra.mxu2 %v769_v0  ;;  %968 = vmatpush.bf16.msra.mxu3 %v769_v0  ;;  %v1057_v8 = vld [vmem:[%s1235_s2] ss:$0 sm:$0xff] }
   0xe   : > { %s1044_s27 = scalar_lea.vmem %s1233_s0, %s972_s24  ;;  %s1178_s11 = scalar_lea.vmem %s1238_s5, %s972_s24 }
   0xf   : > { %v771_v3 = vld [vmem:[%s1044_s27] sm:$0xff]   ;;  %v936_v4 = vld [vmem:[%s1044_s27 + $0x28] sm:$0xff]   ;;  %v941_v5 = vld [vmem:[%s1044_s27 + $0x50] sm:$0xff]  }
  0x10   : > { %514 = vmatpush.bf16.msra.mxu0 %v768_v1  ;;  %969 = vmatpush.bf16.msra.mxu1 %v768_v1  ;;  %v772_v6 = vunpack.c.l.bf16 %v771_v3  ;;  %v773_v7 = vunpack.c.h.bf16 %v771_v3  ;;  %v792_v9 = vunpack.c.l.bf16 %v936_v4  ;;  %v793_v10 = vunpack.c.h.bf16 %v936_v4  ;;  %v932_v11 = vld [vmem:[%s1044_s27 + $0x8] sm:$0xff]   ;;  %v937_v28 = vld [vmem:[%s1044_s27 + $0x30] sm:$0xff]   ;;  %v942_v33 = vld [vmem:[%s1044_s27 + $0x58] sm:$0xff]  }
  0x11   : > { %970 = vmatpush.bf16.msra.mxu2 %v768_v1  ;;  %971 = vmatpush.bf16.msra.mxu3 %v768_v1  ;;  %v812_v12 = vunpack.c.l.bf16 %v941_v5  ;;  %v813_v13 = vunpack.c.h.bf16 %v941_v5  ;;  %v776_v20 = vunpack.c.l.bf16 %v932_v11  ;;  %v777_v27 = vunpack.c.h.bf16 %v932_v11  ;;  %v946_v37 = vld [vmem:[%s1044_s27 + $0x78] sm:$0xff]   ;;  %v933_v57 = vld [vmem:[%s1044_s27 + $0x10] sm:$0xff]   ;;  %v947_v5 = vld [vmem:[%s1044_s27 + $0x80] sm:$0xff]  }
  0x12   : > { %v302_v14 = vmul.f32 %v1049_v2, %v772_v6  ;;  %v303_v15 = vmul.f32 %v1049_v2, %v773_v7  ;;  %v312_v16 = vmul.f32 %v1049_v2, %v792_v9  ;;  %v313_v17 = vmul.f32 %v1049_v2, %v793_v10  ;;  %v938_v63 = vld [vmem:[%s1044_s27 + $0x38] sm:$0xff]  }
  0x13   : > { %v322_v18 = vmul.f32 %v1049_v2, %v812_v12  ;;  %v323_v19 = vmul.f32 %v1049_v2, %v813_v13  ;;  %v304_v36 = vmul.f32 %v1049_v2, %v776_v20  ;;  %v796_v40 = vunpack.c.l.bf16 %v937_v28 }
  0x14   : > { %v342_v21 = vadd.f32 %v1057_v8, %v302_v14  ;;  %v343_v22 = vadd.f32 %v1057_v8, %v303_v15  ;;  %v352_v23 = vadd.f32 %v1057_v8, %v312_v16  ;;  %v353_v24 = vadd.f32 %v1057_v8, %v313_v17  ;;  %v943_v14 = vld [vmem:[%s1044_s27 + $0x60] sm:$0xff]  }
  0x15   : > { %v362_v25 = vadd.f32 %v1057_v8, %v322_v18  ;;  %v363_v26 = vadd.f32 %v1057_v8, %v323_v19  ;;  %v797_v41 = vunpack.c.h.bf16 %v937_v28  ;;  %v305_v43 = vmul.f32 %v1049_v2, %v777_v27 }
  0x16   : > { %v378_v29 = vmax.f32 %v342_v21, 0.0  ;;  %v379_v30 = vmax.f32 %v343_v22, 0.0  ;;  %v388_v31 = vmax.f32 %v352_v23, 0.0  ;;  %v389_v32 = vmax.f32 %v353_v24, 0.0 }
  0x17   : > { %v398_v34 = vmax.f32 %v362_v25, 0.0  ;;  %v399_v35 = vmax.f32 %v363_v26, 0.0  ;;  %v816_v44 = vunpack.c.l.bf16 %v942_v33  ;;  %v817_v45 = vunpack.c.h.bf16 %v942_v33 }
  0x18   : > { %v414_v38 = vpack.c.bf16 %v379_v30, %v378_v29  ;;  %v419_v39 = vpack.c.bf16 %v389_v32, %v388_v31  ;;  %v314_v46 = vmul.f32 %v1049_v2, %v796_v40  ;;  %v315_v47 = vmul.f32 %v1049_v2, %v797_v41 }
  0x19   : > { %v424_v42 = vpack.c.bf16 %v399_v35, %v398_v34  ;;  %v832_v48 = vunpack.c.l.bf16 %v946_v37  ;;  %v833_v49 = vunpack.c.h.bf16 %v946_v37  ;;  %v324_v50 = vmul.f32 %v1049_v2, %v816_v44 }
  0x1a   : > { %748 = vmatmul.msk.bf16.vlgmr.msra.gmra.mxu0 %vm452_vm0, %v414_v38  ;;  %753 = vmatmul.msk.bf16.vlgmr.msra.gmra.mxu1 %vm452_vm0, %v419_v39  ;;  %v325_v51 = vmul.f32 %v1049_v2, %v817_v45  ;;  %v344_v54 = vadd.f32 %v1057_v8, %v304_v36  ;;  %v345_v55 = vadd.f32 %v1057_v8, %v305_v43  ;;  %v780_v3 = vunpack.c.l.bf16 %v933_v57  ;;  %v935_v38 = vld [vmem:[%s1044_s27 + $0x20] sm:$0xff]   ;;  %v948_v43 = vld [vmem:[%s1044_s27 + $0x88] sm:$0xff]  }
  0x1b   : > { %758 = vmatmul.msk.bf16.vlgmr.msra.gmra.mxu2 %vm452_vm0, %v424_v42  ;;  %v332_v52 = vmul.f32 %v1049_v2, %v832_v48  ;;  %v333_v53 = vmul.f32 %v1049_v2, %v833_v49  ;;  %v354_v56 = vadd.f32 %v1057_v8, %v314_v46  ;;  %v355_v58 = vadd.f32 %v1057_v8, %v315_v47  ;;  %v934_v46 = vld [vmem:[%s1044_s27 + $0x18] sm:$0xff]  }
  0x1c   : > { %v364_v61 = vadd.f32 %v1057_v8, %v324_v50  ;;  %v365_v62 = vadd.f32 %v1057_v8, %v325_v51  ;;  %v781_v4 = vunpack.c.h.bf16 %v933_v57  ;;  %v380_v6 = vmax.f32 %v344_v54, 0.0  ;;  %v939_v50 = vld [vmem:[%s1044_s27 + $0x40] sm:$0xff]  }
  0x1d   : > { %v372_v59 = vadd.f32 %v1057_v8, %v332_v52  ;;  %v373_v60 = vadd.f32 %v1057_v8, %v333_v53  ;;  %v381_v7 = vmax.f32 %v345_v55, 0.0  ;;  %v390_v9 = vmax.f32 %v354_v56, 0.0 }
  0x1e   : > { %v391_v10 = vmax.f32 %v355_v58, 0.0  ;;  %v800_v12 = vunpack.c.l.bf16 %v938_v63  ;;  %v801_v13 = vunpack.c.h.bf16 %v938_v63  ;;  %v400_v15 = vmax.f32 %v364_v61, 0.0  ;;  %v940_v58 = vld [vmem:[%s1044_s27 + $0x48] sm:$0xff]   ;;  %v945_v63 = vld [vmem:[%s1044_s27 + $0x70] sm:$0xff]  }
  0x1f   : > { %v408_v0 = vmax.f32 %v372_v59, 0.0  ;;  %v409_v1 = vmax.f32 %v373_v60, 0.0  ;;  %v401_v16 = vmax.f32 %v365_v62, 0.0  ;;  %v836_v17 = vunpack.c.l.bf16 %v947_v5 }
  0x20   : > { %v837_v18 = vunpack.c.h.bf16 %v947_v5  ;;  %v306_v19 = vmul.f32 %v1049_v2, %v780_v3  ;;  %v307_v20 = vmul.f32 %v1049_v2, %v781_v4  ;;  %v820_v21 = vunpack.c.l.bf16 %v943_v14  ;;  %v944_v5 = vld [vmem:[%s1044_s27 + $0x68] sm:$0xff]  }
  0x21   : > { %v429_v11 = vpack.c.bf16 %v409_v1, %v408_v0  ;;  %v821_v22 = vunpack.c.h.bf16 %v943_v14  ;;  %v334_v23 = vmul.f32 %v1049_v2, %v836_v17  ;;  %v415_v25 = vpack.c.bf16 %v381_v7, %v380_v6 }
  0x22   : > { %v335_v24 = vmul.f32 %v1049_v2, %v837_v18  ;;  %v420_v26 = vpack.c.bf16 %v391_v10, %v390_v9  ;;  %v316_v27 = vmul.f32 %v1049_v2, %v800_v12  ;;  %v317_v28 = vmul.f32 %v1049_v2, %v801_v13 }
  0x23   : > { %763 = vmatmul.msk.bf16.vlgmr.msra.gmra.mxu3 %vm452_vm0, %v429_v11  ;;  %v425_v29 = vpack.c.bf16 %v401_v16, %v400_v15  ;;  %v346_v30 = vadd.f32 %v1057_v8, %v306_v19  ;;  %v347_v31 = vadd.f32 %v1057_v8, %v307_v20  ;;  %v374_v32 = vadd.f32 %v1057_v8, %v334_v23 }
  0x24   : > { %v375_v33 = vadd.f32 %v1057_v8, %v335_v24  ;;  %v326_v34 = vmul.f32 %v1049_v2, %v820_v21  ;;  %v327_v35 = vmul.f32 %v1049_v2, %v821_v22  ;;  %v356_v36 = vadd.f32 %v1057_v8, %v316_v27 }
  0x25   : > { %v357_v37 = vadd.f32 %v1057_v8, %v317_v28  ;;  %v382_v39 = vmax.f32 %v346_v30, 0.0  ;;  %v383_v40 = vmax.f32 %v347_v31, 0.0  ;;  %v410_v41 = vmax.f32 %v374_v32, 0.0 }
  0x26   : > { %v411_v42 = vmax.f32 %v375_v33, 0.0  ;;  %v366_v44 = vadd.f32 %v1057_v8, %v326_v34  ;;  %v367_v45 = vadd.f32 %v1057_v8, %v327_v35  ;;  %v788_v47 = vunpack.c.l.bf16 %v935_v38 }
  0x27   : > { %v392_v48 = vmax.f32 %v356_v36, 0.0  ;;  %v393_v49 = vmax.f32 %v357_v37, 0.0  ;;  %v840_v51 = vunpack.c.l.bf16 %v948_v43  ;;  %v789_v52 = vunpack.c.h.bf16 %v935_v38 }
  0x28   : > { %v310_v53 = vmul.f32 %v1049_v2, %v788_v47  ;;  %v416_v54 = vpack.c.bf16 %v383_v40, %v382_v39  ;;  %v430_v55 = vpack.c.bf16 %v411_v42, %v410_v41  ;;  %v784_v56 = vunpack.c.l.bf16 %v934_v46 }
  0x29   : > { %v841_v57 = vunpack.c.h.bf16 %v948_v43  ;;  %v402_v59 = vmax.f32 %v366_v44, 0.0  ;;  %v403_v60 = vmax.f32 %v367_v45, 0.0  ;;  %v311_v61 = vmul.f32 %v1049_v2, %v789_v52 }
  0x2a   : > { %749 = vmatmul.msk.bf16.gmra.mxu0 %vm452_vm0, %v415_v25  ;;  %754 = vmatmul.msk.bf16.gmra.mxu1 %vm452_vm0, %v420_v26  ;;  %v350_v62 = vadd.f32 %v1057_v8, %v310_v53  ;;  %v421_v0 = vpack.c.bf16 %v393_v49, %v392_v48  ;;  %v785_v1 = vunpack.c.h.bf16 %v934_v46  ;;  %v804_v3 = vunpack.c.l.bf16 %v939_v50 }
  0x2b   : > { %759 = vmatmul.msk.bf16.gmra.mxu2 %vm452_vm0, %v425_v29  ;;  %v808_v4 = vunpack.c.l.bf16 %v940_v58  ;;  %v336_v6 = vmul.f32 %v1049_v2, %v840_v51  ;;  %v351_v7 = vadd.f32 %v1057_v8, %v311_v61  ;;  %v809_v10 = vunpack.c.h.bf16 %v940_v58 }
  0x2c   : > { %v386_v9 = vmax.f32 %v350_v62, 0.0  ;;  %v337_v11 = vmul.f32 %v1049_v2, %v841_v57  ;;  %v828_v13 = vunpack.c.l.bf16 %v945_v63  ;;  %v829_v14 = vunpack.c.h.bf16 %v945_v63 }
  0x2d   : > { %v320_v12 = vmul.f32 %v1049_v2, %v808_v4  ;;  %v426_v15 = vpack.c.bf16 %v403_v60, %v402_v59  ;;  %v805_v16 = vunpack.c.h.bf16 %v939_v50  ;;  %v387_v17 = vmax.f32 %v351_v7, 0.0  ;;  %v1167_v60 = vld [vmem:[%s1237_s4] ss:$0 sm:$0xff] }
  0x2e   : > { %v321_v18 = vmul.f32 %v1049_v2, %v809_v10  ;;  %v824_v19 = vunpack.c.l.bf16 %v944_v5  ;;  %v330_v21 = vmul.f32 %v1049_v2, %v828_v13  ;;  %v331_v22 = vmul.f32 %v1049_v2, %v829_v14 }
  0x2f   : > { %v360_v20 = vadd.f32 %v1057_v8, %v320_v12  ;;  %v825_v23 = vunpack.c.h.bf16 %v944_v5  ;;  %v376_v24 = vadd.f32 %v1057_v8, %v336_v6  ;;  %v418_v25 = vpack.c.bf16 %v387_v17, %v386_v9 }
  0x30   : > { %v361_v26 = vadd.f32 %v1057_v8, %v321_v18  ;;  %v377_v27 = vadd.f32 %v1057_v8, %v337_v11  ;;  %v370_v29 = vadd.f32 %v1057_v8, %v330_v21  ;;  %v371_v30 = vadd.f32 %v1057_v8, %v331_v22 }
  0x31   : > { %v396_v28 = vmax.f32 %v360_v20, 0.0  ;;  %v308_v31 = vmul.f32 %v1049_v2, %v784_v56  ;;  %v309_v32 = vmul.f32 %v1049_v2, %v785_v1  ;;  %v318_v34 = vmul.f32 %v1049_v2, %v804_v3 }
  0x32   : > { %v397_v33 = vmax.f32 %v361_v26, 0.0  ;;  %v319_v35 = vmul.f32 %v1049_v2, %v805_v16  ;;  %v406_v36 = vmax.f32 %v370_v29, 0.0  ;;  %v407_v37 = vmax.f32 %v371_v30, 0.0 }
  0x33   : > { %764 = vmatmul.msk.bf16.gmra.mxu3 %vm452_vm0, %v430_v55  ;;  %v328_v38 = vmul.f32 %v1049_v2, %v824_v19  ;;  %v329_v39 = vmul.f32 %v1049_v2, %v825_v23  ;;  %v412_v41 = vmax.f32 %v376_v24, 0.0  ;;  %v413_v42 = vmax.f32 %v377_v27, 0.0 }
  0x34   : > { %v423_v40 = vpack.c.bf16 %v397_v33, %v396_v28  ;;  %v428_v43 = vpack.c.bf16 %v407_v37, %v406_v36  ;;  %v348_v44 = vadd.f32 %v1057_v8, %v308_v31  ;;  %v349_v45 = vadd.f32 %v1057_v8, %v309_v32 }
  0x35   : > { %v358_v46 = vadd.f32 %v1057_v8, %v318_v34  ;;  %v359_v47 = vadd.f32 %v1057_v8, %v319_v35  ;;  %v368_v48 = vadd.f32 %v1057_v8, %v328_v38  ;;  %v369_v49 = vadd.f32 %v1057_v8, %v329_v39 }
  0x36   : > { %v431_v50 = vpack.c.bf16 %v413_v42, %v412_v41  ;;  %v384_v51 = vmax.f32 %v348_v44, 0.0  ;;  %v385_v52 = vmax.f32 %v349_v45, 0.0 }
  0x37   : > { %v394_v2 = vmax.f32 %v358_v46, 0.0  ;;  %v395_v53 = vmax.f32 %v359_v47, 0.0  ;;  %v405_v55 = vmax.f32 %v369_v49, 0.0 }
  0x38   : > { %v417_v56 = vpack.c.bf16 %v385_v52, %v384_v51 }
  0x39   : > { %v422_v57 = vpack.c.bf16 %v395_v53, %v394_v2 }
  0x3a   : > { %750 = vmatmul.msk.bf16.gmra.mxu0 %vm452_vm0, %v416_v54  ;;  %755 = vmatmul.msk.bf16.gmra.mxu1 %vm452_vm0, %v421_v0  ;;  %v404_v54 = vmax.f32 %v368_v48, 0.0 }
  0x3b   : > { %760 = vmatmul.msk.bf16.gmra.mxu2 %vm452_vm0, %v426_v15 }
  0x3c   : > { %v427_v58 = vpack.c.bf16 %v405_v55, %v404_v54 }
  0x43   : > { %765 = vmatmul.msk.bf16.gmra.mxu3 %vm452_vm0, %v431_v50 }
  0x4a   : > { %751 = vmatmul.msk.bf16.gmra.mxu0 %vm452_vm0, %v417_v56  ;;  %756 = vmatmul.msk.bf16.gmra.mxu1 %vm452_vm0, %v422_v57 }
  0x4b   : > { %761 = vmatmul.msk.bf16.gmra.mxu2 %vm452_vm0, %v427_v58 }
  0x5a   : > { %752 = vmatmul.msk.bf16.gmra.mxu0 %vm452_vm0, %v418_v25  ;;  %757 = vmatmul.msk.bf16.gmra.mxu1 %vm452_vm0, %v423_v40 }
  0x5b   : > { %762 = vmatmul.msk.bf16.gmra.mxu2 %vm452_vm0, %v428_v43 }
  0x97   : > { %v516_v8 = vpop.f32.mrf.mxu0  ;;  %v541_v59 = vpop.f32.mrf.mxu1 }
  0x98   : > { %v517_v0 = vadd.f32 %v1167_v60, %v516_v8  ;;  %v542_v1 = vadd.f32 %v1167_v60, %v541_v59 }
  0x9e   : > { %v566_v61 = vpop.f32.mrf.mxu2 }
  0x9f   : > { %v518_v62 = vpop.f32.mrf.mxu0  ;;  %v543_v63 = vpop.f32.mrf.mxu1  ;;  %v567_v9 = vadd.f32 %v1167_v60, %v566_v61 }
  0xa0   : > { %v519_v3 = vadd.f32 %v1167_v60, %v518_v62  ;;  %v544_v4 = vadd.f32 %v1167_v60, %v543_v63 }
  0xa2   : > { %v845_v5 = vpack.c.bf16 %v519_v3, %v517_v0  ;;  %v870_v6 = vpack.c.bf16 %v544_v4, %v542_v1 }
  0xa4   : > { %846 = vst [vmem:[%s1178_s11] sm:$0xff] %v845_v5  }
  0xa5   : > { %953 = vst [vmem:[%s1178_s11 + $0x28] sm:$0xff] %v870_v6  }
  0xa6   : > { %v568_v7 = vpop.f32.mrf.mxu2  ;;  %v591_v13 = vpop.f32.mrf.mxu3 }
  0xa7   : > { %v569_v10 = vadd.f32 %v1167_v60, %v568_v7  ;;  %v521_v11 = vpop.f32.mrf.mxu0  ;;  %v546_v12 = vpop.f32.mrf.mxu1  ;;  %v592_v18 = vadd.f32 %v1167_v60, %v591_v13 }
  0xa8   : > { %v522_v19 = vadd.f32 %v1167_v60, %v521_v11  ;;  %v547_v20 = vadd.f32 %v1167_v60, %v546_v12 }
  0xa9   : > { %v895_v14 = vpack.c.bf16 %v569_v10, %v567_v9 }
  0xab   : > { %958 = vst [vmem:[%s1178_s11 + $0x50] sm:$0xff] %v895_v14  }
  0xae   : > { %v571_v15 = vpop.f32.mrf.mxu2  ;;  %v593_v23 = vpop.f32.mrf.mxu3 }
  0xaf   : > { %v523_v16 = vpop.f32.mrf.mxu0  ;;  %v548_v17 = vpop.f32.mrf.mxu1  ;;  %v594_v24 = vadd.f32 %v1167_v60, %v593_v23  ;;  %v572_v29 = vadd.f32 %v1167_v60, %v571_v15 }
  0xb0   : > { %v524_v21 = vadd.f32 %v1167_v60, %v523_v16  ;;  %v549_v22 = vadd.f32 %v1167_v60, %v548_v17 }
  0xb1   : > { %v920_v27 = vpack.c.bf16 %v594_v24, %v592_v18 }
  0xb2   : > { %v850_v25 = vpack.c.bf16 %v524_v21, %v522_v19  ;;  %v875_v26 = vpack.c.bf16 %v549_v22, %v547_v20 }
  0xb3   : > { %963 = vst [vmem:[%s1178_s11 + $0x78] sm:$0xff] %v920_v27  }
  0xb4   : > { %949 = vst [vmem:[%s1178_s11 + $0x8] sm:$0xff] %v850_v25  }
  0xb5   : > { %954 = vst [vmem:[%s1178_s11 + $0x30] sm:$0xff] %v875_v26  }
  0xb6   : > { %v573_v28 = vpop.f32.mrf.mxu2  ;;  %v596_v33 = vpop.f32.mrf.mxu3 }
  0xb7   : > { %v574_v30 = vadd.f32 %v1167_v60, %v573_v28  ;;  %v526_v31 = vpop.f32.mrf.mxu0  ;;  %v551_v32 = vpop.f32.mrf.mxu1  ;;  %v597_v38 = vadd.f32 %v1167_v60, %v596_v33 }
  0xb8   : > { %v527_v39 = vadd.f32 %v1167_v60, %v526_v31  ;;  %v552_v40 = vadd.f32 %v1167_v60, %v551_v32 }
  0xb9   : > { %v900_v34 = vpack.c.bf16 %v574_v30, %v572_v29 }
  0xbb   : > { %959 = vst [vmem:[%s1178_s11 + $0x58] sm:$0xff] %v900_v34  }
  0xbe   : > { %v576_v35 = vpop.f32.mrf.mxu2  ;;  %v598_v43 = vpop.f32.mrf.mxu3 }
  0xbf   : > { %v528_v36 = vpop.f32.mrf.mxu0  ;;  %v553_v37 = vpop.f32.mrf.mxu1  ;;  %v599_v44 = vadd.f32 %v1167_v60, %v598_v43  ;;  %v577_v49 = vadd.f32 %v1167_v60, %v576_v35 }
  0xc0   : > { %v529_v41 = vadd.f32 %v1167_v60, %v528_v36  ;;  %v554_v42 = vadd.f32 %v1167_v60, %v553_v37 }
  0xc1   : > { %v925_v47 = vpack.c.bf16 %v599_v44, %v597_v38 }
  0xc2   : > { %v855_v45 = vpack.c.bf16 %v529_v41, %v527_v39  ;;  %v880_v46 = vpack.c.bf16 %v554_v42, %v552_v40 }
  0xc3   : > { %964 = vst [vmem:[%s1178_s11 + $0x80] sm:$0xff] %v925_v47  }
  0xc4   : > { %950 = vst [vmem:[%s1178_s11 + $0x10] sm:$0xff] %v855_v45  }
  0xc5   : > { %955 = vst [vmem:[%s1178_s11 + $0x38] sm:$0xff] %v880_v46  }
  0xc6   : > { %v578_v48 = vpop.f32.mrf.mxu2  ;;  %v601_v2 = vpop.f32.mrf.mxu3 }
  0xc7   : > { %v579_v50 = vadd.f32 %v1167_v60, %v578_v48  ;;  %v531_v51 = vpop.f32.mrf.mxu0  ;;  %v556_v52 = vpop.f32.mrf.mxu1  ;;  %v602_v57 = vadd.f32 %v1167_v60, %v601_v2 }
  0xc8   : > { %v532_v58 = vadd.f32 %v1167_v60, %v531_v51  ;;  %v557_v8 = vadd.f32 %v1167_v60, %v556_v52 }
  0xc9   : > { %v905_v53 = vpack.c.bf16 %v579_v50, %v577_v49 }
  0xcb   : > { %960 = vst [vmem:[%s1178_s11 + $0x60] sm:$0xff] %v905_v53  }
  0xce   : > { %v581_v54 = vpop.f32.mrf.mxu2  ;;  %v603_v62 = vpop.f32.mrf.mxu3 }
  0xcf   : > { %v533_v55 = vpop.f32.mrf.mxu0  ;;  %v558_v56 = vpop.f32.mrf.mxu1  ;;  %v604_v63 = vadd.f32 %v1167_v60, %v603_v62  ;;  %v582_v5 = vadd.f32 %v1167_v60, %v581_v54 }
  0xd0   : > { %v534_v59 = vadd.f32 %v1167_v60, %v533_v55  ;;  %v559_v61 = vadd.f32 %v1167_v60, %v558_v56 }
  0xd1   : > { %v930_v3 = vpack.c.bf16 %v604_v63, %v602_v57 }
  0xd2   : > { %v860_v0 = vpack.c.bf16 %v534_v59, %v532_v58  ;;  %v885_v1 = vpack.c.bf16 %v559_v61, %v557_v8 }
  0xd3   : > { %965 = vst [vmem:[%s1178_s11 + $0x88] sm:$0xff] %v930_v3  }
  0xd4   : > { %951 = vst [vmem:[%s1178_s11 + $0x18] sm:$0xff] %v860_v0  }
  0xd5   : > { %956 = vst [vmem:[%s1178_s11 + $0x40] sm:$0xff] %v885_v1  }
  0xd6   : > { %v583_v4 = vpop.f32.mrf.mxu2 }
  0xd7   : > { %v584_v6 = vadd.f32 %v1167_v60, %v583_v4  ;;  %v536_v7 = vpop.f32.mrf.mxu0  ;;  %v561_v9 = vpop.f32.mrf.mxu1 }
  0xd8   : > { %v537_v14 = vadd.f32 %v1167_v60, %v536_v7  ;;  %v562_v15 = vadd.f32 %v1167_v60, %v561_v9 }
  0xd9   : > { %v910_v10 = vpack.c.bf16 %v584_v6, %v582_v5 }
  0xdb   : > { %961 = vst [vmem:[%s1178_s11 + $0x68] sm:$0xff] %v910_v10  }
  0xde   : > { %v586_v11 = vpop.f32.mrf.mxu2 }
  0xdf   : > { %v538_v12 = vpop.f32.mrf.mxu0  ;;  %v563_v13 = vpop.f32.mrf.mxu1  ;;  %v587_v21 = vadd.f32 %v1167_v60, %v586_v11 }
  0xe0   : > { %v539_v16 = vadd.f32 %v1167_v60, %v538_v12  ;;  %v564_v17 = vadd.f32 %v1167_v60, %v563_v13 }
  0xe2   : > { %v865_v18 = vpack.c.bf16 %v539_v16, %v537_v14  ;;  %v890_v19 = vpack.c.bf16 %v564_v17, %v562_v15 }
  0xe4   : > { %952 = vst [vmem:[%s1178_s11 + $0x20] sm:$0xff] %v865_v18  }
  0xe5   : > { %957 = vst [vmem:[%s1178_s11 + $0x48] sm:$0xff] %v890_v19  }
  0xe6   : > { %v588_v20 = vpop.f32.mrf.mxu2 }
  0xe7   : > { %v589_v22 = vadd.f32 %v1167_v60, %v588_v20 }
  0xe9   : > { %v915_v23 = vpack.c.bf16 %v589_v22, %v587_v21 }
  0xeb   : > { %962 = vst [vmem:[%s1178_s11 + $0x70] sm:$0xff] %v915_v23  }
  0xec PF: > { %s15_s18 = sadd.s32 1, %s990_s18  }
  0xed   : > { %p12_p4 = scmp.ge.s32.totalorder %s15_s18, 4  }
  0xef   :  { %14 = sbr.rel (!%p12_p4) target bundleno = 1 (0x1), region = 70 }

// kernel: upsample_forward.2
= control target key start
LH: loop header
LB: loop body
LE: loop exit
PB: predicated region body
PF: predicated region fallthrough
CT: control target
= control target key end

     0   :  { %s3222_s15 = smov 0   ;;  %s4578_s0 = inlined_call_operand.vmem [shape: f32[2,326,4], index: 0, kind: input, shape index: {}]   ;;  %s4579_s1 = inlined_call_operand.vmem [shape: bf16[9,4,32], index: 1, kind: input, shape index: {}]   ;;  %s4580_s2 = inlined_call_operand.vmem [shape: f32[288,1], index: 2, kind: input, shape index: {}]   ;;  %s4581_s3 = inlined_call_operand.vmem [shape: bf16[2,288,32], index: 3, kind: output, shape index: {0}]   ;;  %s4582_s4 = inlined_call_operand.vmem [shape: f32[2,8,64], index: 4, kind: output, shape index: {1}]  }
   0x1 LB: > { %s2985_s16 = sadd.s32 4294967295, %s3192_s15   ;;  %p2989_p0 = scmp.ge.s32.totalorder %s3192_s15, 1  ;;  %s3192_s15 = sphi %s3222_s15, %s15_s15  }
   0x2   : > { %p165_p1 = scmp.lt.s32.totalorder %s3192_s15, 3 }
   0x4   : > { %p166_p2 = pnand %p2989_p0, %p165_p1 }
   0x6   : > { %169 = sbr.rel (%p166_p2) target bundleno = 1102 (0x44e), region = 32 }
   0xb   : > { %v2993_v0 = vld [vmem:[%s4579_s1 + $0x2] sm:$0x3]  ;;  %vm376_vm0 = vcmask 1041408   ;;  %p195_p3 = scmp.lt.s32.totalorder %s2985_s16, 1  ;;  %vm321_vm1 = vcmask 31744   ;;  %vm2407_vm2 = vcmask 257024  }
   0xc   : > { %v378_v1 = vsel %vm376_vm0, %v2993_v0, 0  ;;  %v3030_v26 = vld [vmem:[%s4579_s1 + $0x4] sm:$0x3]  ;;  %v264_v28 = vld [vmem:[%s4579_s1] sm:$0x3]  ;;  %vm2732_vm3 = vcmask 261120  }
   0xd   : > { %387 = vmatpush.bf16.msra.mxu0 %v378_v1  ;;  %3167 = vmatpush.bf16.msra.mxu1 %v378_v1  ;;  %s4626_s16 = smov (!%p195_p3, %s2985_s16), 1  ;;  %v746_v27 = vsel %vm376_vm0, %v3030_v26, 0  ;;  %v534_v29 = vsel %vm376_vm0, %v264_v28, 0  ;;  %v3049_v42 = vld [vmem:[%s4579_s1 + $0x6] sm:$0x3]  ;;  %vm2897_vm4 = vcmask 523264  }
   0xe   : > { %3169 = vmatpush.bf16.msra.mxu3 %v378_v1  ;;  %3168 = vmatpush.bf16.msra.mxu2 %v378_v1  ;;  %s3170_s19 = smul.u32 328, %s4626_s16  ;;  %v994_v43 = vsel %vm376_vm0, %v3049_v42, 0  ;;  %v3068_v56 = vld [vmem:[%s4579_s1 + $0x8] sm:$0x3]  ;;  %s2992_s23 = sshll.u32 %s4626_s16, 3 }
   0xf   : > { %v1242_v57 = vsel %vm376_vm0, %v3068_v56, 0  ;;  %s3171_s14 = smul.u32 144, %s4626_s16  ;;  %s208_s26 = scalar_lea.vmem %s4582_s4, %s2992_s23 }
  0x10   : > { %s3240_s22 = scalar_lea.vmem %s4578_s0, %s3170_s19 }
  0x11   : > { %v265_v2 = vld [vmem:[%s3240_s22 + $0x1] sm:$0xff]  ;;  %v266_v3 = vld [vmem:[%s3240_s22 + $0x9] sm:$0xff]  ;;  %v291_v7 = vld [vmem:[%s3240_s22 + $0xd1] sm:$0xff]  ;;  %543 = vmatpush.bf16.msrb.mxu1 %v534_v29  ;;  %1251 = vmatpush.bf16.msrb.mxu0 %v1242_v57  ;;  %s3948_s19 = scalar_lea.vmem %s4581_s3, %s3171_s14 }
  0x12   : > { %v277_v4 = vld [vmem:[%s3240_s22 + $0x61] sm:$0xff]  ;;  %v301_v5 = vpack.c.bf16 %v266_v3, %v265_v2  ;;  %v278_v6 = vld [vmem:[%s3240_s22 + $0x69] sm:$0xff]  ;;  %v292_v8 = vld [vmem:[%s3240_s22 + $0xd9] sm:$0xff]  ;;  %755 = vmatpush.bf16.msrb.mxu2 %v746_v27  ;;  %1003 = vmatpush.bf16.msrb.mxu3 %v994_v43 }
  0x13   : > { %v307_v9 = vpack.c.bf16 %v278_v6, %v277_v4  ;;  %v314_v10 = vpack.c.bf16 %v292_v8, %v291_v7  ;;  %v285_v11 = vld [vmem:[%s3240_s22 + $0xa1] sm:$0xff]  ;;  %v286_v12 = vld [vmem:[%s3240_s22 + $0xa9] sm:$0xff]  ;;  %v267_v14 = vld [vmem:[%s3240_s22 + $0x11] sm:$0xff] }
  0x14   : > { %2994 = vmatmul.msk.bf16.vlgmr.msra.gmra.mxu0 %vm321_vm1, %v301_v5  ;;  %v311_v13 = vpack.c.bf16 %v286_v12, %v285_v11  ;;  %v268_v15 = vld [vmem:[%s3240_s22 + $0x19] sm:$0xff]  ;;  %v279_v16 = vld [vmem:[%s3240_s22 + $0x71] sm:$0xff]  ;;  %v293_v18 = vld [vmem:[%s3240_s22 + $0xe1] sm:$0xff] }
  0x15   : > { %3000 = vmatmul.msk.bf16.vlgmr.msra.gmra.mxu1 %vm321_vm1, %v307_v9  ;;  %3007 = vmatmul.msk.bf16.vlgmr.msra.gmra.mxu3 %vm321_vm1, %v314_v10  ;;  %v280_v17 = vld [vmem:[%s3240_s22 + $0x79] sm:$0xff]  ;;  %v294_v19 = vld [vmem:[%s3240_s22 + $0xe9] sm:$0xff]  ;;  %v287_v20 = vld [vmem:[%s3240_s22 + $0xb1] sm:$0xff]  ;;  %v302_v22 = vpack.c.bf16 %v268_v15, %v267_v14 }
  0x16   : > { %3004 = vmatmul.msk.bf16.vlgmr.msra.gmra.mxu2 %vm321_vm1, %v311_v13  ;;  %v288_v21 = vld [vmem:[%s3240_s22 + $0xb9] sm:$0xff]  ;;  %v308_v23 = vpack.c.bf16 %v280_v17, %v279_v16  ;;  %v315_v24 = vpack.c.bf16 %v294_v19, %v293_v18  ;;  %v269_v30 = vld [vmem:[%s3240_s22 + $0x21] sm:$0xff]  ;;  %v270_v31 = vld [vmem:[%s3240_s22 + $0x29] sm:$0xff] }
  0x17   : > { %v312_v25 = vpack.c.bf16 %v288_v21, %v287_v20  ;;  %v281_v32 = vld [vmem:[%s3240_s22 + $0x81] sm:$0xff]  ;;  %v282_v33 = vld [vmem:[%s3240_s22 + $0x89] sm:$0xff]  ;;  %v295_v34 = vld [vmem:[%s3240_s22 + $0xf1] sm:$0xff]  ;;  %v303_v38 = vpack.c.bf16 %v270_v31, %v269_v30 }
  0x18   : > { %v296_v35 = vld [vmem:[%s3240_s22 + $0xf9] sm:$0xff]  ;;  %v289_v36 = vld [vmem:[%s3240_s22 + $0xc1] sm:$0xff]  ;;  %v290_v37 = vld [vmem:[%s3240_s22 + $0xc9] sm:$0xff]  ;;  %v309_v39 = vpack.c.bf16 %v282_v33, %v281_v32 }
  0x19   : > { %v316_v40 = vpack.c.bf16 %v296_v35, %v295_v34  ;;  %v313_v41 = vpack.c.bf16 %v290_v37, %v289_v36  ;;  %v271_v44 = vld [vmem:[%s3240_s22 + $0x31] sm:$0xff]  ;;  %v272_v45 = vld [vmem:[%s3240_s22 + $0x39] sm:$0xff]  ;;  %v297_v48 = vld [vmem:[%s3240_s22 + $0x101] sm:$0xff] }
  0x1a   : > { %v283_v46 = vld [vmem:[%s3240_s22 + $0x91] sm:$0xff]  ;;  %v284_v47 = vld [vmem:[%s3240_s22 + $0x99] sm:$0xff]  ;;  %v298_v49 = vld [vmem:[%s3240_s22 + $0x109] sm:$0xff]  ;;  %v304_v52 = vpack.c.bf16 %v272_v45, %v271_v44 }
  0x1b   : > { %v635_v50 = vld [vmem:[%s3240_s22 + $0x2] sm:$0xff]  ;;  %v636_v51 = vld [vmem:[%s3240_s22 + $0xa] sm:$0xff]  ;;  %v310_v53 = vpack.c.bf16 %v284_v47, %v283_v46  ;;  %v317_v54 = vpack.c.bf16 %v298_v49, %v297_v48  ;;  %v300_v61 = vld [vmem:[%s3240_s22 + $0x119] sm:$0xff] }
  0x1c   : > { %v671_v55 = vpack.c.bf16 %v636_v51, %v635_v50  ;;  %v273_v58 = vld [vmem:[%s3240_s22 + $0x41] sm:$0xff]  ;;  %v274_v59 = vld [vmem:[%s3240_s22 + $0x49] sm:$0xff]  ;;  %v299_v60 = vld [vmem:[%s3240_s22 + $0x111] sm:$0xff] }
  0x1d   : > { %v210_v62 = vld [vmem:[%s3240_s22] sm:$0xff]  ;;  %v211_v63 = vld [vmem:[%s3240_s22 + $0x8] sm:$0xff]  ;;  %v637_v0 = vld [vmem:[%s3240_s22 + $0x12] sm:$0xff]  ;;  %v305_v2 = vpack.c.bf16 %v274_v59, %v273_v58  ;;  %v318_v3 = vpack.c.bf16 %v300_v61, %v299_v60 }
  0x1e   : > { %v638_v1 = vld [vmem:[%s3240_s22 + $0x1a] sm:$0xff]  ;;  %v246_v4 = vpack.c.bf16 %v211_v63, %v210_v62  ;;  %v275_v6 = vld [vmem:[%s3240_s22 + $0x51] sm:$0xff]  ;;  %v639_v10 = vld [vmem:[%s3240_s22 + $0x22] sm:$0xff] }
  0x1f   : > { %v672_v5 = vpack.c.bf16 %v638_v1, %v637_v0  ;;  %v276_v7 = vld [vmem:[%s3240_s22 + $0x59] sm:$0xff]  ;;  %v212_v8 = vld [vmem:[%s3240_s22 + $0x10] sm:$0xff]  ;;  %v215_v18 = vld [vmem:[%s3240_s22 + $0x28] sm:$0xff] }
  0x20   : > { %v213_v9 = vld [vmem:[%s3240_s22 + $0x18] sm:$0xff]  ;;  %v640_v11 = vld [vmem:[%s3240_s22 + $0x2a] sm:$0xff]  ;;  %v306_v12 = vpack.c.bf16 %v276_v7, %v275_v6  ;;  %v214_v17 = vld [vmem:[%s3240_s22 + $0x20] sm:$0xff] }
  0x21   : > { %v247_v13 = vpack.c.bf16 %v213_v9, %v212_v8  ;;  %v673_v14 = vpack.c.bf16 %v640_v11, %v639_v10  ;;  %v1131_v15 = vld [vmem:[%s3240_s22 + $0x13] sm:$0xff]  ;;  %v1132_v16 = vld [vmem:[%s3240_s22 + $0x1b] sm:$0xff]  ;;  %v644_v29 = vld [vmem:[%s3240_s22 + $0x4a] sm:$0xff] }
  0x22   : > { %v641_v19 = vld [vmem:[%s3240_s22 + $0x32] sm:$0xff]  ;;  %v642_v20 = vld [vmem:[%s3240_s22 + $0x3a] sm:$0xff]  ;;  %v1167_v21 = vpack.c.bf16 %v1132_v16, %v1131_v15  ;;  %v643_v28 = vld [vmem:[%s3240_s22 + $0x42] sm:$0xff] }
  0x23   : > { %v216_v26 = vld [vmem:[%s3240_s22 + $0x30] sm:$0xff]  ;;  %v217_v27 = vld [vmem:[%s3240_s22 + $0x38] sm:$0xff]  ;;  %v675_v32 = vpack.c.bf16 %v644_v29, %v643_v28  ;;  %v218_v35 = vld [vmem:[%s3240_s22 + $0x40] sm:$0xff] }
  0x24   : > { %2995 = vmatmul.msk.bf16.gmra.mxu0 %vm321_vm1, %v302_v22  ;;  %v248_v22 = vpack.c.bf16 %v215_v18, %v214_v17  ;;  %v249_v31 = vpack.c.bf16 %v217_v27, %v216_v26  ;;  %v1135_v33 = vld [vmem:[%s3240_s22 + $0x33] sm:$0xff]  ;;  %v1136_v34 = vld [vmem:[%s3240_s22 + $0x3b] sm:$0xff]  ;;  %v219_v36 = vld [vmem:[%s3240_s22 + $0x48] sm:$0xff] }
  0x25   : > { %3001 = vmatmul.msk.bf16.gmra.mxu1 %vm321_vm1, %v308_v23  ;;  %3008 = vmatmul.msk.bf16.gmra.mxu3 %vm321_vm1, %v315_v24  ;;  %v674_v23 = vpack.c.bf16 %v642_v20, %v641_v19  ;;  %v1133_v24 = vld [vmem:[%s3240_s22 + $0x23] sm:$0xff]  ;;  %v645_v37 = vld [vmem:[%s3240_s22 + $0x52] sm:$0xff]  ;;  %v650_v6 = vld [vmem:[%s3240_s22 + $0x7a] sm:$0xff] }
  0x26   : > { %3005 = vmatmul.msk.bf16.gmra.mxu2 %vm321_vm1, %v312_v25  ;;  %v1134_v25 = vld [vmem:[%s3240_s22 + $0x2b] sm:$0xff]  ;;  %v1137_v48 = vld [vmem:[%s3240_s22 + $0x43] sm:$0xff]  ;;  %v221_v51 = vld [vmem:[%s3240_s22 + $0x58] sm:$0xff] }
  0x27   : > { %v1168_v30 = vpack.c.bf16 %v1134_v25, %v1133_v24  ;;  %v1138_v49 = vld [vmem:[%s3240_s22 + $0x4b] sm:$0xff]  ;;  %v1139_v1 = vld [vmem:[%s3240_s22 + $0x53] sm:$0xff]  ;;  %v1141_v18 = vld [vmem:[%s3240_s22 + $0x63] sm:$0xff] }
  0x28   : > { %v220_v50 = vld [vmem:[%s3240_s22 + $0x50] sm:$0xff] }
  0x29   : > { %v251_v57 = vpack.c.bf16 %v221_v51, %v220_v50  ;;  %v1142_v19 = vld [vmem:[%s3240_s22 + $0x6b] sm:$0xff] }
  0x2a   : > { %v224_v20 = vld [vmem:[%s3240_s22 + $0x70] sm:$0xff]  ;;  %v1172_v25 = vpack.c.bf16 %v1142_v19, %v1141_v18 }
  0x2b   : > { %v656_v18 = vld [vmem:[%s3240_s22 + $0xaa] sm:$0xff] }
  0x34   : > { %2996 = vmatmul.msk.bf16.gmra.mxu0 %vm321_vm1, %v303_v38  ;;  %v646_v38 = vld [vmem:[%s3240_s22 + $0x5a] sm:$0xff] }
  0x35   : > { %3002 = vmatmul.msk.bf16.gmra.mxu1 %vm321_vm1, %v309_v39  ;;  %3009 = vmatmul.msk.bf16.gmra.mxu3 %vm321_vm1, %v316_v40  ;;  %v1169_v39 = vpack.c.bf16 %v1136_v34, %v1135_v33  ;;  %v676_v43 = vpack.c.bf16 %v646_v38, %v645_v37  ;;  %v226_v37 = vld [vmem:[%s3240_s22 + $0x80] sm:$0xff]  ;;  %v227_v38 = vld [vmem:[%s3240_s22 + $0x88] sm:$0xff] }
  0x36   : > { %3006 = vmatmul.msk.bf16.gmra.mxu2 %vm321_vm1, %v313_v41  ;;  %v250_v41 = vpack.c.bf16 %v219_v36, %v218_v35  ;;  %v1143_v35 = vld [vmem:[%s3240_s22 + $0x73] sm:$0xff]  ;;  %v1144_v36 = vld [vmem:[%s3240_s22 + $0x7b] sm:$0xff]  ;;  %v254_v50 = vpack.c.bf16 %v227_v38, %v226_v37 }
  0x44   : > { %2997 = vmatmul.msk.bf16.gmra.mxu0 %vm321_vm1, %v304_v52  ;;  %v647_v52 = vld [vmem:[%s3240_s22 + $0x62] sm:$0xff] }
  0x45   : > { %3003 = vmatmul.msk.bf16.gmra.mxu1 %vm321_vm1, %v310_v53  ;;  %3010 = vmatmul.msk.bf16.gmra.mxu3 %vm321_vm1, %v317_v54  ;;  %v648_v53 = vld [vmem:[%s3240_s22 + $0x6a] sm:$0xff] }
  0x46   : > { %3031 = vmatmul.msk.bf16.vlgmr.msrb.gmra.mxu2 %vm321_vm1, %v671_v55  ;;  %v1170_v55 = vpack.c.bf16 %v1138_v49, %v1137_v48  ;;  %v677_v60 = vpack.c.bf16 %v648_v53, %v647_v52  ;;  %v1173_v48 = vpack.c.bf16 %v1144_v36, %v1143_v35 }
  0x54   : > { %2998 = vmatmul.msk.bf16.gmra.mxu0 %vm321_vm1, %v305_v2  ;;  %v1140_v2 = vld [vmem:[%s3240_s22 + $0x5b] sm:$0xff] }
  0x55   : > { %3011 = vmatmul.msk.bf16.gmra.mxu3 %vm321_vm1, %v318_v3  ;;  %3012 = vmatmul.msk.bf16.vlgmr.msrb.gmra.mxu1 %vm321_vm1, %v246_v4  ;;  %v222_v3 = vld [vmem:[%s3240_s22 + $0x60] sm:$0xff]  ;;  %v223_v4 = vld [vmem:[%s3240_s22 + $0x68] sm:$0xff]  ;;  %v1171_v8 = vpack.c.bf16 %v1140_v2, %v1139_v1 }
  0x56   : > { %3032 = vmatmul.msk.bf16.gmra.mxu2 %vm321_vm1, %v672_v5  ;;  %v252_v10 = vpack.c.bf16 %v223_v4, %v222_v3 }
  0x64   : > { %2999 = vmatmul.msk.bf16.gmra.mxu0 %vm321_vm1, %v306_v12 }
  0x65   : > { %3013 = vmatmul.msk.bf16.gmra.mxu1 %vm321_vm1, %v247_v13  ;;  %3050 = vmatmul.msk.bf16.vlgmr.msrb.gmra.mxu3 %vm321_vm1, %v672_v5  ;;  %v649_v5 = vld [vmem:[%s3240_s22 + $0x72] sm:$0xff] }
  0x66   : > { %3033 = vmatmul.msk.bf16.gmra.mxu2 %vm321_vm1, %v673_v14  ;;  %v678_v13 = vpack.c.bf16 %v650_v6, %v649_v5  ;;  %v1145_v5 = vld [vmem:[%s3240_s22 + $0x83] sm:$0xff]  ;;  %v1146_v6 = vld [vmem:[%s3240_s22 + $0x8b] sm:$0xff] }
  0x74   : > { %3069 = vmatmul.msk.bf16.vlgmr.msrb.gmra.mxu0 %vm321_vm1, %v1167_v21  ;;  %v225_v21 = vld [vmem:[%s3240_s22 + $0x78] sm:$0xff] }
  0x75   : > { %3014 = vmatmul.msk.bf16.gmra.mxu1 %vm321_vm1, %v248_v22  ;;  %3051 = vmatmul.msk.bf16.gmra.mxu3 %vm321_vm1, %v673_v14  ;;  %v651_v22 = vld [vmem:[%s3240_s22 + $0x82] sm:$0xff]  ;;  %v253_v27 = vpack.c.bf16 %v225_v21, %v224_v20  ;;  %v1174_v20 = vpack.c.bf16 %v1146_v6, %v1145_v5 }
  0x76   : > { %3034 = vmatmul.msk.bf16.gmra.mxu2 %vm321_vm1, %v674_v23 }
  0x84   : > { %3070 = vmatmul.msk.bf16.gmra.mxu0 %vm321_vm1, %v1168_v30 }
  0x85   : > { %3015 = vmatmul.msk.bf16.gmra.mxu1 %vm321_vm1, %v249_v31  ;;  %3052 = vmatmul.msk.bf16.gmra.mxu3 %vm321_vm1, %v674_v23  ;;  %v652_v23 = vld [vmem:[%s3240_s22 + $0x8a] sm:$0xff] }
  0x86   : > { %3035 = vmatmul.msk.bf16.gmra.mxu2 %vm321_vm1, %v675_v32  ;;  %v679_v30 = vpack.c.bf16 %v652_v23, %v651_v22 }
  0x91   : > { %v3354_v40 = vpop.f32.mrf.mxu0 }
  0x92   : > { %v3356_v42 = vpop.f32.mrf.mxu1 }
  0x94   : > { %3071 = vmatmul.msk.bf16.gmra.mxu0 %vm321_vm1, %v1169_v39  ;;  %v653_v39 = vld [vmem:[%s3240_s22 + $0x92] sm:$0xff] }
  0x95   : > { %3016 = vmatmul.msk.bf16.gmra.mxu1 %vm321_vm1, %v250_v41  ;;  %3053 = vmatmul.msk.bf16.gmra.mxu3 %vm321_vm1, %v675_v32  ;;  %v654_v41 = vld [vmem:[%s3240_s22 + $0x9a] sm:$0xff] }
  0x96   : > { %3036 = vmatmul.msk.bf16.gmra.mxu2 %vm321_vm1, %v676_v43  ;;  %v680_v53 = vpack.c.bf16 %v654_v41, %v653_v39  ;;  %v1147_v41 = vld [vmem:[%s3240_s22 + $0x93] sm:$0xff] }
  0x98   : > { %v3362_v44 = vpop.f32.mrf.mxu3 }
  0x99   : > { %v3364_v45 = vpop.f32.mrf.mxu0  ;;  %v3366_v46 = vpop.f32.mrf.mxu2 }
  0x9a   : > { %v3368_v47 = vpop.f32.mrf.mxu1 }
  0xa0   : > { %v3376_v54 = vpop.f32.mrf.mxu3 }
  0xa1   : > { %v3378_v56 = vpop.f32.mrf.mxu0  ;;  %v3380_v58 = vpop.f32.mrf.mxu2 }
  0xa2   : > { %v3382_v59 = vpop.f32.mrf.mxu1 }
  0xa4   : > { %3072 = vmatmul.msk.bf16.gmra.mxu0 %vm321_vm1, %v1170_v55 }
  0xa5   : > { %3017 = vmatmul.msk.bf16.gmra.mxu1 %vm321_vm1, %v251_v57  ;;  %3054 = vmatmul.msk.bf16.gmra.mxu3 %vm321_vm1, %v676_v43 }
  0xa6   : > { %3037 = vmatmul.msk.bf16.gmra.mxu2 %vm321_vm1, %v677_v60 }
  0xa8   : > { %v3388_v61 = vpop.f32.mrf.mxu3 }
  0xa9   : > { %v3390_v62 = vpop.f32.mrf.mxu0  ;;  %v3392_v63 = vpop.f32.mrf.mxu2 }
  0xaa   : > { %v3394_v0 = vpop.f32.mrf.mxu1 }
  0xb0   : > { %v3402_v7 = vpop.f32.mrf.mxu3 }
  0xb1   : > { %v3404_v9 = vpop.f32.mrf.mxu0  ;;  %v3406_v11 = vpop.f32.mrf.mxu2 }
  0xb2   : > { %v3408_v12 = vpop.f32.mrf.mxu1 }
  0xb4   : > { %3073 = vmatmul.msk.bf16.gmra.mxu0 %vm321_vm1, %v1171_v8  ;;  %v228_v8 = vld [vmem:[%s3240_s22 + $0x90] sm:$0xff] }
  0xb5   : > { %3018 = vmatmul.msk.bf16.gmra.mxu1 %vm321_vm1, %v252_v10  ;;  %3055 = vmatmul.msk.bf16.gmra.mxu3 %vm321_vm1, %v677_v60  ;;  %v229_v10 = vld [vmem:[%s3240_s22 + $0x98] sm:$0xff] }
  0xb6   : > { %3038 = vmatmul.msk.bf16.gmra.mxu2 %vm321_vm1, %v678_v13  ;;  %v255_v22 = vpack.c.bf16 %v229_v10, %v228_v8 }
  0xb8   : > { %v3414_v14 = vpop.f32.mrf.mxu3 }
  0xb9   : > { %v3416_v15 = vpop.f32.mrf.mxu0  ;;  %v3418_v16 = vpop.f32.mrf.mxu2 }
  0xba   : > { %v3420_v17 = vpop.f32.mrf.mxu1 }
  0xc0   : > { %v3428_v24 = vpop.f32.mrf.mxu3 }
  0xc1   : > { %v3430_v26 = vpop.f32.mrf.mxu0  ;;  %v3432_v28 = vpop.f32.mrf.mxu2 }
  0xc2   : > { %v3434_v29 = vpop.f32.mrf.mxu1 }
  0xc4   : > { %3074 = vmatmul.msk.bf16.gmra.mxu0 %vm321_vm1, %v1172_v25 }
  0xc5   : > { %3019 = vmatmul.msk.bf16.gmra.mxu1 %vm321_vm1, %v253_v27  ;;  %3056 = vmatmul.msk.bf16.gmra.mxu3 %vm321_vm1, %v678_v13  ;;  %v655_v13 = vld [vmem:[%s3240_s22 + $0xa2] sm:$0xff] }
  0xc6   : > { %3039 = vmatmul.msk.bf16.gmra.mxu2 %vm321_vm1, %v679_v30  ;;  %v681_v27 = vpack.c.bf16 %v656_v18, %v655_v13 }
  0xc8   : > { %v3440_v31 = vpop.f32.mrf.mxu3 }
  0xc9   : > { %v3442_v32 = vpop.f32.mrf.mxu0  ;;  %v757_v33 = vpop.f32.mrf.mxu2 }
  0xca   : > { %v3444_v34 = vpop.f32.mrf.mxu1 }
  0xd0   : > { %v3452_v43 = vpop.f32.mrf.mxu3 }
  0xd1   : > { %v3454_v49 = vpop.f32.mrf.mxu0  ;;  %v759_v51 = vpop.f32.mrf.mxu2 }
  0xd2   : > { %v545_v52 = vpop.f32.mrf.mxu1 }
  0xd3   : > { %v546_v55 = vadd.f32 %v545_v52, %v3354_v40  ;;  %v657_v52 = vld [vmem:[%s3240_s22 + $0xb2] sm:$0xff] }
  0xd4   : > { %3075 = vmatmul.msk.bf16.gmra.mxu0 %vm321_vm1, %v1173_v48  ;;  %v1148_v48 = vld [vmem:[%s3240_s22 + $0x9b] sm:$0xff] }
  0xd5   : > { %v847_v57 = vadd.f32 %v757_v33, %v546_v55  ;;  %3020 = vmatmul.msk.bf16.gmra.mxu1 %vm321_vm1, %v254_v50  ;;  %3057 = vmatmul.msk.bf16.gmra.mxu3 %vm321_vm1, %v679_v30  ;;  %v230_v50 = vld [vmem:[%s3240_s22 + $0xa0] sm:$0xff] }
  0xd6   : > { %3040 = vmatmul.msk.bf16.gmra.mxu2 %vm321_vm1, %v680_v53  ;;  %v658_v55 = vld [vmem:[%s3240_s22 + $0xba] sm:$0xff] }
  0xd7   : > { %v682_v10 = vpack.c.bf16 %v658_v55, %v657_v52 }
  0xd8   : > { %v3461_v60 = vpop.f32.mrf.mxu3 }
  0xd9   : > { %v3463_v1 = vpop.f32.mrf.mxu0  ;;  %v762_v2 = vpop.f32.mrf.mxu2 }
  0xda   : > { %v547_v3 = vpop.f32.mrf.mxu1 }
  0xdb   : > { %v548_v4 = vadd.f32 %v547_v3, %v3364_v45  ;;  %v1175_v3 = vpack.c.bf16 %v1148_v48, %v1147_v41  ;;  %v660_v41 = vld [vmem:[%s3240_s22 + $0xca] sm:$0xff] }
  0xdd   : > { %v848_v40 = vadd.f32 %v759_v51, %v548_v4  ;;  %v231_v51 = vld [vmem:[%s3240_s22 + $0xa8] sm:$0xff] }
  0xde   : > { %v256_v5 = vpack.c.bf16 %v231_v51, %v230_v50 }
  0xe0   : > { %v3472_v19 = vpop.f32.mrf.mxu3 }
  0xe1   : > { %v3474_v21 = vpop.f32.mrf.mxu0  ;;  %v764_v23 = vpop.f32.mrf.mxu2 }
  0xe2   : > { %v550_v25 = vpop.f32.mrf.mxu1 }
  0xe3   : > { %v551_v45 = vadd.f32 %v550_v25, %v3378_v56 }
  0xe4   : > { %3076 = vmatmul.msk.bf16.gmra.mxu0 %vm321_vm1, %v1174_v20 }
  0xe5   : > { %v849_v30 = vadd.f32 %v762_v2, %v551_v45  ;;  %3021 = vmatmul.msk.bf16.gmra.mxu1 %vm321_vm1, %v255_v22  ;;  %3058 = vmatmul.msk.bf16.gmra.mxu3 %vm321_vm1, %v680_v53 }
  0xe6   : > { %3041 = vmatmul.msk.bf16.gmra.mxu2 %vm321_vm1, %v681_v27 }
  0xe8   : > { %v1005_v33 = vpop.f32.mrf.mxu3 }
  0xe9   : > { %v1095_v35 = vadd.f32 %v1005_v33, %v847_v57  ;;  %v3481_v36 = vpop.f32.mrf.mxu0  ;;  %v767_v37 = vpop.f32.mrf.mxu2  ;;  %v1149_v33 = vld [vmem:[%s3240_s22 + $0xa3] sm:$0xff] }
  0xea   : > { %v552_v38 = vpop.f32.mrf.mxu1 }
  0xeb   : > { %v553_v56 = vadd.f32 %v552_v38, %v3390_v62  ;;  %v233_v38 = vld [vmem:[%s3240_s22 + $0xb8] sm:$0xff] }
  0xed   : > { %v850_v39 = vadd.f32 %v764_v23, %v553_v56  ;;  %v659_v56 = vld [vmem:[%s3240_s22 + $0xc2] sm:$0xff] }
  0xf0   : > { %v1007_v2 = vpop.f32.mrf.mxu3 }
  0xf1   : > { %v1096_v53 = vadd.f32 %v1007_v2, %v848_v40  ;;  %v1253_v4 = vpop.f32.mrf.mxu0  ;;  %v769_v6 = vpop.f32.mrf.mxu2 }
  0xf2   : > { %v555_v57 = vpop.f32.mrf.mxu1  ;;  %v3490_v8 = vadd.f32 %v1253_v4, %v1095_v35  ;;  %v1150_v35 = vld [vmem:[%s3240_s22 + $0xab] sm:$0xff] }
  0xf3   : > { %v556_v62 = vadd.f32 %v555_v57, %v3404_v9 }
  0xf4   : > { %3077 = vmatmul.msk.bf16.gmra.mxu0 %vm321_vm1, %v1175_v3  ;;  %v683_v3 = vpack.c.bf16 %v660_v41, %v659_v56 }
  0xf5   : > { %v851_v13 = vadd.f32 %v767_v37, %v556_v62  ;;  %3022 = vmatmul.msk.bf16.gmra.mxu1 %vm321_vm1, %v256_v5  ;;  %3059 = vmatmul.msk.bf16.gmra.mxu3 %vm321_vm1, %v681_v27  ;;  %v232_v37 = vld [vmem:[%s3240_s22 + $0xb0] sm:$0xff]  ;;  %v1176_v27 = vpack.c.bf16 %v1150_v35, %v1149_v33  ;;  %v662_v33 = vld [vmem:[%s3240_s22 + $0xda] sm:$0xff] }
  0xf6   : > { %3042 = vmatmul.msk.bf16.gmra.mxu2 %vm321_vm1, %v682_v10  ;;  %v257_v52 = vpack.c.bf16 %v233_v38, %v232_v37 }
  0xf8   : > { %v1010_v40 = vpop.f32.mrf.mxu3 }
  0xf9   : > { %v1097_v18 = vadd.f32 %v1010_v40, %v849_v30  ;;  %v1255_v20 = vpop.f32.mrf.mxu0  ;;  %v772_v22 = vpop.f32.mrf.mxu2 }
  0xfa   : > { %v557_v23 = vpop.f32.mrf.mxu1  ;;  %v3497_v25 = vadd.f32 %v1255_v20, %v1096_v53  ;;  %v1152_v20 = vld [vmem:[%s3240_s22 + $0xbb] sm:$0xff] }
  0xfb   : > { %v558_v9 = vadd.f32 %v557_v23, %v3416_v15  ;;  %v235_v23 = vld [vmem:[%s3240_s22 + $0xc8] sm:$0xff] }
  0xfd   : > { %v852_v45 = vadd.f32 %v769_v6, %v558_v9  ;;  %v661_v9 = vld [vmem:[%s3240_s22 + $0xd2] sm:$0xff] }
 0x100   : > { %v1012_v48 = vpop.f32.mrf.mxu3 }
 0x101   : > { %v1098_v50 = vadd.f32 %v1012_v48, %v850_v39  ;;  %v1258_v51 = vpop.f32.mrf.mxu0  ;;  %v774_v30 = vpop.f32.mrf.mxu2 }
 0x102   : > { %v560_v55 = vpop.f32.mrf.mxu1  ;;  %v3506_v2 = vadd.f32 %v1258_v51, %v1097_v18  ;;  %v1151_v18 = vld [vmem:[%s3240_s22 + $0xb3] sm:$0xff] }
 0x103   : > { %v561_v15 = vadd.f32 %v560_v55, %v3430_v26 }
 0x104   : > { %3078 = vmatmul.msk.bf16.gmra.mxu0 %vm321_vm1, %v1176_v27  ;;  %v684_v27 = vpack.c.bf16 %v662_v33, %v661_v9 }
 0x105   : > { %v853_v53 = vadd.f32 %v772_v22, %v561_v15  ;;  %3023 = vmatmul.msk.bf16.gmra.mxu1 %vm321_vm1, %v257_v52  ;;  %3060 = vmatmul.msk.bf16.gmra.mxu3 %vm321_vm1, %v682_v10  ;;  %v234_v22 = vld [vmem:[%s3240_s22 + $0xc0] sm:$0xff]  ;;  %v1177_v10 = vpack.c.bf16 %v1152_v20, %v1151_v18  ;;  %v664_v18 = vld [vmem:[%s3240_s22 + $0xea] sm:$0xff] }
 0x106   : > { %3043 = vmatmul.msk.bf16.gmra.mxu2 %vm321_vm1, %v683_v3  ;;  %v258_v56 = vpack.c.bf16 %v235_v23, %v234_v22 }
 0x108   : > { %v1015_v39 = vpop.f32.mrf.mxu3 }
 0x109   : > { %v1099_v4 = vadd.f32 %v1015_v39, %v851_v13  ;;  %v1260_v5 = vpop.f32.mrf.mxu0  ;;  %v777_v6 = vpop.f32.mrf.mxu2 }
 0x10a   : > { %v562_v57 = vpop.f32.mrf.mxu1  ;;  %v3513_v62 = vadd.f32 %v1260_v5, %v1098_v50  ;;  %v1154_v5 = vld [vmem:[%s3240_s22 + $0xcb] sm:$0xff] }
 0x10b   : > { %v563_v26 = vadd.f32 %v562_v57, %v3442_v32  ;;  %v237_v57 = vld [vmem:[%s3240_s22 + $0xd8] sm:$0xff] }
 0x10d   : > { %v854_v40 = vadd.f32 %v774_v30, %v563_v26  ;;  %v663_v26 = vld [vmem:[%s3240_s22 + $0xe2] sm:$0xff] }
 0x110   : > { %v1017_v35 = vpop.f32.mrf.mxu3 }
 0x111   : > { %v1100_v37 = vadd.f32 %v1017_v35, %v852_v45  ;;  %v1263_v38 = vpop.f32.mrf.mxu0  ;;  %v779_v13 = vpop.f32.mrf.mxu2 }
 0x112   : > { %v565_v41 = vpop.f32.mrf.mxu1  ;;  %v3522_v48 = vadd.f32 %v1263_v38, %v1099_v4  ;;  %v1153_v4 = vld [vmem:[%s3240_s22 + $0xc3] sm:$0xff] }
 0x113   : > { %v566_v32 = vadd.f32 %v565_v41, %v3454_v49 }
 0x114   : > { %3079 = vmatmul.msk.bf16.gmra.mxu0 %vm321_vm1, %v1177_v10  ;;  %v685_v10 = vpack.c.bf16 %v664_v18, %v663_v26 }
 0x115   : > { %v855_v50 = vadd.f32 %v777_v6, %v566_v32  ;;  %3024 = vmatmul.msk.bf16.gmra.mxu1 %vm321_vm1, %v258_v56  ;;  %3061 = vmatmul.msk.bf16.gmra.mxu3 %vm321_vm1, %v683_v3  ;;  %v236_v6 = vld [vmem:[%s3240_s22 + $0xd0] sm:$0xff]  ;;  %v1178_v3 = vpack.c.bf16 %v1154_v5, %v1153_v4  ;;  %v666_v4 = vld [vmem:[%s3240_s22 + $0xfa] sm:$0xff] }
 0x116   : > { %3044 = vmatmul.msk.bf16.gmra.mxu2 %vm321_vm1, %v684_v27  ;;  %v259_v9 = vpack.c.bf16 %v237_v57, %v236_v6 }
 0x118   : > { %v1020_v45 = vpop.f32.mrf.mxu3 }
 0x119   : > { %v1101_v51 = vadd.f32 %v1020_v45, %v853_v53  ;;  %v1265_v52 = vpop.f32.mrf.mxu0  ;;  %v782_v30 = vpop.f32.mrf.mxu2 }
 0x11a   : > { %v567_v55 = vpop.f32.mrf.mxu1  ;;  %v3529_v15 = vadd.f32 %v1265_v52, %v1100_v37  ;;  %v1156_v52 = vld [vmem:[%s3240_s22 + $0xdb] sm:$0xff] }
 0x11b   : > { %v568_v49 = vadd.f32 %v567_v55, %v3463_v1  ;;  %v239_v55 = vld [vmem:[%s3240_s22 + $0xe8] sm:$0xff] }
 0x11d   : > { %v856_v39 = vadd.f32 %v779_v13, %v568_v49  ;;  %v665_v49 = vld [vmem:[%s3240_s22 + $0xf2] sm:$0xff] }
 0x120   : > { %v1022_v20 = vpop.f32.mrf.mxu3 }
 0x121   : > { %v1102_v22 = vadd.f32 %v1022_v20, %v854_v40  ;;  %v1268_v23 = vpop.f32.mrf.mxu0  ;;  %v784_v53 = vpop.f32.mrf.mxu2 }
 0x122   : > { %v570_v33 = vpop.f32.mrf.mxu1  ;;  %v3538_v35 = vadd.f32 %v1268_v23, %v1101_v51  ;;  %v1155_v51 = vld [vmem:[%s3240_s22 + $0xd3] sm:$0xff]  ;;  %v3194_v23 = vmov 0  }
 0x123   : > { %v571_v1 = vadd.f32 %v570_v33, %v3474_v21  ;;  %3184 = vset.pattern.permute.xlu1 %v3194_v23  ;;  %3185 = vset.pattern.permute.xlu2 %v3194_v23 }
 0x124   : > { %3080 = vmatmul.msk.bf16.gmra.mxu0 %vm321_vm1, %v1178_v3  ;;  %v686_v3 = vpack.c.bf16 %v666_v4, %v665_v49  ;;  %3183 = vset.pattern.permute.xlu0 %v3194_v23 }
 0x125   : > { %v857_v37 = vadd.f32 %v782_v30, %v571_v1  ;;  %3025 = vmatmul.msk.bf16.gmra.mxu1 %vm321_vm1, %v259_v9  ;;  %3062 = vmatmul.msk.bf16.gmra.mxu3 %vm321_vm1, %v684_v27  ;;  %v238_v30 = vld [vmem:[%s3240_s22 + $0xe0] sm:$0xff]  ;;  %v1179_v27 = vpack.c.bf16 %v1156_v52, %v1155_v51  ;;  %v241_v51 = vld [vmem:[%s3240_s22 + $0xf8] sm:$0xff] }
 0x126   : > { %3045 = vmatmul.msk.bf16.gmra.mxu2 %vm321_vm1, %v685_v10  ;;  %v260_v26 = vpack.c.bf16 %v239_v55, %v238_v30  ;;  %v667_v52 = vld [vmem:[%s3240_s22 + $0x102] sm:$0xff]  ;;  %v668_v30 = vld [vmem:[%s3240_s22 + $0x10a] sm:$0xff] }
 0x128   : > { %v1025_v40 = vpop.f32.mrf.mxu3 }
 0x129   : > { %v1103_v38 = vadd.f32 %v1025_v40, %v855_v50  ;;  %v1270_v56 = vpop.f32.mrf.mxu0  ;;  %v787_v13 = vpop.f32.mrf.mxu2 }
 0x12a   : > { %v572_v41 = vpop.f32.mrf.mxu1  ;;  %v3545_v32 = vadd.f32 %v1270_v56, %v1102_v22  ;;  %v1157_v56 = vld [vmem:[%s3240_s22 + $0xe3] sm:$0xff] }
 0x12b   : > { %v573_v21 = vadd.f32 %v572_v41, %v3481_v36  ;;  %v2495_v41 = vld [vmem:[%s4580_s2 + $0x78] sm:$0xff] }
 0x12d   : > { %v858_v45 = vadd.f32 %v784_v53, %v573_v21  ;;  %v240_v21 = vld [vmem:[%s3240_s22 + $0xf0] sm:$0xff] }
 0x130   : > { %v1027_v5 = vpop.f32.mrf.mxu3 }
 0x131   : > { %v1104_v6 = vadd.f32 %v1027_v5, %v856_v39  ;;  %v1273_v57 = vpop.f32.mrf.mxu0  ;;  %v789_v50 = vpop.f32.mrf.mxu2  ;;  %v2509_v39 = vld [vmem:[%s4580_s2 + $0xe8] sm:$0xff]  ;;  %v261_v5 = vpack.c.bf16 %v241_v51, %v240_v21  ;;  %v670_v51 = vld [vmem:[%s3240_s22 + $0x11a] sm:$0xff] }
 0x132   : > { %v575_v18 = vpop.f32.mrf.mxu1  ;;  %v3554_v20 = vadd.f32 %v1273_v57, %v1103_v38  ;;  %2663 = vperm.xlu1 %3184, %v2509_v39   ;;  %v687_v57 = vpack.c.bf16 %v668_v30, %v667_v52  ;;  %v243_v21 = vld [vmem:[%s3240_s22 + $0x108] sm:$0xff] }
 0x133   : > { %v576_v22 = vadd.f32 %v575_v18, %v3356_v42  ;;  %v2493_v18 = vld [vmem:[%s4580_s2 + $0x68] sm:$0xff] }
 0x134   : > { %3081 = vmatmul.msk.bf16.gmra.mxu0 %vm321_vm1, %v1179_v27 }
 0x135   : > { %v859_v36 = vadd.f32 %v787_v13, %v576_v22  ;;  %3026 = vmatmul.msk.bf16.gmra.mxu1 %vm321_vm1, %v260_v26  ;;  %3063 = vmatmul.msk.bf16.gmra.mxu3 %vm321_vm1, %v685_v10  ;;  %v1158_v13 = vld [vmem:[%s3240_s22 + $0xeb] sm:$0xff] }
 0x136   : > { %3046 = vmatmul.msk.bf16.gmra.mxu2 %vm321_vm1, %v686_v3  ;;  %v1180_v55 = vpack.c.bf16 %v1158_v13, %v1157_v56  ;;  %v2505_v56 = vld [vmem:[%s4580_s2 + $0xc8] sm:$0xff] }
 0x138   : > { %v1030_v42 = vpop.f32.mrf.mxu3 }
 0x139   : > { %v1105_v9 = vadd.f32 %v1030_v42, %v857_v37  ;;  %v1275_v53 = vpop.f32.mrf.mxu0  ;;  %v792_v33 = vpop.f32.mrf.mxu2 }
 0x13a   : > { %v577_v10 = vpop.f32.mrf.mxu1  ;;  %v3564_v1 = vadd.f32 %v1275_v53, %v1104_v6  ;;  %2593 = vperm.xlu1 %3184, %v2495_v41   ;;  %v1159_v53 = vld [vmem:[%s3240_s22 + $0xf3] sm:$0xff]  ;;  %v242_v41 = vld [vmem:[%s3240_s22 + $0x100] sm:$0xff] }
 0x13b   : > { %v578_v40 = vadd.f32 %v577_v10, %v3368_v47 }
 0x13d   : > { %v860_v38 = vadd.f32 %v789_v50, %v578_v40  ;;  %v1160_v40 = vld [vmem:[%s3240_s22 + $0xfb] sm:$0xff] }
 0x13e   : > { %v1181_v30 = vpack.c.bf16 %v1160_v40, %v1159_v53 }
 0x140   : > { %v1032_v37 = vpop.f32.mrf.mxu3 }
 0x141   : > { %v1106_v49 = vadd.f32 %v1032_v37, %v858_v45  ;;  %v1278_v4 = vpop.f32.mrf.mxu0  ;;  %v794_v27 = vpop.f32.mrf.mxu2  ;;  %v2508_v45 = vld [vmem:[%s4580_s2 + $0xe0] sm:$0xff]  ;;  %v3087_v37 = vld [vmem:[%s4579_s1 + $0xa] sm:$0x3] }
 0x142   : > { %v580_v6 = vpop.f32.mrf.mxu1  ;;  %v3576_v47 = vadd.f32 %v1278_v4, %v1105_v9  ;;  %2658 = vperm.xlu2 %3185, %v2508_v45   ;;  %2583 = vperm.xlu1 %3184, %v2493_v18   ;;  %v262_v4 = vpack.c.bf16 %v243_v21, %v242_v41  ;;  %v244_v41 = vld [vmem:[%s3240_s22 + $0x110] sm:$0xff]  ;;  %v1627_v21 = vld [vmem:[%s3240_s22 + $0x24] sm:$0xff] }
 0x143   : > { %v581_v26 = vadd.f32 %v580_v6, %v3382_v59 }
 0x144   : > { %3082 = vmatmul.msk.bf16.gmra.mxu0 %vm321_vm1, %v1180_v55 }
 0x145   : > { %v861_v50 = vadd.f32 %v792_v33, %v581_v26  ;;  %3027 = vmatmul.msk.bf16.gmra.mxu1 %vm321_vm1, %v261_v5  ;;  %3064 = vmatmul.msk.bf16.gmra.mxu3 %vm321_vm1, %v686_v3  ;;  %v3106_v33 = vld [vmem:[%s4579_s1 + $0xc] sm:$0x3] }
 0x146   : > { %3047 = vmatmul.msk.bf16.gmra.mxu2 %vm321_vm1, %v687_v57  ;;  %v1738_v13 = vsel %vm376_vm0, %v3106_v33, 0  ;;  %v1161_v33 = vld [vmem:[%s3240_s22 + $0x103] sm:$0xff] }
 0x147   : > { %1747 = vmatpush.bf16.msra.mxu2 %v1738_v13  ;;  %v2502_v13 = vld [vmem:[%s4580_s2 + $0xb0] sm:$0xff] }
 0x148   : > { %v1035_v59 = vpop.f32.mrf.mxu3 }
 0x149   : > { %v1107_v22 = vadd.f32 %v1035_v59, %v859_v36  ;;  %v1280_v39 = vpop.f32.mrf.mxu0  ;;  %v797_v3 = vpop.f32.mrf.mxu2  ;;  %v2494_v36 = vld [vmem:[%s4580_s2 + $0x70] sm:$0xff] }
 0x14a   : > { %v582_v23 = vpop.f32.mrf.mxu1  ;;  %v3589_v42 = vadd.f32 %v1280_v39, %v1106_v49  ;;  %2588 = vperm.xlu2 %3185, %v2494_v36   ;;  %2643 = vperm.xlu1 %3184, %v2505_v56   ;;  %v1162_v36 = vld [vmem:[%s3240_s22 + $0x10b] sm:$0xff]  ;;  %v2491_v56 = vld [vmem:[%s4580_s2 + $0x58] sm:$0xff] }
 0x14b   : > { %v583_v9 = vadd.f32 %v582_v23, %v3394_v0  ;;  %v669_v0 = vld [vmem:[%s3240_s22 + $0x112] sm:$0xff] }
 0x14c   : > { %v688_v45 = vpack.c.bf16 %v670_v51, %v669_v0  ;;  %v1628_v0 = vld [vmem:[%s3240_s22 + $0x2c] sm:$0xff] }
 0x14d   : > { %v862_v10 = vadd.f32 %v794_v27, %v583_v9  ;;  %v1490_v27 = vsel %vm376_vm0, %v3087_v37, 0 }
 0x14e   : > { %1499 = vmatpush.bf16.msra.mxu1 %v1490_v27 }
 0x150   : > { %v1037_v52 = vpop.f32.mrf.mxu3 }
 0x151   : > { %v1108_v55 = vadd.f32 %v1037_v52, %v860_v38  ;;  %v1283_v49 = vpop.f32.mrf.mxu0  ;;  %v799_v5 = vpop.f32.mrf.mxu2  ;;  %v2506_v38 = vld [vmem:[%s4580_s2 + $0xd0] sm:$0xff]  ;;  %v1182_v52 = vpack.c.bf16 %v1162_v36, %v1161_v33  ;;  %v1164_v36 = vld [vmem:[%s3240_s22 + $0x11b] sm:$0xff] }
 0x152   : > { %v585_v6 = vpop.f32.mrf.mxu1  ;;  %v3612_v26 = vadd.f32 %v1283_v49, %v1107_v22  ;;  %v2490_v22 = vld [vmem:[%s4580_s2 + $0x50] sm:$0xff]  ;;  %2648 = vperm.xlu2 %3185, %v2506_v38  }
 0x153   : > { %v586_v18 = vadd.f32 %v585_v6, %v3408_v12  ;;  %2568 = vperm.xlu1 %3184, %v2490_v22   ;;  %v3646_v6 = vpack.c.bf16 %v1628_v0, %v1627_v21  ;;  %v2487_v22 = vld [vmem:[%s4580_s2 + $0x38] sm:$0xff] }
 0x154   : > { %3083 = vmatmul.msk.bf16.gmra.mxu0 %vm321_vm1, %v1181_v30  ;;  %v1163_v33 = vld [vmem:[%s3240_s22 + $0x113] sm:$0xff]  ;;  %v1380_v0 = vld [vmem:[%s3240_s22 + $0x1c] sm:$0xff] }
 0x155   : > { %v863_v59 = vadd.f32 %v797_v3, %v586_v18  ;;  %3028 = vmatmul.msk.bf16.gmra.mxu1 %vm321_vm1, %v262_v4  ;;  %3065 = vmatmul.msk.bf16.gmra.mxu3 %vm321_vm1, %v687_v57  ;;  %v1379_v21 = vld [vmem:[%s3240_s22 + $0x14] sm:$0xff] }
 0x156   : > { %3048 = vmatmul.msk.bf16.gmra.mxu2 %vm321_vm1, %v688_v45 }
 0x158   : > { %v1040_v12 = vpop.f32.mrf.mxu3 }
 0x159   : > { %v1109_v39 = vadd.f32 %v1040_v12, %v861_v50  ;;  %v1285_v3 = vpop.f32.mrf.mxu0  ;;  %v802_v57 = vpop.f32.mrf.mxu2  ;;  %v245_v50 = vld [vmem:[%s3240_s22 + $0x118] sm:$0xff] }
 0x15a   : > { %v587_v23 = vpop.f32.mrf.mxu1  ;;  %v3625_v9 = vadd.f32 %v1285_v3, %v1108_v55  ;;  %2573 = vperm.xlu2 %3185, %v2491_v56   ;;  %v263_v55 = vpack.c.bf16 %v245_v50, %v244_v41  ;;  %v3144_v41 = vld [vmem:[%s4579_s1 + $0x10] sm:$0x3] }
 0x15b   : > { %v588_v53 = vadd.f32 %v587_v23, %v3420_v17  ;;  %2628 = vperm.xlu1 %3184, %v2502_v13   ;;  %v3125_v17 = vld [vmem:[%s4579_s1 + $0xe] sm:$0x3]  ;;  %v2488_v13 = vld [vmem:[%s4580_s2 + $0x40] sm:$0xff] }
 0x15c   : > { %v1986_v4 = vsel %vm376_vm0, %v3125_v17, 0  ;;  %v918_v50 = vld [vmem:[%s3240_s22 + $0x12a] sm:$0xff] }
 0x15d   : > { %v864_v40 = vadd.f32 %v799_v5, %v588_v53  ;;  %1995 = vmatpush.bf16.msra.mxu3 %v1986_v4  ;;  %v917_v53 = vld [vmem:[%s3240_s22 + $0x122] sm:$0xff]  ;;  %v1415_v4 = vpack.c.bf16 %v1380_v0, %v1379_v21 }
 0x15e   : > { %v2485_v21 = vld [vmem:[%s4580_s2 + $0x28] sm:$0xff] }
 0x15f   : > { %v1875_v0 = vld [vmem:[%s3240_s22 + $0x25] sm:$0xff] }
 0x160   : > { %v1042_v51 = vpop.f32.mrf.mxu3 }
 0x161   : > { %v1110_v30 = vadd.f32 %v1042_v51, %v862_v10  ;;  %v1288_v37 = vpop.f32.mrf.mxu0  ;;  %v804_v49 = vpop.f32.mrf.mxu2  ;;  %v2503_v10 = vld [vmem:[%s4580_s2 + $0xb8] sm:$0xff] }
 0x162   : > { %v590_v5 = vpop.f32.mrf.mxu1  ;;  %v3644_v27 = vadd.f32 %v1288_v37, %v1109_v39  ;;  %2633 = vperm.xlu2 %3185, %v2503_v10   ;;  %v1629_v51 = vld [vmem:[%s3240_s22 + $0x34] sm:$0xff] }
 0x163   : > { %v591_v18 = vadd.f32 %v590_v5, %v3434_v29  ;;  %2553 = vperm.xlu1 %3184, %v2487_v22  }
 0x164   : > { %3084 = vmatmul.msk.bf16.gmra.mxu0 %vm321_vm1, %v1182_v52  ;;  %v1630_v52 = vld [vmem:[%s3240_s22 + $0x3c] sm:$0xff] }
 0x165   : > { %v865_v38 = vadd.f32 %v802_v57, %v591_v18  ;;  %3029 = vmatmul.msk.bf16.gmra.mxu1 %vm321_vm1, %v263_v55  ;;  %3066 = vmatmul.msk.bf16.gmra.mxu3 %vm321_vm1, %v688_v45  ;;  %v3683_v22 = vpack.c.bf16 %v1630_v52, %v1629_v51  ;;  %v1632_v51 = vld [vmem:[%s3240_s22 + $0x4c] sm:$0xff] }
 0x166   : > { %3107 = vmatmul.msk.bf16.vlgmr.msra.gmra.mxu2 %vm321_vm1, %v3646_v6 }
 0x168   : > { %v1045_v29 = vpop.f32.mrf.mxu3 }
 0x169   : > { %v1111_v12 = vadd.f32 %v1045_v29, %v863_v59  ;;  %v1290_v39 = vpop.f32.mrf.mxu0  ;;  %v807_v45 = vpop.f32.mrf.mxu2  ;;  %v2499_v59 = vld [vmem:[%s4580_s2 + $0x98] sm:$0xff] }
 0x16a   : > { %v592_v3 = vpop.f32.mrf.mxu1  ;;  %v3660_v57 = vadd.f32 %v1290_v39, %v1110_v30  ;;  %2558 = vperm.xlu2 %3185, %v2488_v13   ;;  %v1183_v30 = vpack.c.bf16 %v1164_v36, %v1163_v33  ;;  %v1165_v13 = vld [vmem:[%s3240_s22 + $0x123] sm:$0xff] }
 0x16b   : > { %v593_v23 = vadd.f32 %v592_v3, %v3444_v34  ;;  %v2234_v34 = vsel %vm376_vm0, %v3144_v41, 0  ;;  %2613 = vperm.xlu1 %3184, %v2499_v59   ;;  %v1166_v59 = vld [vmem:[%s3240_s22 + $0x12b] sm:$0xff] }
 0x16c   : > { %2243 = vmatpush.bf16.msra.mxu0 %v2234_v34  ;;  %v1876_v34 = vld [vmem:[%s3240_s22 + $0x2d] sm:$0xff] }
 0x16d   : > { %v866_v56 = vadd.f32 %v804_v49, %v593_v23  ;;  %v936_v49 = vpack.c.bf16 %v918_v50, %v917_v53  ;;  %v2511_v50 = vld [vmem:[%s4580_s2 + $0xf8] sm:$0xff] }
 0x16e   : > { %2673 = vperm.xlu0 %3183, %v2511_v50  }
 0x170   : > { %v1047_v17 = vpop.f32.mrf.mxu3 }
 0x171   : > { %v1112_v37 = vadd.f32 %v1047_v17, %v864_v40  ;;  %v1293_v55 = vpop.f32.mrf.mxu0  ;;  %v809_v5 = vpop.f32.mrf.mxu2  ;;  %v2500_v40 = vld [vmem:[%s4580_s2 + $0xa0] sm:$0xff]  ;;  %v1184_v17 = vpack.c.bf16 %v1166_v59, %v1165_v13  ;;  %v2124_v59 = vld [vmem:[%s3240_s22 + $0x2e] sm:$0xff] }
 0x172   : > { %v595_v18 = vpop.f32.mrf.mxu1  ;;  %v3681_v10 = vadd.f32 %v1293_v55, %v1111_v12  ;;  %v2515_v12 = vld [vmem:[%s4580_s2 + $0x118] sm:$0xff]  ;;  %2618 = vperm.xlu2 %3185, %v2500_v40   ;;  %v1911_v55 = vpack.c.bf16 %v1876_v34, %v1875_v0  ;;  %v2123_v13 = vld [vmem:[%s3240_s22 + $0x26] sm:$0xff] }
 0x173   : > { %v596_v29 = vadd.f32 %v595_v18, %v3366_v46  ;;  %2693 = vperm.xlu1 %3184, %v2515_v12   ;;  %v2513_v12 = vld [vmem:[%s4580_s2 + $0x108] sm:$0xff]  ;;  %v1877_v0 = vld [vmem:[%s3240_s22 + $0x35] sm:$0xff]  ;;  %v1878_v34 = vld [vmem:[%s3240_s22 + $0x3d] sm:$0xff] }
 0x174   : > { %3085 = vmatmul.msk.bf16.gmra.mxu0 %vm321_vm1, %v1183_v30 }
 0x175   : > { %v867_v39 = vadd.f32 %v807_v45, %v596_v29  ;;  %3067 = vmatmul.msk.bf16.gmra.mxu3 %vm321_vm1, %v936_v49  ;;  %3088 = vmatmul.msk.bf16.vlgmr.msra.gmra.mxu1 %vm321_vm1, %v1415_v4 }
 0x176   : > { %3108 = vmatmul.msk.bf16.gmra.mxu2 %vm321_vm1, %v3683_v22 }
 0x178   : > { %v1050_v46 = vpop.f32.mrf.mxu3 }
 0x179   : > { %v1113_v45 = vadd.f32 %v1050_v46, %v865_v38  ;;  %v1295_v3 = vpop.f32.mrf.mxu0  ;;  %v812_v23 = vpop.f32.mrf.mxu2  ;;  %v2514_v38 = vld [vmem:[%s4580_s2 + $0x110] sm:$0xff] }
 0x17a   : > { %v597_v53 = vpop.f32.mrf.mxu1  ;;  %v3697_v33 = vadd.f32 %v1295_v3, %v1112_v37  ;;  %2543 = vperm.xlu2 %3185, %v2485_v21   ;;  %v2483_v21 = vld [vmem:[%s4580_s2 + $0x18] sm:$0xff] }
 0x17b   : > { %v598_v36 = vadd.f32 %v597_v53, %v3380_v58  ;;  %v1631_v58 = vld [vmem:[%s3240_s22 + $0x44] sm:$0xff]  ;;  %2688 = vperm.xlu1 %3184, %v2514_v38   ;;  %v2507_v38 = vld [vmem:[%s4580_s2 + $0xd8] sm:$0xff] }
 0x17c   : > { %v3717_v18 = vpack.c.bf16 %v1632_v51, %v1631_v58  ;;  %v1633_v58 = vld [vmem:[%s3240_s22 + $0x54] sm:$0xff] }
 0x17d   : > { %v868_v41 = vadd.f32 %v809_v5, %v598_v36 }
 0x180   : > { %v1052_v52 = vpop.f32.mrf.mxu3 }
 0x181   : > { %v1114_v30 = vadd.f32 %v1052_v52, %v866_v56  ;;  %v1298_v37 = vpop.f32.mrf.mxu0  ;;  %v814_v49 = vpop.f32.mrf.mxu2  ;;  %v2510_v56 = vld [vmem:[%s4580_s2 + $0xf0] sm:$0xff]  ;;  %v2159_v52 = vpack.c.bf16 %v2124_v59, %v2123_v13  ;;  %v2126_v59 = vld [vmem:[%s3240_s22 + $0x3e] sm:$0xff] }
 0x182   : > { %v600_v4 = vpop.f32.mrf.mxu1  ;;  %v3715_v5 = vadd.f32 %v1298_v37, %v1113_v45  ;;  %2668 = vperm.xlu0 %3183, %v2510_v56   ;;  %v1912_v37 = vpack.c.bf16 %v1878_v34, %v1877_v0  ;;  %v1635_v0 = vld [vmem:[%s3240_s22 + $0x64] sm:$0xff]  ;;  %v1636_v34 = vld [vmem:[%s3240_s22 + $0x6c] sm:$0xff] }
 0x183   : > { %v601_v29 = vadd.f32 %v600_v4, %v3392_v63  ;;  %v2484_v63 = vld [vmem:[%s4580_s2 + $0x20] sm:$0xff]  ;;  %2683 = vperm.xlu1 %3184, %v2513_v12  }
 0x184   : > { %3086 = vmatmul.msk.bf16.gmra.mxu0 %vm321_vm1, %v1184_v17  ;;  %2538 = vperm.xlu2 %3185, %v2484_v63   ;;  %v2482_v63 = vld [vmem:[%s4580_s2 + $0x10] sm:$0xff] }
 0x185   : > { %v869_v40 = vadd.f32 %v812_v23, %v601_v29  ;;  %3089 = vmatmul.msk.bf16.gmra.mxu1 %vm321_vm1, %v3646_v6  ;;  %3126 = vmatmul.msk.bf16.vlgmr.msra.gmra.mxu3 %vm321_vm1, %v1911_v55 }
 0x186   : > { %3109 = vmatmul.msk.bf16.gmra.mxu2 %vm321_vm1, %v3717_v18 }
 0x188   : > { %v1055_v6 = vpop.f32.mrf.mxu3 }
 0x189   : > { %v1115_v46 = vadd.f32 %v1055_v6, %v867_v39  ;;  %v1300_v45 = vpop.f32.mrf.mxu0  ;;  %v817_v3 = vpop.f32.mrf.mxu2  ;;  %v2481_v39 = vld [vmem:[%s4580_s2 + $0x8] sm:$0xff] }
 0x18a   : > { %v602_v23 = vpop.f32.mrf.mxu1  ;;  %v3735_v53 = vadd.f32 %v1300_v45, %v1114_v30  ;;  %2653 = vperm.xlu0 %3183, %v2507_v38   ;;  %v2504_v38 = vld [vmem:[%s4580_s2 + $0xc0] sm:$0xff] }
 0x18b   : > { %v603_v36 = vadd.f32 %v602_v23, %v3406_v11  ;;  %v1634_v11 = vld [vmem:[%s3240_s22 + $0x5c] sm:$0xff]  ;;  %2523 = vperm.xlu1 %3184, %v2481_v39   ;;  %v1879_v39 = vld [vmem:[%s3240_s22 + $0x45] sm:$0xff] }
 0x18c   : > { %2533 = vperm.xlu2 %3185, %v2483_v21   ;;  %v3755_v29 = vpack.c.bf16 %v1634_v11, %v1633_v58  ;;  %v2480_v21 = vld [vmem:[%s4580_s2] sm:$0xff] }
 0x18d   : > { %v870_v50 = vadd.f32 %v814_v49, %v603_v36  ;;  %v2125_v36 = vld [vmem:[%s3240_s22 + $0x36] sm:$0xff] }
 0x18e   : > { %v2160_v11 = vpack.c.bf16 %v2126_v59, %v2125_v36  ;;  %v2501_v36 = vld [vmem:[%s4580_s2 + $0xa8] sm:$0xff]  ;;  %v1881_v59 = vld [vmem:[%s3240_s22 + $0x55] sm:$0xff] }
 0x190   : > { %v1057_v51 = vpop.f32.mrf.mxu3 }
 0x191   : > { %v1116_v17 = vadd.f32 %v1057_v51, %v868_v41  ;;  %v1303_v30 = vpop.f32.mrf.mxu0  ;;  %v819_v55 = vpop.f32.mrf.mxu2  ;;  %v2492_v41 = vld [vmem:[%s4580_s2 + $0x60] sm:$0xff] }
 0x192   : > { %v605_v49 = vpop.f32.mrf.mxu1  ;;  %v3753_v4 = vadd.f32 %v1303_v30, %v1115_v46  ;;  %2578 = vperm.xlu0 %3183, %v2492_v41  }
 0x193   : > { %v606_v56 = vadd.f32 %v605_v49, %v3418_v16 }
 0x194   : > { %3145 = vmatmul.msk.bf16.vlgmr.msra.gmra.mxu0 %vm321_vm1, %v2159_v52  ;;  %2528 = vperm.xlu2 %3185, %v2482_v63  }
 0x195   : > { %v871_v12 = vadd.f32 %v817_v3, %v606_v56  ;;  %3090 = vmatmul.msk.bf16.gmra.mxu1 %vm321_vm1, %v3683_v22  ;;  %3127 = vmatmul.msk.bf16.gmra.mxu3 %vm321_vm1, %v1912_v37 }
 0x196   : > { %3110 = vmatmul.msk.bf16.gmra.mxu2 %vm321_vm1, %v3755_v29 }
 0x198   : > { %v1060_v16 = vpop.f32.mrf.mxu3 }
 0x199   : > { %v1117_v22 = vadd.f32 %v1060_v16, %v869_v40  ;;  %v1305_v6 = vpop.f32.mrf.mxu0  ;;  %v822_v46 = vpop.f32.mrf.mxu2  ;;  %v1880_v40 = vld [vmem:[%s3240_s22 + $0x4d] sm:$0xff] }
 0x19a   : > { %v607_v45 = vpop.f32.mrf.mxu1  ;;  %v3770_v3 = vadd.f32 %v1305_v6, %v1116_v17  ;;  %2638 = vperm.xlu0 %3183, %v2504_v38   ;;  %v1913_v52 = vpack.c.bf16 %v1880_v40, %v1879_v39  ;;  %v1882_v38 = vld [vmem:[%s3240_s22 + $0x5d] sm:$0xff] }
 0x19b   : > { %v608_v23 = vadd.f32 %v607_v45, %v3432_v28  ;;  %v2127_v45 = vld [vmem:[%s3240_s22 + $0x46] sm:$0xff]  ;;  %v1638_v39 = vld [vmem:[%s3240_s22 + $0x7c] sm:$0xff] }
 0x19c   : > { %2518 = vperm.xlu2 %3185, %v2480_v21   ;;  %v1637_v21 = vld [vmem:[%s3240_s22 + $0x74] sm:$0xff] }
 0x19d   : > { %v872_v13 = vadd.f32 %v819_v55, %v608_v23  ;;  %v3787_v55 = vpack.c.bf16 %v1636_v34, %v1635_v0  ;;  %v2128_v23 = vld [vmem:[%s3240_s22 + $0x4e] sm:$0xff] }
 0x19e   : > { %v2161_v40 = vpack.c.bf16 %v2128_v23, %v2127_v45  ;;  %v1884_v45 = vld [vmem:[%s3240_s22 + $0x6d] sm:$0xff]  ;;  %v1639_v23 = vld [vmem:[%s3240_s22 + $0x84] sm:$0xff] }
 0x1a0   : > { %v1062_v58 = vpop.f32.mrf.mxu3 }
 0x1a1   : > { %v1118_v28 = vadd.f32 %v1062_v58, %v870_v50  ;;  %v1308_v51 = vpop.f32.mrf.mxu0  ;;  %v824_v17 = vpop.f32.mrf.mxu2  ;;  %v2489_v50 = vld [vmem:[%s4580_s2 + $0x48] sm:$0xff]  ;;  %v1914_v58 = vpack.c.bf16 %v1882_v38, %v1881_v59 }
 0x1a2   : > { %v610_v30 = vpop.f32.mrf.mxu1  ;;  %v3785_v37 = vadd.f32 %v1308_v51, %v1117_v22  ;;  %2563 = vperm.xlu0 %3183, %v2489_v50   ;;  %v3813_v51 = vpack.c.bf16 %v1638_v39, %v1637_v21 }
 0x1a3   : > { %v611_v49 = vadd.f32 %v610_v30, %v3362_v44 }
 0x1a4   : > { %3146 = vmatmul.msk.bf16.gmra.mxu0 %vm321_vm1, %v2160_v11 }
 0x1a5   : > { %v873_v56 = vadd.f32 %v822_v46, %v611_v49  ;;  %3091 = vmatmul.msk.bf16.gmra.mxu1 %vm321_vm1, %v3717_v18  ;;  %3128 = vmatmul.msk.bf16.gmra.mxu3 %vm321_vm1, %v1913_v52 }
 0x1a6   : > { %3111 = vmatmul.msk.bf16.gmra.mxu2 %vm321_vm1, %v3787_v55 }
 0x1a8   : > { %v1065_v44 = vpop.f32.mrf.mxu3 }
 0x1a9   : > { %v1119_v41 = vadd.f32 %v1065_v44, %v871_v12  ;;  %v1310_v63 = vpop.f32.mrf.mxu0  ;;  %v827_v16 = vpop.f32.mrf.mxu2 }
 0x1aa   : > { %v612_v22 = vpop.f32.mrf.mxu1  ;;  %v3799_v18 = vadd.f32 %v1310_v63, %v1118_v28  ;;  %2623 = vperm.xlu0 %3183, %v2501_v36   ;;  %v1640_v36 = vld [vmem:[%s3240_s22 + $0x8c] sm:$0xff] }
 0x1ab   : > { %v613_v6 = vadd.f32 %v612_v22, %v3376_v54  ;;  %v2130_v22 = vld [vmem:[%s3240_s22 + $0x5e] sm:$0xff] }
 0x1ad   : > { %v874_v46 = vadd.f32 %v824_v17, %v613_v6  ;;  %v1883_v6 = vld [vmem:[%s3240_s22 + $0x65] sm:$0xff] }
 0x1b0   : > { %v1067_v12 = vpop.f32.mrf.mxu3 }
 0x1b1   : > { %v1120_v0 = vadd.f32 %v1067_v12, %v872_v13  ;;  %v1313_v34 = vpop.f32.mrf.mxu0  ;;  %v829_v11 = vpop.f32.mrf.mxu2  ;;  %v2486_v13 = vld [vmem:[%s4580_s2 + $0x30] sm:$0xff]  ;;  %v1915_v12 = vpack.c.bf16 %v1884_v45, %v1883_v6 }
 0x1b2   : > { %v615_v28 = vpop.f32.mrf.mxu1  ;;  %v3811_v54 = vadd.f32 %v1313_v34, %v1119_v41  ;;  %2548 = vperm.xlu0 %3183, %v2486_v13  }
 0x1b3   : > { %v616_v52 = vadd.f32 %v615_v28, %v3388_v61 }
 0x1b4   : > { %3147 = vmatmul.msk.bf16.gmra.mxu0 %vm321_vm1, %v2161_v40 }
 0x1b5   : > { %v875_v17 = vadd.f32 %v827_v16, %v616_v52  ;;  %3092 = vmatmul.msk.bf16.gmra.mxu1 %vm321_vm1, %v3755_v29  ;;  %3129 = vmatmul.msk.bf16.gmra.mxu3 %vm321_vm1, %v1914_v58  ;;  %v2129_v16 = vld [vmem:[%s3240_s22 + $0x56] sm:$0xff] }
 0x1b6   : > { %3112 = vmatmul.msk.bf16.gmra.mxu2 %vm321_vm1, %v3813_v51  ;;  %v2162_v38 = vpack.c.bf16 %v2130_v22, %v2129_v16  ;;  %v1642_v16 = vld [vmem:[%s3240_s22 + $0x9c] sm:$0xff] }
 0x1b8   : > { %v1070_v61 = vpop.f32.mrf.mxu3 }
 0x1b9   : > { %v1121_v30 = vadd.f32 %v1070_v61, %v873_v56  ;;  %v1315_v49 = vpop.f32.mrf.mxu0  ;;  %v832_v50 = vpop.f32.mrf.mxu2 }
 0x1ba   : > { %v617_v44 = vpop.f32.mrf.mxu1  ;;  %v3825_v41 = vadd.f32 %v1315_v49, %v1120_v0  ;;  %v1669_v0 = vpack.c.bf16 %v1640_v36, %v1639_v23  ;;  %v2131_v49 = vld [vmem:[%s3240_s22 + $0x66] sm:$0xff] }
 0x1bb   : > { %v618_v29 = vadd.f32 %v617_v44, %v3402_v7  ;;  %v1885_v44 = vld [vmem:[%s3240_s22 + $0x75] sm:$0xff] }
 0x1bd   : > { %v876_v63 = vadd.f32 %v829_v11, %v618_v29  ;;  %v1886_v29 = vld [vmem:[%s3240_s22 + $0x7d] sm:$0xff] }
 0x1be   : > { %v1916_v36 = vpack.c.bf16 %v1886_v29, %v1885_v44 }
 0x1c0   : > { %v1072_v59 = vpop.f32.mrf.mxu3 }
 0x1c1   : > { %v1122_v21 = vadd.f32 %v1072_v59, %v874_v46  ;;  %v1318_v39 = vpop.f32.mrf.mxu0  ;;  %v834_v56 = vpop.f32.mrf.mxu2 }
 0x1c2   : > { %v620_v40 = vpop.f32.mrf.mxu1  ;;  %v3834_v34 = vadd.f32 %v1318_v39, %v1121_v30 }
 0x1c3   : > { %v621_v7 = vadd.f32 %v620_v40, %v3414_v14 }
 0x1c4   : > { %3148 = vmatmul.msk.bf16.gmra.mxu0 %vm321_vm1, %v2162_v38 }
 0x1c5   : > { %v877_v58 = vadd.f32 %v832_v50, %v621_v7  ;;  %3093 = vmatmul.msk.bf16.gmra.mxu1 %vm321_vm1, %v3787_v55  ;;  %3130 = vmatmul.msk.bf16.gmra.mxu3 %vm321_vm1, %v1915_v12  ;;  %v2132_v50 = vld [vmem:[%s3240_s22 + $0x6e] sm:$0xff] }
 0x1c6   : > { %3113 = vmatmul.msk.bf16.gmra.mxu2 %vm321_vm1, %v1669_v0  ;;  %v1641_v55 = vld [vmem:[%s3240_s22 + $0x94] sm:$0xff]  ;;  %v2163_v6 = vpack.c.bf16 %v2132_v50, %v2131_v49  ;;  %v1644_v49 = vld [vmem:[%s3240_s22 + $0xac] sm:$0xff] }
 0x1c8   : > { %v1075_v46 = vpop.f32.mrf.mxu3 }
 0x1c9   : > { %v1123_v11 = vadd.f32 %v1075_v46, %v875_v17  ;;  %v1320_v28 = vpop.f32.mrf.mxu0  ;;  %v837_v52 = vpop.f32.mrf.mxu2 }
 0x1ca   : > { %v622_v13 = vpop.f32.mrf.mxu1  ;;  %v3842_v14 = vadd.f32 %v1320_v28, %v1122_v21  ;;  %v1670_v21 = vpack.c.bf16 %v1642_v16, %v1641_v55  ;;  %v2133_v28 = vld [vmem:[%s3240_s22 + $0x76] sm:$0xff] }
 0x1cb   : > { %v623_v61 = vadd.f32 %v622_v13, %v3428_v24  ;;  %v1887_v13 = vld [vmem:[%s3240_s22 + $0x85] sm:$0xff] }
 0x1cd   : > { %v878_v30 = vadd.f32 %v834_v56, %v623_v61  ;;  %v1888_v61 = vld [vmem:[%s3240_s22 + $0x8d] sm:$0xff] }
 0x1ce   : > { %v1917_v16 = vpack.c.bf16 %v1888_v61, %v1887_v13 }
 0x1d0   : > { %v1077_v22 = vpop.f32.mrf.mxu3 }
 0x1d1   : > { %v1124_v45 = vadd.f32 %v1077_v22, %v876_v63  ;;  %v1323_v23 = vpop.f32.mrf.mxu0  ;;  %v839_v17 = vpop.f32.mrf.mxu2 }
 0x1d2   : > { %v625_v59 = vpop.f32.mrf.mxu1  ;;  %v3851_v38 = vadd.f32 %v1323_v23, %v1123_v11 }
 0x1d3   : > { %v626_v24 = vadd.f32 %v625_v59, %v3440_v31 }
 0x1d4   : > { %4583 = vst [vmem:[#allocation2_spill] sm:$0xff] %v3851_v38  ;;  %3149 = vmatmul.msk.bf16.gmra.mxu0 %vm321_vm1, %v2163_v6 }
 0x1d5   : > { %v879_v39 = vadd.f32 %v837_v52, %v626_v24  ;;  %3094 = vmatmul.msk.bf16.gmra.mxu1 %vm321_vm1, %v3813_v51  ;;  %3131 = vmatmul.msk.bf16.gmra.mxu3 %vm321_vm1, %v1916_v36  ;;  %v2134_v52 = vld [vmem:[%s3240_s22 + $0x7e] sm:$0xff] }
 0x1d6   : > { %3114 = vmatmul.msk.bf16.gmra.mxu2 %vm321_vm1, %v1670_v21  ;;  %v1643_v51 = vld [vmem:[%s3240_s22 + $0xa4] sm:$0xff]  ;;  %v2164_v44 = vpack.c.bf16 %v2134_v52, %v2133_v28  ;;  %v1646_v28 = vld [vmem:[%s3240_s22 + $0xbc] sm:$0xff] }
 0x1d8   : > { %v1080_v63 = vpop.f32.mrf.mxu3 }
 0x1d9   : > { %v1125_v12 = vadd.f32 %v1080_v63, %v877_v58  ;;  %v1325_v56 = vpop.f32.mrf.mxu0  ;;  %v842_v40 = vpop.f32.mrf.mxu2 }
 0x1da   : > { %v627_v7 = vpop.f32.mrf.mxu1  ;;  %v3859_v31 = vadd.f32 %v1325_v56, %v1124_v45  ;;  %v1671_v45 = vpack.c.bf16 %v1644_v49, %v1643_v51  ;;  %v2135_v56 = vld [vmem:[%s3240_s22 + $0x86] sm:$0xff] }
 0x1db   : > { %v628_v46 = vadd.f32 %v627_v7, %v3452_v43  ;;  %v1889_v7 = vld [vmem:[%s3240_s22 + $0x95] sm:$0xff] }
 0x1dc   : > { %4584 = vst [vmem:[#allocation3_spill] sm:$0xff] %v3859_v31 }
 0x1dd   : > { %v880_v11 = vadd.f32 %v839_v17, %v628_v46  ;;  %v1645_v46 = vld [vmem:[%s3240_s22 + $0xb4] sm:$0xff] }
 0x1e0   : > { %v1082_v50 = vpop.f32.mrf.mxu3 }
 0x1e1   : > { %v1126_v29 = vadd.f32 %v1082_v50, %v878_v30  ;;  %v1328_v55 = vpop.f32.mrf.mxu0  ;;  %v844_v58 = vpop.f32.mrf.mxu2 }
 0x1e2   : > { %v630_v22 = vpop.f32.mrf.mxu1  ;;  %v3868_v6 = vadd.f32 %v1328_v55, %v1125_v12 }
 0x1e3   : > { %v631_v43 = vadd.f32 %v630_v22, %v3461_v60 }
 0x1e4   : > { %4585 = vst [vmem:[#allocation4_spill] sm:$0xff] %v3868_v6  ;;  %3150 = vmatmul.msk.bf16.gmra.mxu0 %vm321_vm1, %v2164_v44 }
 0x1e5   : > { %v881_v23 = vadd.f32 %v842_v40, %v631_v43  ;;  %3095 = vmatmul.msk.bf16.gmra.mxu1 %vm321_vm1, %v1669_v0  ;;  %3132 = vmatmul.msk.bf16.gmra.mxu3 %vm321_vm1, %v1917_v16  ;;  %v2136_v40 = vld [vmem:[%s3240_s22 + $0x8e] sm:$0xff]  ;;  %v1890_v0 = vld [vmem:[%s3240_s22 + $0x9d] sm:$0xff] }
 0x1e6   : > { %3115 = vmatmul.msk.bf16.gmra.mxu2 %vm321_vm1, %v1671_v45  ;;  %v2165_v13 = vpack.c.bf16 %v2136_v40, %v2135_v56  ;;  %v2137_v43 = vld [vmem:[%s3240_s22 + $0x96] sm:$0xff]  ;;  %v1648_v56 = vld [vmem:[%s3240_s22 + $0xcc] sm:$0xff] }
 0x1e8   : > { %v1085_v30 = vpop.f32.mrf.mxu3 }
 0x1e9   : > { %v1127_v36 = vadd.f32 %v1085_v30, %v879_v39  ;;  %v1330_v17 = vpop.f32.mrf.mxu0  ;;  %v3875_v59 = vpop.f32.mrf.mxu2  ;;  %v1918_v39 = vpack.c.bf16 %v1890_v0, %v1889_v7  ;;  %v2138_v30 = vld [vmem:[%s3240_s22 + $0x9e] sm:$0xff] }
 0x1ea   : > { %v632_v24 = vpop.f32.mrf.mxu1  ;;  %v3877_v60 = vadd.f32 %v1330_v17, %v1126_v29  ;;  %v1891_v17 = vld [vmem:[%s3240_s22 + $0xa5] sm:$0xff]  ;;  %v2166_v7 = vpack.c.bf16 %v2138_v30, %v2137_v43  ;;  %v2140_v43 = vld [vmem:[%s3240_s22 + $0xae] sm:$0xff] }
 0x1eb   : > { %v633_v63 = vadd.f32 %v632_v24, %v3472_v19  ;;  %v3890_v19 = vpack.c.bf16 %v1646_v28, %v1645_v46  ;;  %v1892_v24 = vld [vmem:[%s3240_s22 + $0xad] sm:$0xff] }
 0x1ec   : > { %4586 = vst [vmem:[#allocation5_spill] sm:$0xff] %v3877_v60  ;;  %v1919_v46 = vpack.c.bf16 %v1892_v24, %v1891_v17  ;;  %v1894_v17 = vld [vmem:[%s3240_s22 + $0xbd] sm:$0xff]  ;;  %v1649_v24 = vld [vmem:[%s3240_s22 + $0xd4] sm:$0xff] }
 0x1ed   : > { %v882_v12 = vadd.f32 %v844_v58, %v633_v63  ;;  %v1647_v63 = vld [vmem:[%s3240_s22 + $0xc4] sm:$0xff] }
 0x1f0   : > { %v1087_v52 = vpop.f32.mrf.mxu3 }
 0x1f1   : > { %v1128_v61 = vadd.f32 %v1087_v52, %v880_v11  ;;  %v1333_v51 = vpop.f32.mrf.mxu0  ;;  %v3886_v49 = vpop.f32.mrf.mxu2  ;;  %v2498_v11 = vld [vmem:[%s4580_s2 + $0x90] sm:$0xff] }
 0x1f2   : > { %v3888_v50 = vadd.f32 %v1333_v51, %v1127_v36  ;;  %v1501_v44 = vpop.f32.mrf.mxu1  ;;  %2608 = vperm.xlu0 %3183, %v2498_v11   ;;  %v2497_v36 = vld [vmem:[%s4580_s2 + $0x88] sm:$0xff] }
 0x1f4   : > { %4587 = vst [vmem:[#allocation6_spill] sm:$0xff] %v3888_v50  ;;  %3151 = vmatmul.msk.bf16.gmra.mxu0 %vm321_vm1, %v2165_v13 }
 0x1f5   : > { %3096 = vmatmul.msk.bf16.gmra.mxu1 %vm321_vm1, %v1670_v21  ;;  %3133 = vmatmul.msk.bf16.gmra.mxu3 %vm321_vm1, %v1918_v39 }
 0x1f6   : > { %3116 = vmatmul.msk.bf16.gmra.mxu2 %vm321_vm1, %v3890_v19 }
 0x1f8   : > { %v1090_v29 = vpop.f32.mrf.mxu3 }
 0x1f9   : > { %v1129_v55 = vadd.f32 %v1090_v29, %v881_v23  ;;  %v1335_v16 = vpop.f32.mrf.mxu0  ;;  %v3900_v58 = vpop.f32.mrf.mxu2  ;;  %v1591_v29 = vadd.f32 %v1501_v44, %v3490_v8 }
 0x1fa   : > { %v3902_v22 = vadd.f32 %v1335_v16, %v1128_v61  ;;  %v1503_v21 = vpop.f32.mrf.mxu1  ;;  %2603 = vperm.xlu0 %3183, %v2497_v36   ;;  %v3917_v61 = vpack.c.bf16 %v1648_v56, %v1647_v63  ;;  %v2139_v16 = vld [vmem:[%s3240_s22 + $0xa6] sm:$0xff]  ;;  %v1893_v36 = vld [vmem:[%s3240_s22 + $0xb5] sm:$0xff] }
 0x1fb   : > { %v1839_v30 = vadd.f32 %v3875_v59, %v1591_v29  ;;  %v1650_v63 = vld [vmem:[%s3240_s22 + $0xdc] sm:$0xff]  ;;  %v1592_v8 = vadd.f32 %v1503_v21, %v3497_v25 }
 0x1fc   : > { %4588 = vst [vmem:[#allocation7_spill] sm:$0xff] %v3902_v22 }
 0x1fd   : > { %v1840_v25 = vadd.f32 %v3886_v49, %v1592_v8  ;;  %v2141_v49 = vld [vmem:[%s3240_s22 + $0xb6] sm:$0xff] }
 0x200   : > { %v1092_v40 = vpop.f32.mrf.mxu3 }
 0x201   : > { %v1130_v23 = vadd.f32 %v1092_v40, %v882_v12  ;;  %v1338_v0 = vpop.f32.mrf.mxu0  ;;  %v3913_v28 = vpop.f32.mrf.mxu2  ;;  %v2496_v12 = vld [vmem:[%s4580_s2 + $0x80] sm:$0xff] }
 0x202   : > { %v3915_v52 = vadd.f32 %v1338_v0, %v1129_v55  ;;  %v1506_v13 = vpop.f32.mrf.mxu1  ;;  %2598 = vperm.xlu0 %3183, %v2496_v12  }
 0x204   : > { %4589 = vst [vmem:[#allocation8_spill] sm:$0xff] %v3915_v52  ;;  %3152 = vmatmul.msk.bf16.gmra.mxu0 %vm321_vm1, %v2166_v7  ;;  %v2167_v7 = vpack.c.bf16 %v2140_v43, %v2139_v16 }
 0x205   : > { %3097 = vmatmul.msk.bf16.gmra.mxu1 %vm321_vm1, %v1671_v45  ;;  %3134 = vmatmul.msk.bf16.gmra.mxu3 %vm321_vm1, %v1919_v46  ;;  %v1920_v46 = vpack.c.bf16 %v1894_v17, %v1893_v36  ;;  %v2142_v17 = vld [vmem:[%s3240_s22 + $0xbe] sm:$0xff] }
 0x206   : > { %3117 = vmatmul.msk.bf16.gmra.mxu2 %vm321_vm1, %v3917_v61  ;;  %v2168_v8 = vpack.c.bf16 %v2142_v17, %v2141_v49 }
 0x208   : > { %v1997_v51 = vpop.f32.mrf.mxu3 }
 0x209   : > { %v1340_v39 = vpop.f32.mrf.mxu0  ;;  %v3927_v11 = vpop.f32.mrf.mxu2  ;;  %v2087_v56 = vadd.f32 %v1997_v51, %v1839_v30 }
 0x20a   : > { %v3930_v45 = vadd.f32 %v1340_v39, %v1130_v23  ;;  %v1508_v55 = vpop.f32.mrf.mxu1  ;;  %v3943_v39 = vpack.c.bf16 %v1650_v63, %v1649_v24  ;;  %v1895_v63 = vld [vmem:[%s3240_s22 + $0xc5] sm:$0xff] }
 0x20c   : > { %4590 = vst [vmem:[#allocation9_spill] sm:$0xff] %v3930_v45 }
 0x210   : > { %v1999_v40 = vpop.f32.mrf.mxu3 }
 0x211   : > { %v2245_v0 = vpop.f32.mrf.mxu0  ;;  %v3940_v12 = vpop.f32.mrf.mxu2  ;;  %v2088_v21 = vadd.f32 %v1999_v40, %v1840_v25  ;;  %v1651_v40 = vld [vmem:[%s3240_s22 + $0xe4] sm:$0xff]  ;;  %v1594_v25 = vadd.f32 %v1508_v55, %v3513_v62 }
 0x212   : > { %v1511_v44 = vpop.f32.mrf.mxu1  ;;  %v2335_v23 = vadd.f32 %v2245_v0, %v2087_v56  ;;  %v1896_v56 = vld [vmem:[%s3240_s22 + $0xcd] sm:$0xff] }
 0x214   : > { %v3950_v59 = vpack.c.bf16 %v2335_v23, %v2335_v23  ;;  %3153 = vmatmul.msk.bf16.gmra.mxu0 %vm321_vm1, %v2167_v7  ;;  %v1652_v7 = vld [vmem:[%s3240_s22 + $0xec] sm:$0xff] }
 0x215   : > { %3098 = vmatmul.msk.bf16.gmra.mxu1 %vm321_vm1, %v3890_v19  ;;  %3135 = vmatmul.msk.bf16.gmra.mxu3 %vm321_vm1, %v1920_v46  ;;  %v1593_v19 = vadd.f32 %v1506_v13, %v3506_v2  ;;  %v1921_v13 = vpack.c.bf16 %v1896_v56, %v1895_v63  ;;  %v2144_v56 = vld [vmem:[%s3240_s22 + $0xce] sm:$0xff] }
 0x216   : > { %2408 = vst.msk [vmem:[%s3948_s19] sm:$0xf] %vm2407_vm2, %v3950_v59  ;;  %3118 = vmatmul.msk.bf16.gmra.mxu2 %vm321_vm1, %v3943_v39 }
 0x217   : > { %v1841_v24 = vadd.f32 %v3900_v58, %v1593_v19  ;;  %v3980_v58 = vpack.c.bf16 %v1652_v7, %v1651_v40  ;;  %v1897_v7 = vld [vmem:[%s3240_s22 + $0xd5] sm:$0xff] }
 0x218   : > { %v2002_v51 = vpop.f32.mrf.mxu3 }
 0x219   : > { %v2247_v29 = vpop.f32.mrf.mxu0  ;;  %v3962_v16 = vpop.f32.mrf.mxu2  ;;  %v2089_v0 = vadd.f32 %v2002_v51, %v1841_v24  ;;  %v1842_v51 = vadd.f32 %v3913_v28, %v1594_v25  ;;  %v2143_v28 = vld [vmem:[%s3240_s22 + $0xc6] sm:$0xff] }
 0x21a   : > { %v1513_v43 = vpop.f32.mrf.mxu1  ;;  %v2336_v30 = vadd.f32 %v2247_v29, %v2088_v21  ;;  %v2169_v25 = vpack.c.bf16 %v2144_v56, %v2143_v28 }
 0x21c   : > { %v3965_v36 = vpack.c.bf16 %v2336_v30, %v2336_v30 }
 0x21e   : > { %2409 = vst.msk [vmem:[%s3948_s19 + $0x4] sm:$0xf] %vm2407_vm2, %v3965_v36 }
 0x220   : > { %v2004_v46 = vpop.f32.mrf.mxu3 }
 0x221   : > { %v2250_v2 = vpop.f32.mrf.mxu0  ;;  %v3977_v23 = vpop.f32.mrf.mxu2  ;;  %v2090_v62 = vadd.f32 %v2004_v46, %v1842_v51  ;;  %v1653_v46 = vld [vmem:[%s3240_s22 + $0xf4] sm:$0xff]  ;;  %v1596_v51 = vadd.f32 %v1513_v43, %v3529_v15 }
 0x222   : > { %v1516_v21 = vpop.f32.mrf.mxu1  ;;  %v2337_v29 = vadd.f32 %v2250_v2, %v2089_v0  ;;  %v1898_v0 = vld [vmem:[%s3240_s22 + $0xdd] sm:$0xff]  ;;  %v4026_v15 = vpop.permute.xlu1 %2663 }
 0x223   : > { %4591 = vst [vmem:[#allocation10_spill] sm:$0xff] %v4026_v15 }
 0x224   : > { %v3982_v19 = vpack.c.bf16 %v2337_v29, %v2337_v29  ;;  %3154 = vmatmul.msk.bf16.gmra.mxu0 %vm321_vm1, %v2168_v8  ;;  %v1654_v8 = vld [vmem:[%s3240_s22 + $0xfc] sm:$0xff] }
 0x225   : > { %3099 = vmatmul.msk.bf16.gmra.mxu1 %vm321_vm1, %v3917_v61  ;;  %3136 = vmatmul.msk.bf16.gmra.mxu3 %vm321_vm1, %v1921_v13  ;;  %v1595_v61 = vadd.f32 %v1511_v44, %v3522_v48  ;;  %v1922_v44 = vpack.c.bf16 %v1898_v0, %v1897_v7  ;;  %v4031_v7 = vpop.permute.xlu2 %2658 }
 0x226   : > { %2410 = vst.msk [vmem:[%s3948_s19 + $0x8] sm:$0xf] %vm2407_vm2, %v3982_v19  ;;  %3119 = vmatmul.msk.bf16.gmra.mxu2 %vm321_vm1, %v3980_v58 }
 0x227   : > { %v1843_v40 = vadd.f32 %v3927_v11, %v1595_v61  ;;  %v4012_v11 = vpack.c.bf16 %v1654_v8, %v1653_v46  ;;  %4592 = vst [vmem:[#allocation11_spill] sm:$0xff] %v4031_v7  ;;  %v2145_v46 = vld [vmem:[%s3240_s22 + $0xd6] sm:$0xff]  ;;  %v2146_v8 = vld [vmem:[%s3240_s22 + $0xde] sm:$0xff] }
 0x228   : > { %v2007_v55 = vpop.f32.mrf.mxu3 }
 0x229   : > { %v2252_v30 = vpop.f32.mrf.mxu0  ;;  %v3994_v49 = vpop.f32.mrf.mxu2  ;;  %v2091_v2 = vadd.f32 %v2007_v55, %v1843_v40  ;;  %v1844_v55 = vadd.f32 %v3940_v12, %v1596_v51  ;;  %v1597_v12 = vadd.f32 %v1516_v21, %v3538_v35  ;;  %v2170_v35 = vpack.c.bf16 %v2146_v8, %v2145_v46 }
 0x22a   : > { %v1518_v17 = vpop.f32.mrf.mxu1  ;;  %v2338_v24 = vadd.f32 %v2252_v30, %v2090_v62 }
 0x22c   : > { %v3997_v63 = vpack.c.bf16 %v2338_v24, %v2338_v24 }
 0x22e   : > { %2411 = vst.msk [vmem:[%s3948_s19 + $0xc] sm:$0xf] %vm2407_vm2, %v3997_v63 }
 0x230   : > { %v2009_v13 = vpop.f32.mrf.mxu3 }
 0x231   : > { %v2255_v48 = vpop.f32.mrf.mxu0  ;;  %v4009_v29 = vpop.f32.mrf.mxu2  ;;  %v2092_v43 = vadd.f32 %v2009_v13, %v1844_v55  ;;  %v1899_v13 = vld [vmem:[%s3240_s22 + $0xe5] sm:$0xff] }
 0x232   : > { %v1521_v62 = vpop.f32.mrf.mxu1  ;;  %v2339_v30 = vadd.f32 %v2255_v48, %v2091_v2  ;;  %v1845_v2 = vadd.f32 %v3962_v16, %v1597_v12  ;;  %v1655_v48 = vld [vmem:[%s3240_s22 + $0x104] sm:$0xff]  ;;  %v4050_v12 = vpop.permute.xlu1 %2593 }
 0x233   : > { %v1599_v8 = vadd.f32 %v1521_v62, %v3554_v20  ;;  %v1902_v20 = vld [vmem:[%s3240_s22 + $0xfd] sm:$0xff]  ;;  %v1657_v62 = vld [vmem:[%s3240_s22 + $0x114] sm:$0xff] }
 0x234   : > { %v4014_v61 = vpack.c.bf16 %v2339_v30, %v2339_v30  ;;  %3155 = vmatmul.msk.bf16.gmra.mxu0 %vm321_vm1, %v2169_v25  ;;  %v1900_v25 = vld [vmem:[%s3240_s22 + $0xed] sm:$0xff] }
 0x235   : > { %3100 = vmatmul.msk.bf16.gmra.mxu1 %vm321_vm1, %v3943_v39  ;;  %3137 = vmatmul.msk.bf16.gmra.mxu3 %vm321_vm1, %v1922_v44  ;;  %v1656_v44 = vld [vmem:[%s3240_s22 + $0x10c] sm:$0xff]  ;;  %v1923_v55 = vpack.c.bf16 %v1900_v25, %v1899_v13  ;;  %v2512_v13 = vld [vmem:[%s4580_s2 + $0x100] sm:$0xff] }
 0x236   : > { %2412 = vst.msk [vmem:[%s3948_s19 + $0x10] sm:$0xf] %vm2407_vm2, %v4014_v61  ;;  %3120 = vmatmul.msk.bf16.gmra.mxu2 %vm321_vm1, %v4012_v11  ;;  %v4048_v16 = vpack.c.bf16 %v1656_v44, %v1655_v48  ;;  %2678 = vperm.xlu0 %3183, %v2512_v13   ;;  %v2147_v44 = vld [vmem:[%s3240_s22 + $0xe6] sm:$0xff] }
 0x238   : > { %v2012_v39 = vpop.f32.mrf.mxu3 }
 0x239   : > { %v2257_v24 = vpop.f32.mrf.mxu0  ;;  %v4028_v28 = vpop.f32.mrf.mxu2  ;;  %v2093_v51 = vadd.f32 %v2012_v39, %v1845_v2 }
 0x23a   : > { %v1523_v56 = vpop.f32.mrf.mxu1  ;;  %v2340_v40 = vadd.f32 %v2257_v24, %v2092_v43  ;;  %v1598_v24 = vadd.f32 %v1518_v17, %v3545_v32  ;;  %v4058_v39 = vpop.permute.xlu2 %2588 }
 0x23b   : > { %v4074_v48 = vpop.permute.xlu1 %2583  ;;  %v1600_v7 = vadd.f32 %v1523_v56, %v3564_v1  ;;  %v4107_v56 = vpop.permute.xlu0 %2673 }
 0x23c   : > { %v4033_v0 = vpack.c.bf16 %v2340_v40, %v2340_v40  ;;  %v1846_v32 = vadd.f32 %v3977_v23, %v1598_v24  ;;  %4595 = vst [vmem:[#allocation14_spill] sm:$0xff] %v4107_v56 }
 0x23e   : > { %2413 = vst.msk [vmem:[%s3948_s19 + $0x14] sm:$0xf] %vm2407_vm2, %v4033_v0 }
 0x240   : > { %v2014_v30 = vpop.f32.mrf.mxu3 }
 0x241   : > { %v2260_v21 = vpop.f32.mrf.mxu0  ;;  %v4045_v43 = vpop.f32.mrf.mxu2 }
 0x242   : > { %v1526_v40 = vpop.f32.mrf.mxu1  ;;  %v2341_v45 = vadd.f32 %v2260_v21, %v2093_v51  ;;  %v2148_v51 = vld [vmem:[%s3240_s22 + $0xee] sm:$0xff]  ;;  %v1658_v21 = vld [vmem:[%s3240_s22 + $0x11c] sm:$0xff] }
 0x243   : > { %v4091_v15 = vpack.c.bf16 %v1658_v21, %v1657_v62  ;;  %v4105_v1 = vpop.permute.xlu1 %2643  ;;  %v2149_v21 = vld [vmem:[%s3240_s22 + $0xf6] sm:$0xff]  ;;  %v4133_v50 = vpop.permute.xlu0 %2668 }
 0x244   : > { %v4052_v52 = vpack.c.bf16 %v2341_v45, %v2341_v45  ;;  %3156 = vmatmul.msk.bf16.gmra.mxu0 %vm321_vm1, %v2170_v35  ;;  %v2094_v45 = vadd.f32 %v2014_v30, %v1846_v32  ;;  %v1847_v30 = vadd.f32 %v3994_v49, %v1599_v8  ;;  %v1901_v35 = vld [vmem:[%s3240_s22 + $0xf5] sm:$0xff]  ;;  %4594 = vst [vmem:[#allocation13_spill] sm:$0xff] %v4105_v1 }
 0x245   : > { %3101 = vmatmul.msk.bf16.gmra.mxu1 %vm321_vm1, %v3980_v58  ;;  %3138 = vmatmul.msk.bf16.gmra.mxu3 %vm321_vm1, %v1923_v55  ;;  %v4086_v55 = vpop.permute.xlu2 %2648  ;;  %4596 = vst [vmem:[#allocation15_spill] sm:$0xff] %v4133_v50 }
 0x246   : > { %2414 = vst.msk [vmem:[%s3948_s19 + $0x18] sm:$0xf] %vm2407_vm2, %v4052_v52  ;;  %3121 = vmatmul.msk.bf16.gmra.mxu2 %vm321_vm1, %v4048_v16 }
 0x247   : > { %4593 = vst [vmem:[#allocation12_spill] sm:$0xff] %v4086_v55 }
 0x248   : > { %v2017_v17 = vpop.f32.mrf.mxu3 }
 0x249   : > { %v2262_v58 = vpop.f32.mrf.mxu0  ;;  %v4066_v46 = vpop.f32.mrf.mxu2  ;;  %v2095_v24 = vadd.f32 %v2017_v17, %v1847_v30  ;;  %v1848_v17 = vadd.f32 %v4009_v29, %v1600_v7  ;;  %v1601_v7 = vadd.f32 %v1526_v40, %v3576_v47 }
 0x24a   : > { %v1528_v2 = vpop.f32.mrf.mxu1  ;;  %v2342_v23 = vadd.f32 %v2262_v58, %v2094_v45  ;;  %v2171_v45 = vpack.c.bf16 %v2148_v51, %v2147_v44 }
 0x24c   : > { %v4072_v25 = vpack.c.bf16 %v2342_v23, %v2342_v23  ;;  %v1924_v23 = vpack.c.bf16 %v1902_v20, %v1901_v35 }
 0x24d   : > { %v4111_v29 = vpop.permute.xlu2 %2573 }
 0x24e   : > { %2415 = vst.msk [vmem:[%s3948_s19 + $0x1c] sm:$0xf] %vm2407_vm2, %v4072_v25 }
 0x250   : > { %v2019_v32 = vpop.f32.mrf.mxu3 }
 0x251   : > { %v2265_v58 = vpop.f32.mrf.mxu0  ;;  %v4088_v13 = vpop.f32.mrf.mxu2 }
 0x252   : > { %v1531_v49 = vpop.f32.mrf.mxu1  ;;  %v2343_v8 = vadd.f32 %v2265_v58, %v2095_v24  ;;  %v2150_v24 = vld [vmem:[%s3240_s22 + $0xfe] sm:$0xff]  ;;  %v1904_v58 = vld [vmem:[%s3240_s22 + $0x10d] sm:$0xff] }
 0x253   : > { %v2172_v55 = vpack.c.bf16 %v2150_v24, %v2149_v21  ;;  %v1603_v24 = vadd.f32 %v1531_v49, %v3612_v26  ;;  %v1661_v26 = vld [vmem:[%s3240_s22 + $0x134] sm:$0xff]  ;;  %v1662_v49 = vld [vmem:[%s3240_s22 + $0x13c] sm:$0xff] }
 0x254   : > { %v4093_v22 = vpack.c.bf16 %v2343_v8, %v2343_v8  ;;  %3157 = vmatmul.msk.bf16.gmra.mxu0 %vm321_vm1, %v2171_v45  ;;  %v1849_v45 = vadd.f32 %v4028_v28, %v1601_v7  ;;  %v1660_v8 = vld [vmem:[%s3240_s22 + $0x12c] sm:$0xff] }
 0x255   : > { %3102 = vmatmul.msk.bf16.gmra.mxu1 %vm321_vm1, %v4012_v11  ;;  %3139 = vmatmul.msk.bf16.gmra.mxu3 %vm321_vm1, %v1924_v23  ;;  %v2096_v11 = vadd.f32 %v2019_v32, %v1848_v17  ;;  %v1903_v32 = vld [vmem:[%s3240_s22 + $0x105] sm:$0xff]  ;;  %v4135_v60 = vpop.permute.xlu2 %2633 }
 0x256   : > { %2416 = vst.msk [vmem:[%s3948_s19 + $0x20] sm:$0xf] %vm2407_vm2, %v4093_v22  ;;  %3122 = vmatmul.msk.bf16.gmra.mxu2 %vm321_vm1, %v4091_v15  ;;  %v1659_v23 = vld [vmem:[%s3240_s22 + $0x124] sm:$0xff]  ;;  %v1925_v40 = vpack.c.bf16 %v1904_v58, %v1903_v32 }
 0x257   : > { %v4131_v56 = vpack.c.bf16 %v1660_v8, %v1659_v23  ;;  %4597 = vst [vmem:[#allocation16_spill] sm:$0xff] %v4135_v60  ;;  %v4156_v23 = vpop.permute.xlu0 %2653  ;;  %v2151_v8 = vld [vmem:[%s3240_s22 + $0x106] sm:$0xff] }
 0x258   : > { %v2022_v44 = vpop.f32.mrf.mxu3  ;;  %4599 = vst [vmem:[#allocation18_spill] sm:$0xff] %v4156_v23 }
 0x259   : > { %v2267_v51 = vpop.f32.mrf.mxu0  ;;  %v4109_v30 = vpop.f32.mrf.mxu2  ;;  %v2097_v17 = vadd.f32 %v2022_v44, %v1849_v45 }
 0x25a   : > { %v1533_v35 = vpop.f32.mrf.mxu1  ;;  %v2344_v20 = vadd.f32 %v2267_v51, %v2096_v11  ;;  %v4128_v51 = vpop.permute.xlu1 %2568 }
 0x25b   : > { %v1604_v60 = vadd.f32 %v1533_v35, %v3625_v9 }
 0x25c   : > { %v4114_v62 = vpack.c.bf16 %v2344_v20, %v2344_v20  ;;  %v1602_v20 = vadd.f32 %v1528_v2, %v3589_v42 }
 0x25e   : > { %2417 = vst.msk [vmem:[%s3948_s19 + $0x24] sm:$0xf] %vm2407_vm2, %v4114_v62  ;;  %v1850_v42 = vadd.f32 %v4045_v43, %v1602_v20  ;;  %v1906_v20 = vld [vmem:[%s3240_s22 + $0x11d] sm:$0xff] }
 0x25f   : > { %v4186_v9 = vpop.permute.xlu0 %2578 }
 0x260   : > { %v2024_v1 = vpop.f32.mrf.mxu3 }
 0x261   : > { %v2270_v47 = vpop.f32.mrf.mxu0  ;;  %v4126_v11 = vpop.f32.mrf.mxu2  ;;  %v2098_v2 = vadd.f32 %v2024_v1, %v1850_v42 }
 0x262   : > { %v1536_v28 = vpop.f32.mrf.mxu1  ;;  %v2345_v7 = vadd.f32 %v2270_v47, %v2097_v17  ;;  %v4152_v32 = vpop.permute.xlu1 %2628  ;;  %v2152_v17 = vld [vmem:[%s3240_s22 + $0x10e] sm:$0xff]  ;;  %v1851_v47 = vadd.f32 %v4066_v46, %v1603_v24  ;;  %v1680_v46 = vpack.c.bf16 %v1662_v49, %v1661_v26  ;;  %v2153_v26 = vld [vmem:[%s3240_s22 + $0x116] sm:$0xff]  ;;  %v2154_v49 = vld [vmem:[%s3240_s22 + $0x11e] sm:$0xff] }
 0x263   : > { %4598 = vst [vmem:[#allocation17_spill] sm:$0xff] %v4152_v32  ;;  %v4160_v1 = vpop.permute.xlu2 %2558 }
 0x264   : > { %v4137_v44 = vpack.c.bf16 %v2345_v7, %v2345_v7  ;;  %3158 = vmatmul.msk.bf16.gmra.mxu0 %vm321_vm1, %v2172_v55 }
 0x265   : > { %3103 = vmatmul.msk.bf16.gmra.mxu1 %vm321_vm1, %v4048_v16  ;;  %3140 = vmatmul.msk.bf16.gmra.mxu3 %vm321_vm1, %v1925_v40  ;;  %v1905_v40 = vld [vmem:[%s3240_s22 + $0x115] sm:$0xff] }
 0x266   : > { %2418 = vst.msk [vmem:[%s3948_s19 + $0x28] sm:$0xf] %vm2407_vm2, %v4137_v44  ;;  %3123 = vmatmul.msk.bf16.gmra.mxu2 %vm321_vm1, %v4131_v56 }
 0x268   : > { %v2027_v55 = vpop.f32.mrf.mxu3 }
 0x269   : > { %v2272_v21 = vpop.f32.mrf.mxu0  ;;  %v4149_v16 = vpop.f32.mrf.mxu2  ;;  %v2099_v7 = vadd.f32 %v2027_v55, %v1851_v47 }
 0x26a   : > { %v1538_v45 = vpop.f32.mrf.mxu1  ;;  %v2346_v43 = vadd.f32 %v2272_v21, %v2098_v2  ;;  %v2173_v2 = vpack.c.bf16 %v2152_v17, %v2151_v8  ;;  %v4179_v55 = vpop.permute.xlu1 %2553  ;;  %v1852_v8 = vadd.f32 %v4088_v13, %v1604_v60 }
 0x26c   : > { %v4154_v58 = vpack.c.bf16 %v2346_v43, %v2346_v43  ;;  %v1926_v43 = vpack.c.bf16 %v1906_v20, %v1905_v40  ;;  %v1605_v40 = vadd.f32 %v1536_v28, %v3644_v27 }
 0x26e   : > { %2419 = vst.msk [vmem:[%s3948_s19 + $0x2c] sm:$0xf] %vm2407_vm2, %v4154_v58 }
 0x270   : > { %v2029_v42 = vpop.f32.mrf.mxu3 }
 0x271   : > { %v2275_v21 = vpop.f32.mrf.mxu0  ;;  %v4170_v32 = vpop.f32.mrf.mxu2 }
 0x272   : > { %v1541_v23 = vpop.f32.mrf.mxu1  ;;  %v2347_v50 = vadd.f32 %v2275_v21, %v2099_v7  ;;  %v1853_v7 = vadd.f32 %v4109_v30, %v1605_v40  ;;  %v1908_v21 = vld [vmem:[%s3240_s22 + $0x12d] sm:$0xff] }
 0x274   : > { %v4173_v24 = vpack.c.bf16 %v2347_v50, %v2347_v50  ;;  %3159 = vmatmul.msk.bf16.gmra.mxu0 %vm321_vm1, %v2173_v2  ;;  %v4188_v50 = vpop.permute.xlu2 %2618  ;;  %v1907_v2 = vld [vmem:[%s3240_s22 + $0x125] sm:$0xff] }
 0x275   : > { %3104 = vmatmul.msk.bf16.gmra.mxu1 %vm321_vm1, %v4091_v15  ;;  %3141 = vmatmul.msk.bf16.gmra.mxu3 %vm321_vm1, %v1926_v43  ;;  %4600 = vst [vmem:[#allocation19_spill] sm:$0xff] %v4188_v50  ;;  %v2100_v15 = vadd.f32 %v2029_v42, %v1852_v8  ;;  %v4200_v43 = vpop.permute.xlu1 %2613  ;;  %v2174_v8 = vpack.c.bf16 %v2154_v49, %v2153_v26  ;;  %v4202_v50 = vpop.permute.xlu0 %2638 }
 0x276   : > { %2420 = vst.msk [vmem:[%s3948_s19 + $0x30] sm:$0xf] %vm2407_vm2, %v4173_v24  ;;  %3124 = vmatmul.msk.bf16.gmra.mxu2 %vm321_vm1, %v1680_v46  ;;  %v1927_v28 = vpack.c.bf16 %v1908_v21, %v1907_v2  ;;  %v1607_v49 = vadd.f32 %v1541_v23, %v3681_v10  ;;  %v1909_v10 = vld [vmem:[%s3240_s22 + $0x135] sm:$0xff]  ;;  %v1910_v23 = vld [vmem:[%s3240_s22 + $0x13d] sm:$0xff]  ;;  %v2456_v31 = vunpack.c.l.bf16 %v4173_v24 }
 0x277   : > { %4601 = vst [vmem:[#allocation20_spill] sm:$0xff] %v4200_v43 }
 0x278   : > { %v2032_v35 = vpop.f32.mrf.mxu3  ;;  %4602 = vst [vmem:[#allocation21_spill] sm:$0xff] %v4202_v50  ;;  %v1928_v50 = vpack.c.bf16 %v1910_v23, %v1909_v10 }
 0x279   : > { %v2277_v17 = vpop.f32.mrf.mxu0  ;;  %v4190_v47 = vpop.f32.mrf.mxu2  ;;  %v2101_v42 = vadd.f32 %v2032_v35, %v1853_v7 }
 0x27a   : > { %v1543_v60 = vpop.f32.mrf.mxu1  ;;  %v2348_v13 = vadd.f32 %v2277_v17, %v2100_v15  ;;  %v1606_v17 = vadd.f32 %v1538_v45, %v3660_v57 }
 0x27b   : > { %v1608_v38 = vadd.f32 %v1543_v60, %v3697_v33 }
 0x27c   : > { %v2384_v20 = vpack.c.bf16 %v2348_v13, %v2348_v13  ;;  %v4204_v15 = vpop.permute.xlu2 %2543  ;;  %v1854_v35 = vadd.f32 %v4126_v11, %v1606_v17 }
 0x27d   : > { %v4221_v21 = vpop.permute.xlu1 %2693 }
 0x27e   : > { %2421 = vst.msk [vmem:[%s3948_s19 + $0x34] sm:$0xf] %vm2407_vm2, %v2384_v20 }
 0x27f   : > { %4603 = vst [vmem:[#allocation22_spill] sm:$0xff] %v4221_v21 }
 0x280   : > { %v2034_v46 = vpop.f32.mrf.mxu3 }
 0x281   : > { %v2280_v27 = vpop.f32.mrf.mxu0  ;;  %v4209_v40 = vpop.f32.mrf.mxu2  ;;  %v2102_v57 = vadd.f32 %v2034_v46, %v1854_v35  ;;  %v1855_v46 = vadd.f32 %v4149_v16, %v1607_v49  ;;  %v2457_v35 = vunpack.c.l.bf16 %v2384_v20 }
 0x282   : > { %v4207_v13 = vpop.f32.mrf.mxu1  ;;  %v2349_v30 = vadd.f32 %v2280_v27, %v2101_v42  ;;  %v2155_v27 = vld [vmem:[%s3240_s22 + $0x126] sm:$0xff] }
 0x283   : > { %v4251_v24 = vmul.f32 %v4074_v48, %v2457_v35 }
 0x284   : > { %v2385_v6 = vpack.c.bf16 %v2349_v30, %v2349_v30  ;;  %3160 = vmatmul.msk.bf16.gmra.mxu0 %vm321_vm1, %v2174_v8  ;;  %v4223_v42 = vpop.permute.xlu2 %2538 }
 0x285   : > { %3105 = vmatmul.msk.bf16.gmra.mxu1 %vm321_vm1, %v4131_v56  ;;  %3142 = vmatmul.msk.bf16.gmra.mxu3 %vm321_vm1, %v1927_v28  ;;  %v2564_v56 = vpop.permute.xlu0 %2563  ;;  %v2156_v28 = vld [vmem:[%s3240_s22 + $0x12e] sm:$0xff]  ;;  %v4253_v33 = vpop.permute.xlu1 %2688 }
 0x286   : > { %2422 = vst.msk [vmem:[%s3948_s19 + $0x38] sm:$0xf] %vm2407_vm2, %v2385_v6  ;;  %v2458_v17 = vunpack.c.l.bf16 %v2385_v6  ;;  %v2175_v43 = vpack.c.bf16 %v2156_v28, %v2155_v27 }
 0x288   : > { %v2037_v45 = vpop.f32.mrf.mxu3  ;;  %v4243_v20 = vmul.f32 %v4058_v39, %v2458_v17  ;;  %v2454_v39 = vunpack.c.l.bf16 %v4137_v44  ;;  %v2158_v17 = vld [vmem:[%s3240_s22 + $0x13e] sm:$0xff] }
 0x289   : > { %v2282_v26 = vpop.f32.mrf.mxu0  ;;  %v4225_v11 = vpop.f32.mrf.mxu2 }
 0x28a   : > { %v4219_v7 = vpop.f32.mrf.mxu1  ;;  %v2350_v2 = vadd.f32 %v2282_v26, %v2102_v57  ;;  %v2103_v57 = vadd.f32 %v2037_v45, %v1855_v46 }
 0x28c   : > { %v2386_v8 = vpack.c.bf16 %v2350_v2, %v2350_v2  ;;  %v2534_v49 = vpop.permute.xlu2 %2533 }
 0x28d   : > { %v4255_v60 = vpop.permute.xlu0 %2623 }
 0x28e   : > { %2423 = vst.msk [vmem:[%s3948_s19 + $0x3c] sm:$0xf] %vm2407_vm2, %v2386_v8  ;;  %v2459_v30 = vunpack.c.l.bf16 %v2386_v8  ;;  %v2453_v8 = vunpack.c.l.bf16 %v4114_v62  ;;  %v4281_v62 = vmul.f32 %v4128_v51, %v2454_v39 }
 0x290   : > { %v4235_v26 = vmul.f32 %v4050_v12, %v2459_v30  ;;  %v2039_v21 = vpop.f32.mrf.mxu3  ;;  %v2455_v12 = vunpack.c.l.bf16 %v4154_v58  ;;  %v1856_v58 = vadd.f32 %v4170_v32, %v1608_v38  ;;  %v2452_v32 = vunpack.c.l.bf16 %v4093_v22  ;;  %v2157_v22 = vld [vmem:[%s3240_s22 + $0x136] sm:$0xff]  ;;  %s3196_s22 = smov 32  }
 0x291   : > { %v2285_v2 = vpop.f32.mrf.mxu0  ;;  %v4267_v48 = vpop.f32.mrf.mxu2 }
 0x292   : > { %v4239_v6 = vpop.f32.mrf.mxu1  ;;  %v2351_v16 = vadd.f32 %v2285_v2, %v2103_v57  ;;  %2736 = vmatpush.msrb.mxu1 %v4235_v26  ;;  %v2104_v27 = vadd.f32 %v2039_v21, %v1856_v58  ;;  %v4272_v38 = vmul.f32 %v4111_v29, %v2455_v12  ;;  %v2451_v21 = vunpack.c.l.bf16 %v4072_v25  ;;  %v4300_v25 = vpop.permute.xlu1 %2683 }
 0x293   : > { %v4287_v29 = vmul.f32 %v2564_v56, %v2453_v8  ;;  %v4298_v51 = vmul.f32 %v4160_v1, %v2452_v32  ;;  %v2449_v56 = vunpack.c.l.bf16 %v4033_v0  ;;  %v2448_v1 = vunpack.c.l.bf16 %v4014_v61 }
 0x294   : > { %v4246_v45 = vpack.c.bf16 %v2351_v16, %v2351_v16  ;;  %3161 = vmatmul.msk.bf16.gmra.mxu0 %vm321_vm1, %v2175_v43  ;;  %2737 = vmatpush.msrb.mxu1 %v4243_v20  ;;  %v4265_v43 = vmul.f32 %v4186_v9, %v2456_v31  ;;  %v1609_v31 = vadd.f32 %v4207_v13, %v3715_v5  ;;  %v2450_v5 = vunpack.c.l.bf16 %v4052_v52  ;;  %v2529_v10 = vpop.permute.xlu2 %2528 }
 0x295   : > { %3143 = vmatmul.msk.bf16.gmra.mxu3 %vm321_vm1, %v1928_v50  ;;  %v2549_v30 = vpop.permute.xlu0 %2548  ;;  %v4305_v52 = vmul.f32 %v4179_v55, %v2451_v21  ;;  %v1610_v12 = vadd.f32 %v4219_v7, %v3735_v53  ;;  %v2447_v58 = vunpack.c.l.bf16 %v3997_v63  ;;  %v4321_v8 = vmul.f32 %v4204_v15, %v2449_v56 }
 0x296   : > { %2424 = vst.msk [vmem:[%s3948_s19 + $0x40] sm:$0xf] %vm2407_vm2, %v4246_v45  ;;  %2738 = vmatpush.msrb.mxu1 %v4251_v24  ;;  %v1857_v13 = vadd.f32 %v4190_v47, %v1609_v31  ;;  %v2176_v47 = vpack.c.bf16 %v2158_v17, %v2157_v22  ;;  %v4310_v16 = vmul.f32 %v2549_v30, %v2450_v5  ;;  %v2446_v61 = vunpack.c.l.bf16 %v3982_v19 }
 0x297   : > { %v4330_v53 = vmul.f32 %v4223_v42, %v2448_v1  ;;  %v2445_v63 = vunpack.c.l.bf16 %v3965_v36  ;;  %v4334_v15 = vmul.f32 %v2534_v49, %v2447_v58  ;;  %v1611_v32 = vadd.f32 %v4239_v6, %v3753_v4 }
 0x298   : > { %v2042_v50 = vpop.f32.mrf.mxu3  ;;  %2739 = vmatpush.msrb.mxu1 %v4265_v43  ;;  %v4340_v42 = vmul.f32 %v2529_v10, %v2446_v61  ;;  %v2811_v4 = vmul.f32 %v4235_v26, %v4235_v26  ;;  %v2810_v30 = vmul.f32 %v4243_v20, %v4243_v20  ;;  %v2806_v1 = vmul.f32 %v4281_v62, %v4281_v62 }
 0x299   : > { %v2287_v44 = vpop.f32.mrf.mxu0  ;;  %v2105_v23 = vadd.f32 %v2042_v50, %v1857_v13  ;;  %v4307_v2 = vpop.f32.mrf.mxu2 }
 0x29a   : > { %v4277_v9 = vpop.f32.mrf.mxu1  ;;  %v2352_v28 = vadd.f32 %v2287_v44, %v2104_v27  ;;  %2740 = vmatpush.msrb.mxu1 %v4272_v38  ;;  %v1858_v27 = vadd.f32 %v4209_v40, %v1610_v12  ;;  %v2524_v19 = vpop.permute.xlu1 %2523  ;;  %v2444_v40 = vunpack.c.l.bf16 %v3950_v59  ;;  %v1859_v59 = vadd.f32 %v4225_v11, %v1611_v32 }
 0x29b   : > { %v4342_v22 = vmul.f32 %v2524_v19, %v2445_v63  ;;  %v1612_v11 = vadd.f32 %v4277_v9, %v3770_v3  ;;  %v2807_v3 = vmul.f32 %v4272_v38, %v4272_v38  ;;  %v2804_v38 = vmul.f32 %v4298_v51, %v4298_v51 }
 0x29c   : > { %v4284_v46 = vpack.c.bf16 %v2352_v28, %v2352_v28  ;;  %2741 = vmatpush.msrb.mxu1 %v4281_v62  ;;  %v2519_v36 = vpop.permute.xlu2 %2518 }
 0x29d   : > { %v4347_v17 = vmul.f32 %v2519_v36, %v2444_v40  ;;  %v2797_v36 = vmul.f32 %v4342_v22, %v4342_v22 }
 0x29e   : > { %2425 = vst.msk [vmem:[%s3948_s19 + $0x44] sm:$0xf] %vm2407_vm2, %v4284_v46  ;;  %2742 = vmatpush.msrb.mxu1 %v4287_v29 }
 0x2a0   : > { %v2044_v35 = vpop.f32.mrf.mxu3  ;;  %2743 = vmatpush.msrb.mxu1 %v4298_v51 }
 0x2a1   : > { %v2290_v57 = vpop.f32.mrf.mxu0  ;;  %v2106_v7 = vadd.f32 %v2044_v35, %v1858_v27  ;;  %v1806_v21 = vpop.f32.mrf.mxu2 }
 0x2a2   : > { %v1556_v0 = vpop.f32.mrf.mxu1  ;;  %v2353_v39 = vadd.f32 %v2290_v57, %v2105_v23  ;;  %2744 = vmatpush.msrb.mxu1 %v4305_v52  ;;  %v2809_v23 = vmul.f32 %v4251_v24, %v4251_v24  ;;  %v1860_v57 = vadd.f32 %v4267_v48, %v1612_v11  ;;  %v2805_v48 = vmul.f32 %v4287_v29, %v4287_v29 }
 0x2a3   : > { %v1613_v12 = vadd.f32 %v1556_v0, %v3785_v37  ;;  %v2803_v37 = vmul.f32 %v4305_v52, %v4305_v52  ;;  %v2802_v29 = vmul.f32 %v4310_v16, %v4310_v16  ;;  %v2800_v52 = vmul.f32 %v4330_v53, %v4330_v53 }
 0x2a4   : > { %v4316_v55 = vpack.c.bf16 %v2353_v39, %v2353_v39  ;;  %3162 = vmatmul.msk.bf16.gmra.mxu0 %vm321_vm1, %v2176_v47  ;;  %2745 = vmatpush.msrb.mxu1 %v4310_v16  ;;  %v2808_v47 = vmul.f32 %v4265_v43, %v4265_v43 }
 0x2a5   : > { %v1861_v61 = vadd.f32 %v4307_v2, %v1613_v12  ;;  %v2801_v2 = vmul.f32 %v4321_v8, %v4321_v8 }
 0x2a6   : > { %2426 = vst.msk [vmem:[%s3948_s19 + $0x48] sm:$0xf] %vm2407_vm2, %v4316_v55  ;;  %2746 = vmatpush.msrb.mxu1 %v4321_v8 }
 0x2a8   : > { %v2047_v50 = vpop.f32.mrf.mxu3  ;;  %2747 = vmatpush.msrb.mxu1 %v4330_v53 }
 0x2a9   : > { %v2292_v44 = vpop.f32.mrf.mxu0  ;;  %v2107_v6 = vadd.f32 %v2047_v50, %v1859_v59  ;;  %v1809_v35 = vpop.f32.mrf.mxu2 }
 0x2aa   : > { %v1558_v31 = vpop.f32.mrf.mxu1  ;;  %v2354_v28 = vadd.f32 %v2292_v44, %v2106_v7  ;;  %2748 = vmatpush.msrb.mxu1 %v4334_v15 }
 0x2ab   : > { %v1614_v51 = vadd.f32 %v1558_v31, %v3799_v18  ;;  %v2799_v18 = vmul.f32 %v4334_v15, %v4334_v15  ;;  %v2798_v31 = vmul.f32 %v4340_v42, %v4340_v42  ;;  %v2796_v15 = vmul.f32 %v4347_v17, %v4347_v17 }
 0x2ac   : > { %v4344_v49 = vpack.c.bf16 %v2354_v28, %v2354_v28  ;;  %2749 = vmatpush.msrb.mxu1 %v4340_v42 }
 0x2ad   : > { %v1862_v44 = vadd.f32 %v1806_v21, %v1614_v51 }
 0x2ae   : > { %2427 = vst.msk [vmem:[%s3948_s19 + $0x4c] sm:$0xf] %vm2407_vm2, %v4344_v49  ;;  %2750 = vmatpush.msrb.mxu1 %v4342_v22 }
 0x2b0   : > { %v2049_v5 = vpop.f32.mrf.mxu3  ;;  %2751 = vmatpush.msrb.mxu1 %v4347_v17 }
 0x2b1   : > { %v2295_v13 = vpop.f32.mrf.mxu0  ;;  %v2108_v20 = vadd.f32 %v2049_v5, %v1860_v57  ;;  %v1811_v62 = vpop.f32.mrf.mxu2 }
 0x2b2   : > { %2832 = vmatpush.msra.mxu1 %v2811_v4  ;;  %v1561_v10 = vpop.f32.mrf.mxu1  ;;  %v2355_v56 = vadd.f32 %v2295_v13, %v2107_v6 }
 0x2b3   : > { %v1615_v28 = vadd.f32 %v1561_v10, %v3811_v54 }
 0x2b4   : > { %2833 = vmatpush.msra.mxu1 %v2810_v30  ;;  %v4363_v26 = vpack.c.bf16 %v2355_v56, %v2355_v56 }
 0x2b5   : > { %v1863_v59 = vadd.f32 %v1809_v35, %v1615_v28 }
 0x2b6   : > { %2834 = vmatpush.msra.mxu1 %v2809_v23  ;;  %2428 = vst.msk [vmem:[%s3948_s19 + $0x50] sm:$0xf] %vm2407_vm2, %v4363_v26 }
 0x2b8   : > { %2835 = vmatpush.msra.mxu1 %v2808_v47  ;;  %v2052_v9 = vpop.f32.mrf.mxu3 }
 0x2b9   : > { %v2297_v24 = vpop.f32.mrf.mxu0  ;;  %v2109_v0 = vadd.f32 %v2052_v9, %v1861_v61  ;;  %v1814_v32 = vpop.f32.mrf.mxu2 }
 0x2ba   : > { %2836 = vmatpush.msra.mxu1 %v2807_v3  ;;  %v2356_v43 = vadd.f32 %v2297_v24, %v2108_v20  ;;  %v1563_v39 = vpop.f32.mrf.mxu1 }
 0x2bb   : > { %v1616_v22 = vadd.f32 %v1563_v39, %v3825_v41 }
 0x2bc   : > { %2837 = vmatpush.msra.mxu1 %v2806_v1  ;;  %v4378_v58 = vpack.c.bf16 %v2356_v43, %v2356_v43 }
 0x2bd   : > { %v1864_v11 = vadd.f32 %v1811_v62, %v1616_v22 }
 0x2be   : > { %2838 = vmatpush.msra.mxu1 %v2805_v48  ;;  %2429 = vst.msk [vmem:[%s3948_s19 + $0x54] sm:$0xf] %vm2407_vm2, %v4378_v58 }
 0x2c0   : > { %2839 = vmatpush.msra.mxu1 %v2804_v38  ;;  %v2054_v27 = vpop.f32.mrf.mxu3 }
 0x2c1   : > { %v2300_v63 = vpop.f32.mrf.mxu0  ;;  %v2110_v16 = vadd.f32 %v2054_v27, %v1862_v44  ;;  %v1816_v13 = vpop.f32.mrf.mxu2 }
 0x2c2   : > { %2840 = vmatpush.msra.mxu1 %v2803_v37  ;;  %v2357_v7 = vadd.f32 %v2300_v63, %v2109_v0  ;;  %v1566_v19 = vpop.f32.mrf.mxu1  ;;  %v4604_v37 = vld [vmem:[#allocation2_spill] sm:$0xff] }
 0x2c3   : > { %v1617_v35 = vadd.f32 %v1566_v19, %v3834_v34 }
 0x2c4   : > { %2841 = vmatpush.msra.mxu1 %v2802_v29  ;;  %v4393_v50 = vpack.c.bf16 %v2357_v7, %v2357_v7 }
 0x2c5   : > { %v1865_v41 = vadd.f32 %v1814_v32, %v1617_v35 }
 0x2c6   : > { %2842 = vmatpush.msra.mxu1 %v2801_v2  ;;  %2430 = vst.msk [vmem:[%s3948_s19 + $0x58] sm:$0xf] %vm2407_vm2, %v4393_v50 }
 0x2c8   : > { %2843 = vmatpush.msra.mxu1 %v2800_v52  ;;  %v2057_v40 = vpop.f32.mrf.mxu3  ;;  %v4605_v52 = vld [vmem:[#allocation3_spill] sm:$0xff] }
 0x2c9   : > { %v2302_v8 = vpop.f32.mrf.mxu0  ;;  %v2111_v42 = vadd.f32 %v2057_v40, %v1863_v59  ;;  %v1819_v3 = vpop.f32.mrf.mxu2 }
 0x2ca   : > { %2844 = vmatpush.msra.mxu1 %v2799_v18  ;;  %v2358_v53 = vadd.f32 %v2302_v8, %v2110_v16  ;;  %v1568_v4 = vpop.f32.mrf.mxu1 }
 0x2cb   : > { %v1618_v1 = vadd.f32 %v1568_v4, %v3842_v14 }
 0x2cc   : > { %2845 = vmatpush.msra.mxu1 %v2798_v31  ;;  %v4407_v21 = vpack.c.bf16 %v2358_v53, %v2358_v53  ;;  %v4606_v53 = vld [vmem:[#allocation4_spill] sm:$0xff] }
 0x2cd   : > { %v1866_v48 = vadd.f32 %v1816_v13, %v1618_v1  ;;  %v4607_v13 = vld [vmem:[#allocation5_spill] sm:$0xff] }
 0x2ce   : > { %2846 = vmatpush.msra.mxu1 %v2797_v36  ;;  %2431 = vst.msk [vmem:[%s3948_s19 + $0x5c] sm:$0xf] %vm2407_vm2, %v4407_v21 }
 0x2d0   : > { %2847 = vmatpush.msra.mxu1 %v2796_v15  ;;  %v2059_v54 = vpop.f32.mrf.mxu3 }
 0x2d1   : > { %v2305_v6 = vpop.f32.mrf.mxu0  ;;  %v2112_v17 = vadd.f32 %v2059_v54, %v1864_v11  ;;  %v1821_v34 = vpop.f32.mrf.mxu2 }
 0x2d2   : > { %v2359_v5 = vadd.f32 %v2305_v6, %v2111_v42  ;;  %v1571_v56 = vpop.f32.mrf.mxu1 }
 0x2d3   : > { %v1619_v0 = vadd.f32 %v1571_v56, %v4604_v37 }
 0x2d4   : > { %v4415_v30 = vpack.c.bf16 %v2359_v5, %v2359_v5 }
 0x2d5   : > { %v1867_v14 = vadd.f32 %v1819_v3, %v1619_v0 }
 0x2d6   : > { %2432 = vst.msk [vmem:[%s3948_s19 + $0x60] sm:$0xf] %vm2407_vm2, %v4415_v30 }
 0x2d8   : > { %v2062_v10 = vpop.f32.mrf.mxu3 }
 0x2d9   : > { %v2307_v23 = vpop.f32.mrf.mxu0  ;;  %v2113_v20 = vadd.f32 %v2062_v10, %v1865_v41  ;;  %v1824_v2 = vpop.f32.mrf.mxu2  ;;  %v4608_v41 = vld [vmem:[#allocation6_spill] sm:$0xff] }
 0x2da   : > { %v2360_v47 = vadd.f32 %v2307_v23, %v2112_v17  ;;  %v1573_v43 = vpop.f32.mrf.mxu1 }
 0x2db   : > { %v1620_v44 = vadd.f32 %v1573_v43, %v4605_v52 }
 0x2dc   : > { %v4421_v57 = vpack.c.bf16 %v2360_v47, %v2360_v47 }
 0x2dd   : > { %v1868_v40 = vadd.f32 %v1821_v34, %v1620_v44 }
 0x2de   : > { %2433 = vst.msk [vmem:[%s3948_s19 + $0x64] sm:$0xf] %vm2407_vm2, %v4421_v57 }
 0x2e0   : > { %v2064_v9 = vpop.f32.mrf.mxu3 }
 0x2e1   : > { %v2310_v24 = vpop.f32.mrf.mxu0  ;;  %v2114_v38 = vadd.f32 %v2064_v9, %v1866_v48  ;;  %v1826_v59 = vpop.f32.mrf.mxu2 }
 0x2e2   : > { %v2361_v12 = vadd.f32 %v2310_v24, %v2113_v20  ;;  %v1576_v63 = vpop.f32.mrf.mxu1 }
 0x2e3   : > { %v1621_v36 = vadd.f32 %v1576_v63, %v4606_v53  ;;  %v2469_v53 = vunpack.c.l.bf16 %v4421_v57 }
 0x2e4   : > { %v4427_v39 = vpack.c.bf16 %v2361_v12, %v2361_v12 }
 0x2e5   : > { %v1869_v42 = vadd.f32 %v1824_v2, %v1621_v36  ;;  %v4611_v2 = vld [vmem:[#allocation15_spill] sm:$0xff] }
 0x2e6   : > { %2434 = vst.msk [vmem:[%s3948_s19 + $0x68] sm:$0xf] %vm2407_vm2, %v4427_v39 }
 0x2e8   : > { %v2067_v61 = vpop.f32.mrf.mxu3 }
 0x2e9   : > { %v2312_v62 = vpop.f32.mrf.mxu0  ;;  %v2115_v51 = vadd.f32 %v2067_v61, %v1867_v14  ;;  %v1829_v56 = vpop.f32.mrf.mxu2  ;;  %v4610_v14 = vld [vmem:[#allocation7_spill] sm:$0xff] }
 0x2ea   : > { %v2362_v27 = vadd.f32 %v2312_v62, %v2114_v38  ;;  %v1578_v32 = vpop.f32.mrf.mxu1  ;;  %v4609_v62 = vld [vmem:[#allocation14_spill] sm:$0xff] }
 0x2eb   : > { %v1622_v11 = vadd.f32 %v1578_v32, %v4607_v13 }
 0x2ec   : > { %v4433_v29 = vpack.c.bf16 %v2362_v27, %v2362_v27 }
 0x2ed   : > { %v1870_v23 = vadd.f32 %v1826_v59, %v1622_v11  ;;  %v2467_v11 = vunpack.c.l.bf16 %v4407_v21  ;;  %v2465_v21 = vunpack.c.l.bf16 %v4378_v58 }
 0x2ee   : > { %2435 = vst.msk [vmem:[%s3948_s19 + $0x6c] sm:$0xf] %vm2407_vm2, %v4433_v29  ;;  %v2471_v52 = vunpack.c.l.bf16 %v4433_v29  ;;  %v2609_v29 = vpop.permute.xlu0 %2608 }
 0x2f0   : > { %v2069_v7 = vpop.f32.mrf.mxu3 }
 0x2f1   : > { %v2315_v19 = vpop.f32.mrf.mxu0  ;;  %v2116_v8 = vadd.f32 %v2069_v7, %v1868_v40  ;;  %v1831_v34 = vpop.f32.mrf.mxu2 }
 0x2f2   : > { %v2363_v18 = vadd.f32 %v2315_v19, %v2115_v51  ;;  %v1581_v22 = vpop.f32.mrf.mxu1 }
 0x2f3   : > { %v1623_v20 = vadd.f32 %v1581_v22, %v4608_v41 }
 0x2f4   : > { %v2399_v16 = vpack.c.bf16 %v2363_v18, %v2363_v18  ;;  %v4612_v18 = vld [vmem:[#allocation10_spill] sm:$0xff] }
 0x2f5   : > { %v1871_v12 = vadd.f32 %v1829_v56, %v1623_v20  ;;  %v4619_v20 = vld [vmem:[#allocation16_spill] sm:$0xff] }
 0x2f6   : > { %2436 = vst.msk [vmem:[%s3948_s19 + $0x70] sm:$0xf] %vm2407_vm2, %v2399_v16  ;;  %v2472_v63 = vunpack.c.l.bf16 %v2399_v16  ;;  %v2470_v16 = vunpack.c.l.bf16 %v4427_v39 }
 0x2f8   : > { %v2072_v31 = vpop.f32.mrf.mxu3 }
 0x2f9   : > { %v2317_v28 = vpop.f32.mrf.mxu0  ;;  %v2117_v54 = vadd.f32 %v2072_v31, %v1869_v42  ;;  %v4613_v31 = vld [vmem:[#allocation11_spill] sm:$0xff]  ;;  %v1834_v39 = vpop.f32.mrf.mxu2  ;;  %v2468_v42 = vunpack.c.l.bf16 %v4415_v30  ;;  %v2466_v30 = vunpack.c.l.bf16 %v4393_v50 }
 0x2fa   : > { %v2364_v15 = vadd.f32 %v2317_v28, %v2116_v8  ;;  %v1583_v24 = vpop.f32.mrf.mxu1  ;;  %v4471_v28 = vmul.f32 %v4613_v31, %v2472_v63  ;;  %v2604_v50 = vpop.permute.xlu0 %2603 }
 0x2fb   : > { %v1624_v51 = vadd.f32 %v1583_v24, %v4610_v14  ;;  %v4622_v14 = vld [vmem:[#allocation19_spill] sm:$0xff] }
 0x2fc   : > { %v2400_v4 = vpack.c.bf16 %v2364_v15, %v2364_v15  ;;  %v4614_v15 = vld [vmem:[#allocation18_spill] sm:$0xff] }
 0x2fd   : > { %v1872_v8 = vadd.f32 %v1831_v34, %v1624_v51  ;;  %v4476_v59 = vmul.f32 %v4614_v15, %v2471_v52  ;;  %v4621_v34 = vld [vmem:[#allocation17_spill] sm:$0xff] }
 0x2fe   : > { %2437 = vst.msk [vmem:[%s3948_s19 + $0x74] sm:$0xf] %vm2407_vm2, %v2400_v4  ;;  %v2473_v38 = vunpack.c.l.bf16 %v2400_v4 }
 0x300   : > { %v2074_v6 = vpop.f32.mrf.mxu3  ;;  %v4463_v40 = vmul.f32 %v4612_v18, %v2473_v38  ;;  %v4508_v38 = vmul.f32 %v4621_v34, %v2466_v30  ;;  %v3195_v18 = vmov 1.0  }
 0x301   : > { %v2320_v5 = vpop.f32.mrf.mxu0  ;;  %v2118_v35 = vadd.f32 %v2074_v6, %v1870_v23  ;;  %v1836_v58 = vpop.f32.mrf.mxu2  ;;  %2752 = vmatmul.f32.vlgmr.msrb.gmra.mxu1 %v3195_v18 }
 0x302   : > { %v2365_v17 = vadd.f32 %v2320_v5, %v2117_v54  ;;  %v1586_v32 = vpop.f32.mrf.mxu1  ;;  %v4615_v54 = vld [vmem:[#allocation8_spill] sm:$0xff] }
 0x303   : > { %v1625_v6 = vadd.f32 %v1586_v32, %v4615_v54  ;;  %v4616_v5 = vld [vmem:[#allocation12_spill] sm:$0xff] }
 0x304   : > { %v2401_v10 = vpack.c.bf16 %v2365_v17, %v2365_v17  ;;  %v4482_v13 = vmul.f32 %v4616_v5, %v2470_v16 }
 0x305   : > { %v1873_v23 = vadd.f32 %v1834_v39, %v1625_v6 }
 0x306   : > { %2438 = vst.msk [vmem:[%s3948_s19 + $0x78] sm:$0xf] %vm2407_vm2, %v2401_v10  ;;  %v2474_v43 = vunpack.c.l.bf16 %v2401_v10  ;;  %v4617_v10 = vld [vmem:[#allocation13_spill] sm:$0xff] }
 0x307   : > { %v4489_v56 = vmul.f32 %v4617_v10, %v2469_v53  ;;  %v2818_v10 = vmul.f32 %v4508_v38, %v4508_v38 }
 0x308   : > { %v2077_v47 = vpop.f32.mrf.mxu3  ;;  %v4456_v19 = vmul.f32 %v4611_v2, %v2474_v43  ;;  %v4623_v2 = vld [vmem:[#allocation20_spill] sm:$0xff] }
 0x309   : > { %v2322_v3 = vpop.f32.mrf.mxu0  ;;  %v2119_v61 = vadd.f32 %v2077_v47, %v1871_v12  ;;  %v4620_v12 = vld [vmem:[#allocation9_spill] sm:$0xff]  ;;  %2848 = vmatmul.f32.vlgmr.msra.gmra.mxu1 %v3195_v18 }
 0x30a   : > { %v2366_v9 = vadd.f32 %v2322_v3, %v2118_v35  ;;  %v4618_v35 = vld [vmem:[#allocation21_spill] sm:$0xff]  ;;  %v1588_v3 = vpop.f32.mrf.mxu1 }
 0x30b   : > { %v4497_v47 = vmul.f32 %v4618_v35, %v2468_v42  ;;  %v1626_v43 = vadd.f32 %v1588_v3, %v4620_v12 }
 0x30c   : > { %v2402_v1 = vpack.c.bf16 %v2366_v9, %v2366_v9  ;;  %v4502_v9 = vmul.f32 %v4619_v20, %v2467_v11 }
 0x30d   : > { %v1874_v63 = vadd.f32 %v1836_v58, %v1626_v43 }
 0x30e   : > { %2439 = vst.msk [vmem:[%s3948_s19 + $0x7c] sm:$0xf] %vm2407_vm2, %v2402_v1  ;;  %v2475_v48 = vunpack.c.l.bf16 %v2402_v1  ;;  %v2464_v1 = vunpack.c.l.bf16 %v4363_v26  ;;  %v2462_v26 = vunpack.c.l.bf16 %v4316_v55  ;;  %v2460_v55 = vunpack.c.l.bf16 %v4246_v45  ;;  %v4624_v45 = vld [vmem:[#allocation22_spill] sm:$0xff] }
 0x310   : > { %v4451_v37 = vmul.f32 %v4609_v62, %v2475_v48  ;;  %v2079_v0 = vpop.f32.mrf.mxu3  ;;  %v4520_v51 = vmul.f32 %v4622_v14, %v2464_v1  ;;  %v2714_v16 = vmul.f32 %v2609_v29, %v2462_v26  ;;  %v2826_v29 = vmul.f32 %v4456_v19, %v4456_v19 }
 0x311   : > { %v2325_v27 = vpop.f32.mrf.mxu0  ;;  %v2120_v36 = vadd.f32 %v2079_v0, %v1872_v8  ;;  %v4513_v0 = vmul.f32 %v4255_v60, %v2465_v21  ;;  %v2599_v8 = vpop.permute.xlu0 %2598 }
 0x312   : > { %v2367_v7 = vadd.f32 %v2325_v27, %v2119_v61  ;;  %2756 = vmatpush.msrb.mxu2 %v4451_v37  ;;  %v2463_v61 = vunpack.c.l.bf16 %v4344_v49  ;;  %v2712_v53 = vmul.f32 %v2599_v8, %v2460_v55  ;;  %v2827_v39 = vmul.f32 %v4451_v37, %v4451_v37 }
 0x313   : > { %v2825_v37 = vmul.f32 %v4463_v40, %v4463_v40  ;;  %v2816_v30 = vmul.f32 %v4520_v51, %v4520_v51  ;;  %v2814_v35 = vmul.f32 %v2714_v16, %v2714_v16 }
 0x314   : > { %v4459_v44 = vpack.c.bf16 %v2367_v7, %v2367_v7  ;;  %2757 = vmatpush.msrb.mxu2 %v4456_v19  ;;  %v2461_v7 = vunpack.c.l.bf16 %v4284_v46  ;;  %v4525_v60 = vmul.f32 %v4623_v2, %v2463_v61  ;;  %v2824_v19 = vmul.f32 %v4471_v28, %v4471_v28 }
 0x315   : > { %v2812_v3 = vmul.f32 %v2712_v53, %v2712_v53 }
 0x316   : > { %2440 = vst.msk [vmem:[%s3948_s19 + $0x80] sm:$0xf] %vm2407_vm2, %v4459_v44  ;;  %2758 = vmatpush.msrb.mxu2 %v4463_v40  ;;  %v2713_v46 = vmul.f32 %v2604_v50, %v2461_v7  ;;  %v2476_v54 = vunpack.c.l.bf16 %v4459_v44  ;;  %v2822_v40 = vmul.f32 %v4482_v13, %v4482_v13 }
 0x318   : > { %2759 = vmatpush.msrb.mxu2 %v4471_v28  ;;  %v2082_v57 = vpop.f32.mrf.mxu3  ;;  %v2821_v28 = vmul.f32 %v4489_v56, %v4489_v56 }
 0x319   : > { %v2327_v4 = vpop.f32.mrf.mxu0  ;;  %v2121_v41 = vadd.f32 %v2082_v57, %v1873_v23  ;;  %v2679_v5 = vpop.permute.xlu0 %2678  ;;  %v2815_v23 = vmul.f32 %v4525_v60, %v4525_v60 }
 0x31a   : > { %v2368_v22 = vadd.f32 %v2327_v4, %v2120_v36  ;;  %2760 = vmatpush.msrb.mxu2 %v4476_v59  ;;  %v2728_v57 = vmul.f32 %v2679_v5, %v2476_v54 }
 0x31c   : > { %v4485_v17 = vpack.c.bf16 %v2368_v22, %v2368_v22  ;;  %2761 = vmatpush.msrb.mxu2 %v4482_v13  ;;  %v2819_v13 = vmul.f32 %v4502_v9, %v4502_v9 }
 0x31e   : > { %2441 = vst.msk [vmem:[%s3948_s19 + $0x84] sm:$0xf] %vm2407_vm2, %v4485_v17  ;;  %2762 = vmatpush.msrb.mxu2 %v4489_v56  ;;  %v2477_v4 = vunpack.c.l.bf16 %v4485_v17  ;;  %v2828_v17 = vmul.f32 %v2728_v57, %v2728_v57  ;;  %v2817_v56 = vmul.f32 %v4513_v0, %v4513_v0 }
 0x320   : > { %2763 = vmatpush.msrb.mxu2 %v4497_v47  ;;  %v2084_v27 = vpop.f32.mrf.mxu3  ;;  %v2729_v22 = vmul.f32 %v4300_v25, %v2477_v4 }
 0x321   : > { %v2330_v24 = vpop.f32.mrf.mxu0  ;;  %v2122_v49 = vadd.f32 %v2084_v27, %v1874_v63 }
 0x322   : > { %v2369_v48 = vadd.f32 %v2330_v24, %v2121_v41  ;;  %2764 = vmatpush.msrb.mxu2 %v4502_v9  ;;  %v2829_v11 = vmul.f32 %v2729_v22, %v2729_v22 }
 0x324   : > { %v2405_v62 = vpack.c.bf16 %v2369_v48, %v2369_v48  ;;  %2765 = vmatpush.msrb.mxu2 %v4508_v38 }
 0x326   : > { %2442 = vst.msk [vmem:[%s3948_s19 + $0x88] sm:$0xf] %vm2407_vm2, %v2405_v62  ;;  %2766 = vmatpush.msrb.mxu2 %v4513_v0  ;;  %v2478_v36 = vunpack.c.l.bf16 %v2405_v62 }
 0x328   : > { %2767 = vmatpush.msrb.mxu2 %v4520_v51  ;;  %v2730_v6 = vmul.f32 %v4253_v33, %v2478_v36  ;;  %v2823_v33 = vmul.f32 %v4476_v59, %v4476_v59  ;;  %v2820_v59 = vmul.f32 %v4497_v47, %v4497_v47  ;;  %v2813_v47 = vmul.f32 %v2713_v46, %v2713_v46 }
 0x329   : > { %v2332_v52 = vpop.f32.mrf.mxu0 }
 0x32a   : > { %v2370_v32 = vadd.f32 %v2332_v52, %v2122_v49  ;;  %2768 = vmatpush.msrb.mxu2 %v4525_v60  ;;  %v2830_v25 = vmul.f32 %v2730_v6, %v2730_v6 }
 0x32c   : > { %v2406_v31 = vpack.c.bf16 %v2370_v32, %v2370_v32  ;;  %2769 = vmatpush.msrb.mxu2 %v2714_v16 }
 0x32e   : > { %2443 = vst.msk [vmem:[%s3948_s19 + $0x8c] sm:$0xf] %vm2407_vm2, %v2406_v31  ;;  %v2479_v15 = vunpack.c.l.bf16 %v2406_v31  ;;  %2770 = vmatpush.msrb.mxu2 %v2713_v46 }
 0x330   : > { %v2731_v42 = vmul.f32 %v4624_v45, %v2479_v15  ;;  %2771 = vmatpush.msrb.mxu2 %v2712_v53 }
 0x331   : > { %2772 = vmatmul.f32.vlgmr.msrb.gmra.mxu2 %v3195_v18 }
 0x332   : > { %2852 = vmatpush.msra.mxu2 %v2827_v39  ;;  %2788 = vmatpush.msrb.mxu3 %v2731_v42  ;;  %v2831_v44 = vmul.f32 %v2731_v42, %v2731_v42 }
 0x334   : > { %2853 = vmatpush.msra.mxu2 %v2826_v29  ;;  %2789 = vmatpush.msrb.mxu3 %v2730_v6 }
 0x336   : > { %2854 = vmatpush.msra.mxu2 %v2825_v37  ;;  %2790 = vmatpush.msrb.mxu3 %v2729_v22 }
 0x338   : > { %2855 = vmatpush.msra.mxu2 %v2824_v19  ;;  %2791 = vmatpush.msrb.mxu3 %v2728_v57 }
 0x339   : > { %3163 = vmatmul.msk.f32.vlgmr.msrb.gmra.mxu3 %vm2732_vm3, %v3195_v18 }
 0x33a   : > { %2856 = vmatpush.msra.mxu2 %v2823_v33  ;;  %2884 = vmatpush.msra.mxu3 %v2831_v44 }
 0x33c   : > { %2857 = vmatpush.msra.mxu2 %v2822_v40  ;;  %2885 = vmatpush.msra.mxu3 %v2830_v25 }
 0x33e   : > { %2858 = vmatpush.msra.mxu2 %v2821_v28  ;;  %2886 = vmatpush.msra.mxu3 %v2829_v11 }
 0x340   : > { %2859 = vmatpush.msra.mxu2 %v2820_v59  ;;  %2887 = vmatpush.msra.mxu3 %v2828_v17 }
 0x341   : > { %3164 = vmatmul.msk.f32.vlgmr.msra.gmra.mxu3 %vm2732_vm3, %v3195_v18 }
 0x342   : > { %2860 = vmatpush.msra.mxu2 %v2819_v13 }
 0x344   : > { %2861 = vmatpush.msra.mxu2 %v2818_v10 }
 0x346   : > { %2862 = vmatpush.msra.mxu2 %v2817_v56 }
 0x348   : > { %2863 = vmatpush.msra.mxu2 %v2816_v30 }
 0x34a   : > { %2864 = vmatpush.msra.mxu2 %v2815_v23 }
 0x34c   : > { %2865 = vmatpush.msra.mxu2 %v2814_v35 }
 0x34e   : > { %2866 = vmatpush.msra.mxu2 %v2813_v47 }
 0x350   : > { %2867 = vmatpush.msra.mxu2 %v2812_v3 }
 0x351   : > { %2868 = vmatmul.f32.vlgmr.msra.gmra.mxu2 %v3195_v18 }
 0x37e   : > { %v2753_v21 = vpop.f32.mrf.mxu1 }
 0x386   : > { %v2849_v24 = vpop.f32.mrf.mxu1 }
 0x3b4   : > { %v2773_v41 = vpop.f32.mrf.mxu2 }
 0x3b5   : > { %v2774_v20 = vadd.f32 %v2773_v41, %v2753_v21 }
 0x3bc   : > { %v2793_v9 = vpop.f32.mrf.mxu3 }
 0x3bd   : > { %v2794_v50 = vadd.f32 %v2793_v9, %v2774_v20 }
 0x3c4   : > { %v2889_v12 = vpop.f32.mrf.mxu3 }
 0x3d4   : > { %v2869_v1 = vpop.f32.mrf.mxu2 }
 0x3d5   : > { %v2870_v43 = vadd.f32 %v2869_v1, %v2849_v24 }
 0x3d7   : > { %v2890_v48 = vadd.f32 %v2889_v12, %v2870_v43 }
 0x3d9   : > { %2893 = vrot.lane.b32.xlu0 %v2890_v48, %s3196_s22 }
 0x44b   : > { %v2894_v34 = vpop.permute.xlu0 %2893 }
 0x44c   : > { %v2896_v38 = vsel %vm2732_vm3, %v2794_v50, %v2894_v34 }
 0x44d   : > { %2898 = vst.msk [vmem:[%s208_s26] sm:$0xff] %vm2897_vm4, %v2896_v38 }
 0x44e PF: > { %s15_s15 = sadd.s32 1, %s3192_s15  }
 0x44f   : > { %p12_p4 = scmp.ge.s32.totalorder %s15_s15, 4  }
 0x451   :  { %14 = sbr.rel (!%p12_p4) target bundleno = 1 (0x1), region = 82 }

</bundles_post_ra>
